<compile_context>
chip_gen: v7x
topology: tpu7x:2x2x1
jax: 0.10.0
libtpu: 0.0.40
codegen_flags: <defaults>
</compile_context>

<pallas_src>
import functools

import jax
import jax.numpy as jnp
from jax import lax
from jax.experimental import pallas as pl
from jax.experimental.pallas import tpu as pltpu


def _round_up(x, m):
    return ((x + m - 1) // m) * m


def _regroup_gates(a):
    """Reorder the last (4H) axis from PyTorch gate order (i,f,g,o) to (i,f,o,g)."""
    H = a.shape[-1] // 4
    return jnp.concatenate([a[..., :2 * H], a[..., 3 * H:], a[..., 2 * H:3 * H]],
                           axis=-1)


# ------------------------------ Fused forward kernel --------------------------
def _fused_forward_kernel(x_ref, gamma_ref, beta_ref, len_ref, *rest, num_layers):
    """rest = [wih_0,whh_0,b_0, ..., wih_{L-1},whh_{L-1},b_{L-1}, fc_wT, fc_b,
               out_ref, gx_scratch, seq_scratch]"""
    layer_refs = rest[:3 * num_layers]
    fcw_ref, fcb_ref, out_ref, gx_s, seq_s = rest[3 * num_layers:]

    B = len_ref.shape[0]                       # padded batch (multiple of 16)
    TB = x_ref.shape[0]
    T = TB // B
    H = seq_s.shape[1]

    lengths = len_ref[...]                     # (B, 1) int32

    # ---- LayerNorm (eps=1e-5) over the embedding dim, all T*B rows at once.
    # The result is written straight into the sequence scratch (layer-0 input),
    # so it does not duplicate the input block as a second live value.
    x = x_ref[...].astype(jnp.float32)         # (T*B, E), E == H
    mean = jnp.mean(x, axis=-1, keepdims=True)
    var = jnp.mean(jnp.square(x - mean), axis=-1, keepdims=True)
    xn = (x - mean) * lax.rsqrt(var + 1e-5) * gamma_ref[...] + beta_ref[...]
    seq_s[...] = xn.astype(seq_s.dtype)

    h = jnp.zeros((B, H), jnp.float32)

    for l in range(num_layers):
        wih_ref, whh_ref, bias_ref = layer_refs[3 * l:3 * l + 3]

        # Batched input-side gate projection for ALL time steps in one bf16 MXU
        # matmul; the combined bias (b_ih + b_hh) is folded in once (hoisted out
        # of the recurrence). Input is the previous layer's sequence (or the LN'd
        # embeddings for layer 0), already bf16 in VMEM scratch.
        gx_s[...] = (jnp.dot(seq_s[...], wih_ref[...],
                             preferred_element_type=jnp.float32)
                     + bias_ref[...]).astype(gx_s.dtype)          # (T*B, 4H)

        whh = whh_ref[...]                     # (H, 4H) bf16, resident across loop
        write_seq = l < num_layers - 1         # last layer's sequence is unused

        def step(t, carry, whh=whh, write_seq=write_seq):
            h, c = carry
            row = pl.multiple_of(t * B, B)     # sublane-tile-aligned slice start
            # bf16 operands into the MXU, f32 accumulation + f32 elementwise.
            gates = gx_s[pl.ds(row, B), :].astype(jnp.float32) + jnp.dot(
                h.astype(jnp.bfloat16), whh,
                preferred_element_type=jnp.float32)               # (B, 4H)

            # Regrouped gate order (i, f, o | g): sigmoid over 3H, tanh over H.
            sig = jax.nn.sigmoid(gates[:, :3 * H])
            g_g = jnp.tanh(gates[:, 3 * H:])
            i_g = sig[:, 0 * H:1 * H]
            f_g = sig[:, 1 * H:2 * H]
            o_g = sig[:, 2 * H:3 * H]

            c_new = f_g * c + i_g * g_g
            h_new = o_g * jnp.tanh(c_new)

            valid = lengths > t                # (B, 1) -> broadcast over H
            h = jnp.where(valid, h_new, h)
            c = jnp.where(valid, c_new, c)
            if write_seq:
                seq_s[pl.ds(row, B), :] = h.astype(seq_s.dtype)
            return (h, c)

        h, _ = lax.fori_loop(
            0, T, step,
            (jnp.zeros((B, H), jnp.float32), jnp.zeros((B, H), jnp.float32)),
            unroll=min(T, 8))                  # partial unroll: LLO visibility
                                               # without vreg-spill blowup at big T

    # ---- FC: lane-dense (B, L_pad) output slab; wrapper slices to num_labels ----
    out_ref[...] = (jnp.dot(h, fcw_ref[...], preferred_element_type=jnp.float32)
                    + fcb_ref[...]).astype(out_ref.dtype)


# ------------------------------ Parameter preparation --------------------------
def prepare_params(raw, num_layers):
    """One-time weight prep: transpose, regroup gates (i,f,g,o)->(i,f,o,g), fold
    b_ih+b_hh, cast MXU weights to bf16, pad FC to a lane-dense width."""
    H = raw["w_hh_0"].shape[1]
    L = raw["fc_w"].shape[0]
    L_pad = _round_up(max(L, 1), 128)
    prep = {
        "embedding": raw["embedding"],
        "ln_gamma": raw["ln_gamma"].reshape(1, -1),
        "ln_beta": raw["ln_beta"].reshape(1, -1),
        "fc_wT": jnp.pad(jnp.transpose(raw["fc_w"]), ((0, 0), (0, L_pad - L))),
        "fc_b": jnp.pad(raw["fc_b"], (0, L_pad - L)).reshape(1, L_pad),
    }
    for l in range(num_layers):
        prep[f"wih_{l}"] = _regroup_gates(
            jnp.transpose(raw[f"w_ih_{l}"])).astype(jnp.bfloat16)   # (in, 4H)
        prep[f"whh_{l}"] = _regroup_gates(
            jnp.transpose(raw[f"w_hh_{l}"])).astype(jnp.bfloat16)   # (H, 4H)
        prep[f"b_{l}"] = _regroup_gates(
            raw[f"b_ih_{l}"] + raw[f"b_hh_{l}"]).reshape(1, 4 * H)  # f32
    return prep


# ----------------------------------- Forward -----------------------------------
def lstm_text_classifier_forward(prep, text, text_mask, *, num_layers, num_labels):
    B, T = text.shape
    E = prep["embedding"].shape[1]
    H = prep["whh_0"].shape[0]
    L_pad = prep["fc_wT"].shape[1]
    # The module applies LayerNorm(hidden_dim) to the embedding output, which
    # implies embedding_dim == hidden_dim; the fused kernel relies on that to
    # reuse the sequence scratch as the layer-0 input.
    assert E == H, "LSTMTextClassifier implies embedding_dim == hidden_dim"

    # Pad batch to a multiple of 16 so per-step dynamic slices of the bf16
    # scratches (16 rows per sublane tile) stay tile-aligned.
    B_pad = max(16, _round_up(B, 16))

    # Embedding lookup (gather) stays in XLA glue, done time-major directly so no
    # activation transpose is materialized before the kernel.
    emb_tm = jnp.take(prep["embedding"], jnp.transpose(text), axis=0)   # (T, B, E)

    lengths = jnp.maximum(jnp.sum(text_mask.astype(jnp.int32), axis=1), 1)

    # Padded batch rows get length 0 -> their state stays 0 and they are sliced
    # away from the logits.
    x = jnp.pad(emb_tm, ((0, 0), (0, B_pad - B), (0, 0)))
    x2d = x.reshape(T * B_pad, E).astype(jnp.float32)
    len2d = jnp.pad(lengths, (0, B_pad - B)).reshape(B_pad, 1).astype(jnp.int32)

    operands = [x2d, prep["ln_gamma"], prep["ln_beta"], len2d]
    in_specs = [
        pl.BlockSpec((T * B_pad, E), lambda i: (0, 0)),
        pl.BlockSpec((1, E), lambda i: (0, 0)),
        pl.BlockSpec((1, E), lambda i: (0, 0)),
        pl.BlockSpec((B_pad, 1), lambda i: (0, 0)),
    ]
    for l in range(num_layers):
        in_dim = prep[f"wih_{l}"].shape[0]
        operands += [prep[f"wih_{l}"], prep[f"whh_{l}"], prep[f"b_{l}"]]
        in_specs += [
            pl.BlockSpec((in_dim, 4 * H), lambda i: (0, 0)),
            pl.BlockSpec((H, 4 * H), lambda i: (0, 0)),
            pl.BlockSpec((1, 4 * H), lambda i: (0, 0)),
        ]
    operands += [prep["fc_wT"], prep["fc_b"]]
    in_specs += [
        pl.BlockSpec((H, L_pad), lambda i: (0, 0)),
        pl.BlockSpec((1, L_pad), lambda i: (0, 0)),
    ]

    kernel = functools.partial(_fused_forward_kernel, num_layers=num_layers)

    # Explicit VMEM budget from the actual footprint (bf16 scratches), capped at
    # 64 MiB so the same numbers hold on v7x.
    scratch_bytes = T * B_pad * 4 * H * 2 + T * B_pad * H * 2
    operand_bytes = sum(int(o.size) * o.dtype.itemsize for o in operands)
    out_bytes = B_pad * L_pad * 4
    vmem_limit = int(min(64 << 20,
                         max(16 << 20,
                             2 * (scratch_bytes + operand_bytes + out_bytes)
                             + (1 << 20))))

    logits_pad = pl.pallas_call(
        kernel,
        out_shape=jax.ShapeDtypeStruct((B_pad, L_pad), jnp.float32),
        grid=(1,),
        in_specs=in_specs,
        out_specs=pl.BlockSpec((B_pad, L_pad), lambda i: (0, 0)),
        scratch_shapes=[
            pltpu.VMEM((T * B_pad, 4 * H), jnp.bfloat16),  # batched gate projections
            pltpu.VMEM((T * B_pad, H), jnp.bfloat16),      # per-layer output sequence
        ],
        compiler_params=pltpu.CompilerParams(
            dimension_semantics=("arbitrary",),
            vmem_limit_bytes=vmem_limit),
    )(*operands)

    return logits_pad[:B, :num_labels]


# -------------------------- Pure-JAX reference check ---------------------------
def ref_forward(params, text, text_mask, num_layers):
    emb = jnp.take(params["embedding"], text, axis=0)
    mean = emb.mean(-1, keepdims=True)
    var = ((emb - mean) ** 2).mean(-1, keepdims=True)
    emb = (emb - mean) / jnp.sqrt(var + 1e-5) * params["ln_gamma"] + params["ln_beta"]
    lengths = jnp.maximum(jnp.sum(text_mask.astype(jnp.int32), axis=1), 1)
    x = jnp.transpose(emb, (1, 0, 2))
    T, B, _ = x.shape
    h_last = None
    for l in range(num_layers):
        w_ih, w_hh = params[f"w_ih_{l}"], params[f"w_hh_{l}"]
        b = params[f"b_ih_{l}"] + params[f"b_hh_{l}"]
        H = w_hh.shape[1]

        def step(carry, inp, w_ih=w_ih, w_hh=w_hh, b=b, H=H):
            h, c = carry
            x_t, t = inp
            gates = x_t @ w_ih.T + h @ w_hh.T + b
            i = jax.nn.sigmoid(gates[:, :H])
            f = jax.nn.sigmoid(gates[:, H:2 * H])
            g = jnp.tanh(gates[:, 2 * H:3 * H])
            o = jax.nn.sigmoid(gates[:, 3 * H:])
            c_new = f * c + i * g
            h_new = o * jnp.tanh(c_new)
            valid = (lengths > t)[:, None]
            h = jnp.where(valid, h_new, h)
            c = jnp.where(valid, c_new, c)
            return (h, c), h

        (h_last, _), outs = lax.scan(
            step,
            (jnp.zeros((B, H), jnp.float32), jnp.zeros((B, H), jnp.float32)),
            (x, jnp.arange(T)))
        x = outs
    return h_last @ params["fc_w"].T + params["fc_b"]


# ----------------------------------- Main --------------------------------------
if __name__ == "__main__":
    # Small "args" consistent with the module (embedding_dim == hidden_dim).
    vocab_size, embedding_dim, hidden_dim = 50, 32, 32
    num_layers, num_labels, pad_idx = 2, 4, 0
    B, T = 4, 8

    key = jax.random.PRNGKey(0)
    keys = jax.random.split(key, 16)

    params = {}
    emb_tbl = 0.1 * jax.random.normal(keys[0], (vocab_size, embedding_dim), jnp.float32)
    params["embedding"] = emb_tbl.at[pad_idx].set(0.0)          # padding_idx row = 0
    params["ln_gamma"] = jnp.ones((hidden_dim,), jnp.float32)
    params["ln_beta"] = jnp.zeros((hidden_dim,), jnp.float32)
    kidx = 1
    for l in range(num_layers):
        in_dim = embedding_dim if l == 0 else hidden_dim
        params[f"w_ih_{l}"] = 0.1 * jax.random.normal(keys[kidx], (4 * hidden_dim, in_dim), jnp.float32); kidx += 1
        params[f"w_hh_{l}"] = 0.1 * jax.random.normal(keys[kidx], (4 * hidden_dim, hidden_dim), jnp.float32); kidx += 1
        params[f"b_ih_{l}"] = 0.05 * jax.random.normal(keys[kidx], (4 * hidden_dim,), jnp.float32); kidx += 1
        params[f"b_hh_{l}"] = 0.05 * jax.random.normal(keys[kidx], (4 * hidden_dim,), jnp.float32); kidx += 1
    params["fc_w"] = 0.1 * jax.random.normal(keys[kidx], (num_labels, hidden_dim), jnp.float32); kidx += 1
    params["fc_b"] = 0.05 * jax.random.normal(keys[kidx], (num_labels,), jnp.float32)

    # Deterministic inputs: variable lengths (including one all-pad row -> clamped to 1).
    lengths = jnp.array([8, 5, 3, 0], dtype=jnp.int32)
    pos = jnp.arange(T, dtype=jnp.int32)[None, :]
    text_mask = (pos < lengths[:, None]).astype(jnp.int32)       # (B, T)
    tokens = jax.random.randint(keys[kidx + 1], (B, T), 1, vocab_size, jnp.int32)
    text = jnp.where(text_mask == 1, tokens, pad_idx)            # (B, T)

    prep = prepare_params(params, num_layers)                    # one-time weight prep

    fwd = jax.jit(functools.partial(lstm_text_classifier_forward,
                                    num_layers=num_layers, num_labels=num_labels))
    logits = fwd(prep, text, text_mask)
    logits = jax.block_until_ready(logits)

    ref = ref_forward(params, text, text_mask, num_layers)
    assert logits.shape == (B, num_labels)
    # bf16 MXU operands / bf16 scratches drift slightly from the pure-f32 reference;
    # accumulation stays f32, so a few 1e-3 of absolute error is expected.
    assert jnp.allclose(logits, ref, atol=5e-2, rtol=5e-2), (logits, ref)

    print("KERNEL_OK")
</pallas_src>

<mosaic_0001>
module attributes {stable_mosaic.version = 11 : i64} {
  func.func @_fused_forward_kernel(%arg0: i32, %arg1: memref<128x32xf32, #tpu.memory_space<vmem>>, %arg2: memref<1x32xf32, #tpu.memory_space<vmem>>, %arg3: memref<1x32xf32, #tpu.memory_space<vmem>>, %arg4: memref<16x1xi32, #tpu.memory_space<vmem>>, %arg5: memref<32x128xbf16, #tpu.memory_space<vmem>>, %arg6: memref<32x128xbf16, #tpu.memory_space<vmem>>, %arg7: memref<1x128xf32, #tpu.memory_space<vmem>>, %arg8: memref<32x128xbf16, #tpu.memory_space<vmem>>, %arg9: memref<32x128xbf16, #tpu.memory_space<vmem>>, %arg10: memref<1x128xf32, #tpu.memory_space<vmem>>, %arg11: memref<32x128xf32, #tpu.memory_space<vmem>>, %arg12: memref<1x128xf32, #tpu.memory_space<vmem>>, %arg13: memref<16x128xf32, #tpu.memory_space<vmem>>, %arg14: memref<128x128xbf16, #tpu.memory_space<vmem>>, %arg15: memref<128x32xbf16, #tpu.memory_space<vmem>>) attributes {dimension_semantics = [#tpu.dimension_semantics<arbitrary>], iteration_bounds = array<i64: 1>, scalar_prefetch = 0 : i64, scratch_operands = 2 : i64, tpu.core_type = #tpu.core_type<tc>, window_params = [{pipeline_mode = #tpu.pipeline_mode<synchronous>, transform_indices = @transform_0, window_bounds = array<i64: 128, 32>}, {pipeline_mode = #tpu.pipeline_mode<synchronous>, transform_indices = @transform_1, window_bounds = array<i64: 1, 32>}, {pipeline_mode = #tpu.pipeline_mode<synchronous>, transform_indices = @transform_2, window_bounds = array<i64: 1, 32>}, {pipeline_mode = #tpu.pipeline_mode<synchronous>, transform_indices = @transform_3, window_bounds = array<i64: 16, 1>}, {pipeline_mode = #tpu.pipeline_mode<synchronous>, transform_indices = @transform_4, window_bounds = array<i64: 32, 128>}, {pipeline_mode = #tpu.pipeline_mode<synchronous>, transform_indices = @transform_5, window_bounds = array<i64: 32, 128>}, {pipeline_mode = #tpu.pipeline_mode<synchronous>, transform_indices = @transform_6, window_bounds = array<i64: 1, 128>}, {pipeline_mode = #tpu.pipeline_mode<synchronous>, transform_indices = @transform_7, window_bounds = array<i64: 32, 128>}, {pipeline_mode = #tpu.pipeline_mode<synchronous>, transform_indices = @transform_8, window_bounds = array<i64: 32, 128>}, {pipeline_mode = #tpu.pipeline_mode<synchronous>, transform_indices = @transform_9, window_bounds = array<i64: 1, 128>}, {pipeline_mode = #tpu.pipeline_mode<synchronous>, transform_indices = @transform_10, window_bounds = array<i64: 32, 128>}, {pipeline_mode = #tpu.pipeline_mode<synchronous>, transform_indices = @transform_11, window_bounds = array<i64: 1, 128>}, {pipeline_mode = #tpu.pipeline_mode<synchronous>, transform_indices = @transform_12, window_bounds = array<i64: 16, 128>}]} {
    %c0 = arith.constant 0 : index
    %c0_0 = arith.constant 0 : index
    %0 = vector.load %arg4[%c0, %c0_0] : memref<16x1xi32, #tpu.memory_space<vmem>>, vector<16x1xi32>
    %c0_1 = arith.constant 0 : index
    %c0_2 = arith.constant 0 : index
    %1 = vector.load %arg1[%c0_1, %c0_2] : memref<128x32xf32, #tpu.memory_space<vmem>>, vector<128x32xf32>
    %cst = arith.constant dense<0.000000e+00> : vector<128xf32>
    %2 = vector.multi_reduction <add>, %1, %cst [1] : vector<128x32xf32> to vector<128xf32>
    %3 = vector.shape_cast %2 : vector<128xf32> to vector<128x1xf32>
    %cst_3 = arith.constant 3.200000e+01 : f32
    %4 = vector.broadcast %cst_3 : f32 to vector<128x1xf32>
    %5 = arith.divf %3, %4 : vector<128x1xf32>
    %6 = vector.broadcast %5 : vector<128x1xf32> to vector<128x32xf32>
    %7 = arith.subf %1, %6 : vector<128x32xf32>
    %8 = arith.mulf %7, %7 : vector<128x32xf32>
    %cst_4 = arith.constant dense<0.000000e+00> : vector<128xf32>
    %9 = vector.multi_reduction <add>, %8, %cst_4 [1] : vector<128x32xf32> to vector<128xf32>
    %10 = vector.shape_cast %9 : vector<128xf32> to vector<128x1xf32>
    %cst_5 = arith.constant 3.200000e+01 : f32
    %11 = vector.broadcast %cst_5 : f32 to vector<128x1xf32>
    %12 = arith.divf %10, %11 : vector<128x1xf32>
    %13 = vector.broadcast %5 : vector<128x1xf32> to vector<128x32xf32>
    %14 = arith.subf %1, %13 : vector<128x32xf32>
    %cst_6 = arith.constant 9.99999974E-6 : f32
    %15 = vector.broadcast %cst_6 : f32 to vector<128x1xf32>
    %16 = arith.addf %12, %15 : vector<128x1xf32>
    %17 = math.rsqrt %16 : vector<128x1xf32>
    %18 = vector.broadcast %17 : vector<128x1xf32> to vector<128x32xf32>
    %19 = arith.mulf %14, %18 : vector<128x32xf32>
    %c0_7 = arith.constant 0 : index
    %c0_8 = arith.constant 0 : index
    %20 = vector.load %arg2[%c0_7, %c0_8] : memref<1x32xf32, #tpu.memory_space<vmem>>, vector<1x32xf32>
    %21 = vector.broadcast %20 : vector<1x32xf32> to vector<128x32xf32>
    %22 = arith.mulf %19, %21 : vector<128x32xf32>
    %c0_9 = arith.constant 0 : index
    %c0_10 = arith.constant 0 : index
    %23 = vector.load %arg3[%c0_9, %c0_10] : memref<1x32xf32, #tpu.memory_space<vmem>>, vector<1x32xf32>
    %24 = vector.broadcast %23 : vector<1x32xf32> to vector<128x32xf32>
    %25 = arith.addf %22, %24 : vector<128x32xf32>
    %26 = arith.truncf %25 : vector<128x32xf32> to vector<128x32xbf16>
    %c0_11 = arith.constant 0 : index
    %c0_12 = arith.constant 0 : index
    %27 = vector.load %arg15[%c0_11, %c0_12] : memref<128x32xbf16, #tpu.memory_space<vmem>>, vector<128x32xbf16>
    tpu.vector_store %arg15[%c0_11, %c0_12], %26 {strides = array<i32>} : memref<128x32xbf16, #tpu.memory_space<vmem>>, vector<128x32xbf16>,
    %c0_13 = arith.constant 0 : index
    %c0_14 = arith.constant 0 : index
    %28 = vector.load %arg15[%c0_13, %c0_14] : memref<128x32xbf16, #tpu.memory_space<vmem>>, vector<128x32xbf16>
    %c0_15 = arith.constant 0 : index
    %c0_16 = arith.constant 0 : index
    %29 = vector.load %arg5[%c0_15, %c0_16] : memref<32x128xbf16, #tpu.memory_space<vmem>>, vector<32x128xbf16>
    %cst_17 = arith.constant dense<0.000000e+00> : vector<128x128xf32>
    %30 = tpu.matmul %28, %29, %cst_17 {dimension_numbers = #tpu.dot_dimension_numbers<[1], [0], [0], [1], [0, 0, 1, 1], [], []>} : vector<128x32xbf16>, vector<32x128xbf16>, vector<128x128xf32> -> vector<128x128xf32>
    %c0_18 = arith.constant 0 : index
    %c0_19 = arith.constant 0 : index
    %31 = vector.load %arg7[%c0_18, %c0_19] : memref<1x128xf32, #tpu.memory_space<vmem>>, vector<1x128xf32>
    %32 = vector.broadcast %31 : vector<1x128xf32> to vector<128x128xf32>
    %33 = arith.addf %30, %32 : vector<128x128xf32>
    %34 = arith.truncf %33 : vector<128x128xf32> to vector<128x128xbf16>
    %c0_20 = arith.constant 0 : index
    %c0_21 = arith.constant 0 : index
    %35 = vector.load %arg14[%c0_20, %c0_21] : memref<128x128xbf16, #tpu.memory_space<vmem>>, vector<128x128xbf16>
    tpu.vector_store %arg14[%c0_20, %c0_21], %34 {strides = array<i32>} : memref<128x128xbf16, #tpu.memory_space<vmem>>, vector<128x128xbf16>,
    %c0_22 = arith.constant 0 : index
    %c0_23 = arith.constant 0 : index
    %36 = vector.load %arg6[%c0_22, %c0_23] : memref<32x128xbf16, #tpu.memory_space<vmem>>, vector<32x128xbf16>
    %cst_24 = arith.constant 0.000000e+00 : f32
    %37 = vector.broadcast %cst_24 : f32 to vector<16x32xf32>
    %cst_25 = arith.constant 0.000000e+00 : f32
    %38 = vector.broadcast %cst_25 : f32 to vector<16x32xf32>
    %c0_i32 = arith.constant 0 : i32
    %c16_i32 = arith.constant 16 : i32
    %39 = arith.muli %c0_i32, %c16_i32 : i32
    %40 = tpu.assume_multiple %39, 16 : i32
    %41 = arith.index_cast %40 : i32 to index
    %c0_26 = arith.constant 0 : index
    %42 = vector.load %arg14[%41, %c0_26] : memref<128x128xbf16, #tpu.memory_space<vmem>>, vector<16x128xbf16>
    %43 = arith.extf %42 : vector<16x128xbf16> to vector<16x128xf32>
    %44 = arith.truncf %37 : vector<16x32xf32> to vector<16x32xbf16>
    %cst_27 = arith.constant dense<0.000000e+00> : vector<16x128xf32>
    %45 = tpu.matmul %44, %36, %cst_27 {dimension_numbers = #tpu.dot_dimension_numbers<[1], [0], [0], [1], [0, 0, 1, 1], [], []>} : vector<16x32xbf16>, vector<32x128xbf16>, vector<16x128xf32> -> vector<16x128xf32>
    %46 = arith.addf %43, %45 : vector<16x128xf32>
    %47 = vector.extract_strided_slice %46 {offsets = [0, 0], sizes = [16, 96], strides = [1, 1]} : vector<16x128xf32> to vector<16x96xf32>
    %48 = arith.negf %47 : vector<16x96xf32>
    %49 = math.exp %48 : vector<16x96xf32>
    %cst_28 = arith.constant 1.000000e+00 : f32
    %50 = vector.broadcast %cst_28 : f32 to vector<16x96xf32>
    %51 = arith.addf %50, %49 : vector<16x96xf32>
    %52 = arith.divf %50, %51 : vector<16x96xf32>
    %53 = vector.extract_strided_slice %46 {offsets = [0, 96], sizes = [16, 32], strides = [1, 1]} : vector<16x128xf32> to vector<16x32xf32>
    %54 = math.tanh %53 : vector<16x32xf32>
    %55 = vector.extract_strided_slice %52 {offsets = [0, 0], sizes = [16, 32], strides = [1, 1]} : vector<16x96xf32> to vector<16x32xf32>
    %56 = vector.extract_strided_slice %52 {offsets = [0, 32], sizes = [16, 32], strides = [1, 1]} : vector<16x96xf32> to vector<16x32xf32>
    %57 = vector.extract_strided_slice %52 {offsets = [0, 64], sizes = [16, 32], strides = [1, 1]} : vector<16x96xf32> to vector<16x32xf32>
    %58 = arith.mulf %56, %38 : vector<16x32xf32>
    %59 = arith.mulf %55, %54 : vector<16x32xf32>
    %60 = arith.addf %58, %59 : vector<16x32xf32>
    %61 = math.tanh %60 : vector<16x32xf32>
    %62 = arith.mulf %57, %61 : vector<16x32xf32>
    %63 = vector.broadcast %c0_i32 : i32 to vector<16x1xi32>
    %64 = arith.cmpi sgt, %0, %63 : vector<16x1xi32>
    %65 = vector.shape_cast %64 : vector<16x1xi1> to vector<16x1xi1>
    %66 = vector.broadcast %65 : vector<16x1xi1> to vector<16x32xi1>
    %67 = arith.select %66, %62, %37 : vector<16x32xi1>, vector<16x32xf32>
    %68 = vector.shape_cast %64 : vector<16x1xi1> to vector<16x1xi1>
    %69 = vector.broadcast %68 : vector<16x1xi1> to vector<16x32xi1>
    %70 = arith.select %69, %60, %38 : vector<16x32xi1>, vector<16x32xf32>
    %71 = arith.truncf %67 : vector<16x32xf32> to vector<16x32xbf16>
    %72 = arith.index_cast %40 : i32 to index
    %c0_29 = arith.constant 0 : index
    %73 = vector.load %arg15[%72, %c0_29] : memref<128x32xbf16, #tpu.memory_space<vmem>>, vector<16x32xbf16>
    tpu.vector_store %arg15[%72, %c0_29], %71 {strides = array<i32>} : memref<128x32xbf16, #tpu.memory_space<vmem>>, vector<16x32xbf16>,
    %c1_i32 = arith.constant 1 : i32
    %c16_i32_30 = arith.constant 16 : i32
    %74 = arith.muli %c1_i32, %c16_i32_30 : i32
    %75 = tpu.assume_multiple %74, 16 : i32
    %76 = arith.index_cast %75 : i32 to index
    %c0_31 = arith.constant 0 : index
    %77 = vector.load %arg14[%76, %c0_31] : memref<128x128xbf16, #tpu.memory_space<vmem>>, vector<16x128xbf16>
    %78 = arith.extf %77 : vector<16x128xbf16> to vector<16x128xf32>
    %79 = arith.truncf %67 : vector<16x32xf32> to vector<16x32xbf16>
    %cst_32 = arith.constant dense<0.000000e+00> : vector<16x128xf32>
    %80 = tpu.matmul %79, %36, %cst_32 {dimension_numbers = #tpu.dot_dimension_numbers<[1], [0], [0], [1], [0, 0, 1, 1], [], []>} : vector<16x32xbf16>, vector<32x128xbf16>, vector<16x128xf32> -> vector<16x128xf32>
    %81 = arith.addf %78, %80 : vector<16x128xf32>
    %82 = vector.extract_strided_slice %81 {offsets = [0, 0], sizes = [16, 96], strides = [1, 1]} : vector<16x128xf32> to vector<16x96xf32>
    %83 = arith.negf %82 : vector<16x96xf32>
    %84 = math.exp %83 : vector<16x96xf32>
    %cst_33 = arith.constant 1.000000e+00 : f32
    %85 = vector.broadcast %cst_33 : f32 to vector<16x96xf32>
    %86 = arith.addf %85, %84 : vector<16x96xf32>
    %87 = arith.divf %85, %86 : vector<16x96xf32>
    %88 = vector.extract_strided_slice %81 {offsets = [0, 96], sizes = [16, 32], strides = [1, 1]} : vector<16x128xf32> to vector<16x32xf32>
    %89 = math.tanh %88 : vector<16x32xf32>
    %90 = vector.extract_strided_slice %87 {offsets = [0, 0], sizes = [16, 32], strides = [1, 1]} : vector<16x96xf32> to vector<16x32xf32>
    %91 = vector.extract_strided_slice %87 {offsets = [0, 32], sizes = [16, 32], strides = [1, 1]} : vector<16x96xf32> to vector<16x32xf32>
    %92 = vector.extract_strided_slice %87 {offsets = [0, 64], sizes = [16, 32], strides = [1, 1]} : vector<16x96xf32> to vector<16x32xf32>
    %93 = arith.mulf %91, %70 : vector<16x32xf32>
    %94 = arith.mulf %90, %89 : vector<16x32xf32>
    %95 = arith.addf %93, %94 : vector<16x32xf32>
    %96 = math.tanh %95 : vector<16x32xf32>
    %97 = arith.mulf %92, %96 : vector<16x32xf32>
    %98 = vector.broadcast %c1_i32 : i32 to vector<16x1xi32>
    %99 = arith.cmpi sgt, %0, %98 : vector<16x1xi32>
    %100 = vector.shape_cast %99 : vector<16x1xi1> to vector<16x1xi1>
    %101 = vector.broadcast %100 : vector<16x1xi1> to vector<16x32xi1>
    %102 = arith.select %101, %97, %67 : vector<16x32xi1>, vector<16x32xf32>
    %103 = vector.shape_cast %99 : vector<16x1xi1> to vector<16x1xi1>
    %104 = vector.broadcast %103 : vector<16x1xi1> to vector<16x32xi1>
    %105 = arith.select %104, %95, %70 : vector<16x32xi1>, vector<16x32xf32>
    %106 = arith.truncf %102 : vector<16x32xf32> to vector<16x32xbf16>
    %107 = arith.index_cast %75 : i32 to index
    %c0_34 = arith.constant 0 : index
    %108 = vector.load %arg15[%107, %c0_34] : memref<128x32xbf16, #tpu.memory_space<vmem>>, vector<16x32xbf16>
    tpu.vector_store %arg15[%107, %c0_34], %106 {strides = array<i32>} : memref<128x32xbf16, #tpu.memory_space<vmem>>, vector<16x32xbf16>,
    %c2_i32 = arith.constant 2 : i32
    %c16_i32_35 = arith.constant 16 : i32
    %109 = arith.muli %c2_i32, %c16_i32_35 : i32
    %110 = tpu.assume_multiple %109, 16 : i32
    %111 = arith.index_cast %110 : i32 to index
    %c0_36 = arith.constant 0 : index
    %112 = vector.load %arg14[%111, %c0_36] : memref<128x128xbf16, #tpu.memory_space<vmem>>, vector<16x128xbf16>
    %113 = arith.extf %112 : vector<16x128xbf16> to vector<16x128xf32>
    %114 = arith.truncf %102 : vector<16x32xf32> to vector<16x32xbf16>
    %cst_37 = arith.constant dense<0.000000e+00> : vector<16x128xf32>
    %115 = tpu.matmul %114, %36, %cst_37 {dimension_numbers = #tpu.dot_dimension_numbers<[1], [0], [0], [1], [0, 0, 1, 1], [], []>} : vector<16x32xbf16>, vector<32x128xbf16>, vector<16x128xf32> -> vector<16x128xf32>
    %116 = arith.addf %113, %115 : vector<16x128xf32>
    %117 = vector.extract_strided_slice %116 {offsets = [0, 0], sizes = [16, 96], strides = [1, 1]} : vector<16x128xf32> to vector<16x96xf32>
    %118 = arith.negf %117 : vector<16x96xf32>
    %119 = math.exp %118 : vector<16x96xf32>
    %cst_38 = arith.constant 1.000000e+00 : f32
    %120 = vector.broadcast %cst_38 : f32 to vector<16x96xf32>
    %121 = arith.addf %120, %119 : vector<16x96xf32>
    %122 = arith.divf %120, %121 : vector<16x96xf32>
    %123 = vector.extract_strided_slice %116 {offsets = [0, 96], sizes = [16, 32], strides = [1, 1]} : vector<16x128xf32> to vector<16x32xf32>
    %124 = math.tanh %123 : vector<16x32xf32>
    %125 = vector.extract_strided_slice %122 {offsets = [0, 0], sizes = [16, 32], strides = [1, 1]} : vector<16x96xf32> to vector<16x32xf32>
    %126 = vector.extract_strided_slice %122 {offsets = [0, 32], sizes = [16, 32], strides = [1, 1]} : vector<16x96xf32> to vector<16x32xf32>
    %127 = vector.extract_strided_slice %122 {offsets = [0, 64], sizes = [16, 32], strides = [1, 1]} : vector<16x96xf32> to vector<16x32xf32>
    %128 = arith.mulf %126, %105 : vector<16x32xf32>
    %129 = arith.mulf %125, %124 : vector<16x32xf32>
    %130 = arith.addf %128, %129 : vector<16x32xf32>
    %131 = math.tanh %130 : vector<16x32xf32>
    %132 = arith.mulf %127, %131 : vector<16x32xf32>
    %133 = vector.broadcast %c2_i32 : i32 to vector<16x1xi32>
    %134 = arith.cmpi sgt, %0, %133 : vector<16x1xi32>
    %135 = vector.shape_cast %134 : vector<16x1xi1> to vector<16x1xi1>
    %136 = vector.broadcast %135 : vector<16x1xi1> to vector<16x32xi1>
    %137 = arith.select %136, %132, %102 : vector<16x32xi1>, vector<16x32xf32>
    %138 = vector.shape_cast %134 : vector<16x1xi1> to vector<16x1xi1>
    %139 = vector.broadcast %138 : vector<16x1xi1> to vector<16x32xi1>
    %140 = arith.select %139, %130, %105 : vector<16x32xi1>, vector<16x32xf32>
    %141 = arith.truncf %137 : vector<16x32xf32> to vector<16x32xbf16>
    %142 = arith.index_cast %110 : i32 to index
    %c0_39 = arith.constant 0 : index
    %143 = vector.load %arg15[%142, %c0_39] : memref<128x32xbf16, #tpu.memory_space<vmem>>, vector<16x32xbf16>
    tpu.vector_store %arg15[%142, %c0_39], %141 {strides = array<i32>} : memref<128x32xbf16, #tpu.memory_space<vmem>>, vector<16x32xbf16>,
    %c3_i32 = arith.constant 3 : i32
    %c16_i32_40 = arith.constant 16 : i32
    %144 = arith.muli %c3_i32, %c16_i32_40 : i32
    %145 = tpu.assume_multiple %144, 16 : i32
    %146 = arith.index_cast %145 : i32 to index
    %c0_41 = arith.constant 0 : index
    %147 = vector.load %arg14[%146, %c0_41] : memref<128x128xbf16, #tpu.memory_space<vmem>>, vector<16x128xbf16>
    %148 = arith.extf %147 : vector<16x128xbf16> to vector<16x128xf32>
    %149 = arith.truncf %137 : vector<16x32xf32> to vector<16x32xbf16>
    %cst_42 = arith.constant dense<0.000000e+00> : vector<16x128xf32>
    %150 = tpu.matmul %149, %36, %cst_42 {dimension_numbers = #tpu.dot_dimension_numbers<[1], [0], [0], [1], [0, 0, 1, 1], [], []>} : vector<16x32xbf16>, vector<32x128xbf16>, vector<16x128xf32> -> vector<16x128xf32>
    %151 = arith.addf %148, %150 : vector<16x128xf32>
    %152 = vector.extract_strided_slice %151 {offsets = [0, 0], sizes = [16, 96], strides = [1, 1]} : vector<16x128xf32> to vector<16x96xf32>
    %153 = arith.negf %152 : vector<16x96xf32>
    %154 = math.exp %153 : vector<16x96xf32>
    %cst_43 = arith.constant 1.000000e+00 : f32
    %155 = vector.broadcast %cst_43 : f32 to vector<16x96xf32>
    %156 = arith.addf %155, %154 : vector<16x96xf32>
    %157 = arith.divf %155, %156 : vector<16x96xf32>
    %158 = vector.extract_strided_slice %151 {offsets = [0, 96], sizes = [16, 32], strides = [1, 1]} : vector<16x128xf32> to vector<16x32xf32>
    %159 = math.tanh %158 : vector<16x32xf32>
    %160 = vector.extract_strided_slice %157 {offsets = [0, 0], sizes = [16, 32], strides = [1, 1]} : vector<16x96xf32> to vector<16x32xf32>
    %161 = vector.extract_strided_slice %157 {offsets = [0, 32], sizes = [16, 32], strides = [1, 1]} : vector<16x96xf32> to vector<16x32xf32>
    %162 = vector.extract_strided_slice %157 {offsets = [0, 64], sizes = [16, 32], strides = [1, 1]} : vector<16x96xf32> to vector<16x32xf32>
    %163 = arith.mulf %161, %140 : vector<16x32xf32>
    %164 = arith.mulf %160, %159 : vector<16x32xf32>
    %165 = arith.addf %163, %164 : vector<16x32xf32>
    %166 = math.tanh %165 : vector<16x32xf32>
    %167 = arith.mulf %162, %166 : vector<16x32xf32>
    %168 = vector.broadcast %c3_i32 : i32 to vector<16x1xi32>
    %169 = arith.cmpi sgt, %0, %168 : vector<16x1xi32>
    %170 = vector.shape_cast %169 : vector<16x1xi1> to vector<16x1xi1>
    %171 = vector.broadcast %170 : vector<16x1xi1> to vector<16x32xi1>
    %172 = arith.select %171, %167, %137 : vector<16x32xi1>, vector<16x32xf32>
    %173 = vector.shape_cast %169 : vector<16x1xi1> to vector<16x1xi1>
    %174 = vector.broadcast %173 : vector<16x1xi1> to vector<16x32xi1>
    %175 = arith.select %174, %165, %140 : vector<16x32xi1>, vector<16x32xf32>
    %176 = arith.truncf %172 : vector<16x32xf32> to vector<16x32xbf16>
    %177 = arith.index_cast %145 : i32 to index
    %c0_44 = arith.constant 0 : index
    %178 = vector.load %arg15[%177, %c0_44] : memref<128x32xbf16, #tpu.memory_space<vmem>>, vector<16x32xbf16>
    tpu.vector_store %arg15[%177, %c0_44], %176 {strides = array<i32>} : memref<128x32xbf16, #tpu.memory_space<vmem>>, vector<16x32xbf16>,
    %c4_i32 = arith.constant 4 : i32
    %c16_i32_45 = arith.constant 16 : i32
    %179 = arith.muli %c4_i32, %c16_i32_45 : i32
    %180 = tpu.assume_multiple %179, 16 : i32
    %181 = arith.index_cast %180 : i32 to index
    %c0_46 = arith.constant 0 : index
    %182 = vector.load %arg14[%181, %c0_46] : memref<128x128xbf16, #tpu.memory_space<vmem>>, vector<16x128xbf16>
    %183 = arith.extf %182 : vector<16x128xbf16> to vector<16x128xf32>
    %184 = arith.truncf %172 : vector<16x32xf32> to vector<16x32xbf16>
    %cst_47 = arith.constant dense<0.000000e+00> : vector<16x128xf32>
    %185 = tpu.matmul %184, %36, %cst_47 {dimension_numbers = #tpu.dot_dimension_numbers<[1], [0], [0], [1], [0, 0, 1, 1], [], []>} : vector<16x32xbf16>, vector<32x128xbf16>, vector<16x128xf32> -> vector<16x128xf32>
    %186 = arith.addf %183, %185 : vector<16x128xf32>
    %187 = vector.extract_strided_slice %186 {offsets = [0, 0], sizes = [16, 96], strides = [1, 1]} : vector<16x128xf32> to vector<16x96xf32>
    %188 = arith.negf %187 : vector<16x96xf32>
    %189 = math.exp %188 : vector<16x96xf32>
    %cst_48 = arith.constant 1.000000e+00 : f32
    %190 = vector.broadcast %cst_48 : f32 to vector<16x96xf32>
    %191 = arith.addf %190, %189 : vector<16x96xf32>
    %192 = arith.divf %190, %191 : vector<16x96xf32>
    %193 = vector.extract_strided_slice %186 {offsets = [0, 96], sizes = [16, 32], strides = [1, 1]} : vector<16x128xf32> to vector<16x32xf32>
    %194 = math.tanh %193 : vector<16x32xf32>
    %195 = vector.extract_strided_slice %192 {offsets = [0, 0], sizes = [16, 32], strides = [1, 1]} : vector<16x96xf32> to vector<16x32xf32>
    %196 = vector.extract_strided_slice %192 {offsets = [0, 32], sizes = [16, 32], strides = [1, 1]} : vector<16x96xf32> to vector<16x32xf32>
    %197 = vector.extract_strided_slice %192 {offsets = [0, 64], sizes = [16, 32], strides = [1, 1]} : vector<16x96xf32> to vector<16x32xf32>
    %198 = arith.mulf %196, %175 : vector<16x32xf32>
    %199 = arith.mulf %195, %194 : vector<16x32xf32>
    %200 = arith.addf %198, %199 : vector<16x32xf32>
    %201 = math.tanh %200 : vector<16x32xf32>
    %202 = arith.mulf %197, %201 : vector<16x32xf32>
    %203 = vector.broadcast %c4_i32 : i32 to vector<16x1xi32>
    %204 = arith.cmpi sgt, %0, %203 : vector<16x1xi32>
    %205 = vector.shape_cast %204 : vector<16x1xi1> to vector<16x1xi1>
    %206 = vector.broadcast %205 : vector<16x1xi1> to vector<16x32xi1>
    %207 = arith.select %206, %202, %172 : vector<16x32xi1>, vector<16x32xf32>
    %208 = vector.shape_cast %204 : vector<16x1xi1> to vector<16x1xi1>
    %209 = vector.broadcast %208 : vector<16x1xi1> to vector<16x32xi1>
    %210 = arith.select %209, %200, %175 : vector<16x32xi1>, vector<16x32xf32>
    %211 = arith.truncf %207 : vector<16x32xf32> to vector<16x32xbf16>
    %212 = arith.index_cast %180 : i32 to index
    %c0_49 = arith.constant 0 : index
    %213 = vector.load %arg15[%212, %c0_49] : memref<128x32xbf16, #tpu.memory_space<vmem>>, vector<16x32xbf16>
    tpu.vector_store %arg15[%212, %c0_49], %211 {strides = array<i32>} : memref<128x32xbf16, #tpu.memory_space<vmem>>, vector<16x32xbf16>,
    %c5_i32 = arith.constant 5 : i32
    %c16_i32_50 = arith.constant 16 : i32
    %214 = arith.muli %c5_i32, %c16_i32_50 : i32
    %215 = tpu.assume_multiple %214, 16 : i32
    %216 = arith.index_cast %215 : i32 to index
    %c0_51 = arith.constant 0 : index
    %217 = vector.load %arg14[%216, %c0_51] : memref<128x128xbf16, #tpu.memory_space<vmem>>, vector<16x128xbf16>
    %218 = arith.extf %217 : vector<16x128xbf16> to vector<16x128xf32>
    %219 = arith.truncf %207 : vector<16x32xf32> to vector<16x32xbf16>
    %cst_52 = arith.constant dense<0.000000e+00> : vector<16x128xf32>
    %220 = tpu.matmul %219, %36, %cst_52 {dimension_numbers = #tpu.dot_dimension_numbers<[1], [0], [0], [1], [0, 0, 1, 1], [], []>} : vector<16x32xbf16>, vector<32x128xbf16>, vector<16x128xf32> -> vector<16x128xf32>
    %221 = arith.addf %218, %220 : vector<16x128xf32>
    %222 = vector.extract_strided_slice %221 {offsets = [0, 0], sizes = [16, 96], strides = [1, 1]} : vector<16x128xf32> to vector<16x96xf32>
    %223 = arith.negf %222 : vector<16x96xf32>
    %224 = math.exp %223 : vector<16x96xf32>
    %cst_53 = arith.constant 1.000000e+00 : f32
    %225 = vector.broadcast %cst_53 : f32 to vector<16x96xf32>
    %226 = arith.addf %225, %224 : vector<16x96xf32>
    %227 = arith.divf %225, %226 : vector<16x96xf32>
    %228 = vector.extract_strided_slice %221 {offsets = [0, 96], sizes = [16, 32], strides = [1, 1]} : vector<16x128xf32> to vector<16x32xf32>
    %229 = math.tanh %228 : vector<16x32xf32>
    %230 = vector.extract_strided_slice %227 {offsets = [0, 0], sizes = [16, 32], strides = [1, 1]} : vector<16x96xf32> to vector<16x32xf32>
    %231 = vector.extract_strided_slice %227 {offsets = [0, 32], sizes = [16, 32], strides = [1, 1]} : vector<16x96xf32> to vector<16x32xf32>
    %232 = vector.extract_strided_slice %227 {offsets = [0, 64], sizes = [16, 32], strides = [1, 1]} : vector<16x96xf32> to vector<16x32xf32>
    %233 = arith.mulf %231, %210 : vector<16x32xf32>
    %234 = arith.mulf %230, %229 : vector<16x32xf32>
    %235 = arith.addf %233, %234 : vector<16x32xf32>
    %236 = math.tanh %235 : vector<16x32xf32>
    %237 = arith.mulf %232, %236 : vector<16x32xf32>
    %238 = vector.broadcast %c5_i32 : i32 to vector<16x1xi32>
    %239 = arith.cmpi sgt, %0, %238 : vector<16x1xi32>
    %240 = vector.shape_cast %239 : vector<16x1xi1> to vector<16x1xi1>
    %241 = vector.broadcast %240 : vector<16x1xi1> to vector<16x32xi1>
    %242 = arith.select %241, %237, %207 : vector<16x32xi1>, vector<16x32xf32>
    %243 = vector.shape_cast %239 : vector<16x1xi1> to vector<16x1xi1>
    %244 = vector.broadcast %243 : vector<16x1xi1> to vector<16x32xi1>
    %245 = arith.select %244, %235, %210 : vector<16x32xi1>, vector<16x32xf32>
    %246 = arith.truncf %242 : vector<16x32xf32> to vector<16x32xbf16>
    %247 = arith.index_cast %215 : i32 to index
    %c0_54 = arith.constant 0 : index
    %248 = vector.load %arg15[%247, %c0_54] : memref<128x32xbf16, #tpu.memory_space<vmem>>, vector<16x32xbf16>
    tpu.vector_store %arg15[%247, %c0_54], %246 {strides = array<i32>} : memref<128x32xbf16, #tpu.memory_space<vmem>>, vector<16x32xbf16>,
    %c6_i32 = arith.constant 6 : i32
    %c16_i32_55 = arith.constant 16 : i32
    %249 = arith.muli %c6_i32, %c16_i32_55 : i32
    %250 = tpu.assume_multiple %249, 16 : i32
    %251 = arith.index_cast %250 : i32 to index
    %c0_56 = arith.constant 0 : index
    %252 = vector.load %arg14[%251, %c0_56] : memref<128x128xbf16, #tpu.memory_space<vmem>>, vector<16x128xbf16>
    %253 = arith.extf %252 : vector<16x128xbf16> to vector<16x128xf32>
    %254 = arith.truncf %242 : vector<16x32xf32> to vector<16x32xbf16>
    %cst_57 = arith.constant dense<0.000000e+00> : vector<16x128xf32>
    %255 = tpu.matmul %254, %36, %cst_57 {dimension_numbers = #tpu.dot_dimension_numbers<[1], [0], [0], [1], [0, 0, 1, 1], [], []>} : vector<16x32xbf16>, vector<32x128xbf16>, vector<16x128xf32> -> vector<16x128xf32>
    %256 = arith.addf %253, %255 : vector<16x128xf32>
    %257 = vector.extract_strided_slice %256 {offsets = [0, 0], sizes = [16, 96], strides = [1, 1]} : vector<16x128xf32> to vector<16x96xf32>
    %258 = arith.negf %257 : vector<16x96xf32>
    %259 = math.exp %258 : vector<16x96xf32>
    %cst_58 = arith.constant 1.000000e+00 : f32
    %260 = vector.broadcast %cst_58 : f32 to vector<16x96xf32>
    %261 = arith.addf %260, %259 : vector<16x96xf32>
    %262 = arith.divf %260, %261 : vector<16x96xf32>
    %263 = vector.extract_strided_slice %256 {offsets = [0, 96], sizes = [16, 32], strides = [1, 1]} : vector<16x128xf32> to vector<16x32xf32>
    %264 = math.tanh %263 : vector<16x32xf32>
    %265 = vector.extract_strided_slice %262 {offsets = [0, 0], sizes = [16, 32], strides = [1, 1]} : vector<16x96xf32> to vector<16x32xf32>
    %266 = vector.extract_strided_slice %262 {offsets = [0, 32], sizes = [16, 32], strides = [1, 1]} : vector<16x96xf32> to vector<16x32xf32>
    %267 = vector.extract_strided_slice %262 {offsets = [0, 64], sizes = [16, 32], strides = [1, 1]} : vector<16x96xf32> to vector<16x32xf32>
    %268 = arith.mulf %266, %245 : vector<16x32xf32>
    %269 = arith.mulf %265, %264 : vector<16x32xf32>
    %270 = arith.addf %268, %269 : vector<16x32xf32>
    %271 = math.tanh %270 : vector<16x32xf32>
    %272 = arith.mulf %267, %271 : vector<16x32xf32>
    %273 = vector.broadcast %c6_i32 : i32 to vector<16x1xi32>
    %274 = arith.cmpi sgt, %0, %273 : vector<16x1xi32>
    %275 = vector.shape_cast %274 : vector<16x1xi1> to vector<16x1xi1>
    %276 = vector.broadcast %275 : vector<16x1xi1> to vector<16x32xi1>
    %277 = arith.select %276, %272, %242 : vector<16x32xi1>, vector<16x32xf32>
    %278 = vector.shape_cast %274 : vector<16x1xi1> to vector<16x1xi1>
    %279 = vector.broadcast %278 : vector<16x1xi1> to vector<16x32xi1>
    %280 = arith.select %279, %270, %245 : vector<16x32xi1>, vector<16x32xf32>
    %281 = arith.truncf %277 : vector<16x32xf32> to vector<16x32xbf16>
    %282 = arith.index_cast %250 : i32 to index
    %c0_59 = arith.constant 0 : index
    %283 = vector.load %arg15[%282, %c0_59] : memref<128x32xbf16, #tpu.memory_space<vmem>>, vector<16x32xbf16>
    tpu.vector_store %arg15[%282, %c0_59], %281 {strides = array<i32>} : memref<128x32xbf16, #tpu.memory_space<vmem>>, vector<16x32xbf16>,
    %c7_i32 = arith.constant 7 : i32
    %c16_i32_60 = arith.constant 16 : i32
    %284 = arith.muli %c7_i32, %c16_i32_60 : i32
    %285 = tpu.assume_multiple %284, 16 : i32
    %286 = arith.index_cast %285 : i32 to index
    %c0_61 = arith.constant 0 : index
    %287 = vector.load %arg14[%286, %c0_61] : memref<128x128xbf16, #tpu.memory_space<vmem>>, vector<16x128xbf16>
    %288 = arith.extf %287 : vector<16x128xbf16> to vector<16x128xf32>
    %289 = arith.truncf %277 : vector<16x32xf32> to vector<16x32xbf16>
    %cst_62 = arith.constant dense<0.000000e+00> : vector<16x128xf32>
    %290 = tpu.matmul %289, %36, %cst_62 {dimension_numbers = #tpu.dot_dimension_numbers<[1], [0], [0], [1], [0, 0, 1, 1], [], []>} : vector<16x32xbf16>, vector<32x128xbf16>, vector<16x128xf32> -> vector<16x128xf32>
    %291 = arith.addf %288, %290 : vector<16x128xf32>
    %292 = vector.extract_strided_slice %291 {offsets = [0, 0], sizes = [16, 96], strides = [1, 1]} : vector<16x128xf32> to vector<16x96xf32>
    %293 = arith.negf %292 : vector<16x96xf32>
    %294 = math.exp %293 : vector<16x96xf32>
    %cst_63 = arith.constant 1.000000e+00 : f32
    %295 = vector.broadcast %cst_63 : f32 to vector<16x96xf32>
    %296 = arith.addf %295, %294 : vector<16x96xf32>
    %297 = arith.divf %295, %296 : vector<16x96xf32>
    %298 = vector.extract_strided_slice %291 {offsets = [0, 96], sizes = [16, 32], strides = [1, 1]} : vector<16x128xf32> to vector<16x32xf32>
    %299 = math.tanh %298 : vector<16x32xf32>
    %300 = vector.extract_strided_slice %297 {offsets = [0, 0], sizes = [16, 32], strides = [1, 1]} : vector<16x96xf32> to vector<16x32xf32>
    %301 = vector.extract_strided_slice %297 {offsets = [0, 32], sizes = [16, 32], strides = [1, 1]} : vector<16x96xf32> to vector<16x32xf32>
    %302 = vector.extract_strided_slice %297 {offsets = [0, 64], sizes = [16, 32], strides = [1, 1]} : vector<16x96xf32> to vector<16x32xf32>
    %303 = arith.mulf %301, %280 : vector<16x32xf32>
    %304 = arith.mulf %300, %299 : vector<16x32xf32>
    %305 = arith.addf %303, %304 : vector<16x32xf32>
    %306 = math.tanh %305 : vector<16x32xf32>
    %307 = arith.mulf %302, %306 : vector<16x32xf32>
    %308 = vector.broadcast %c7_i32 : i32 to vector<16x1xi32>
    %309 = arith.cmpi sgt, %0, %308 : vector<16x1xi32>
    %310 = vector.shape_cast %309 : vector<16x1xi1> to vector<16x1xi1>
    %311 = vector.broadcast %310 : vector<16x1xi1> to vector<16x32xi1>
    %312 = arith.select %311, %307, %277 : vector<16x32xi1>, vector<16x32xf32>
    %313 = vector.shape_cast %309 : vector<16x1xi1> to vector<16x1xi1>
    %314 = vector.broadcast %313 : vector<16x1xi1> to vector<16x32xi1>
    %315 = arith.select %314, %305, %280 : vector<16x32xi1>, vector<16x32xf32>
    %316 = arith.truncf %312 : vector<16x32xf32> to vector<16x32xbf16>
    %317 = arith.index_cast %285 : i32 to index
    %c0_64 = arith.constant 0 : index
    %318 = vector.load %arg15[%317, %c0_64] : memref<128x32xbf16, #tpu.memory_space<vmem>>, vector<16x32xbf16>
    tpu.vector_store %arg15[%317, %c0_64], %316 {strides = array<i32>} : memref<128x32xbf16, #tpu.memory_space<vmem>>, vector<16x32xbf16>,
    %c8_i32 = arith.constant 8 : i32
    %c0_65 = arith.constant 0 : index
    %c0_66 = arith.constant 0 : index
    %319 = vector.load %arg15[%c0_65, %c0_66] : memref<128x32xbf16, #tpu.memory_space<vmem>>, vector<128x32xbf16>
    %c0_67 = arith.constant 0 : index
    %c0_68 = arith.constant 0 : index
    %320 = vector.load %arg8[%c0_67, %c0_68] : memref<32x128xbf16, #tpu.memory_space<vmem>>, vector<32x128xbf16>
    %cst_69 = arith.constant dense<0.000000e+00> : vector<128x128xf32>
    %321 = tpu.matmul %319, %320, %cst_69 {dimension_numbers = #tpu.dot_dimension_numbers<[1], [0], [0], [1], [0, 0, 1, 1], [], []>} : vector<128x32xbf16>, vector<32x128xbf16>, vector<128x128xf32> -> vector<128x128xf32>
    %c0_70 = arith.constant 0 : index
    %c0_71 = arith.constant 0 : index
    %322 = vector.load %arg10[%c0_70, %c0_71] : memref<1x128xf32, #tpu.memory_space<vmem>>, vector<1x128xf32>
    %323 = vector.broadcast %322 : vector<1x128xf32> to vector<128x128xf32>
    %324 = arith.addf %321, %323 : vector<128x128xf32>
    %325 = arith.truncf %324 : vector<128x128xf32> to vector<128x128xbf16>
    %c0_72 = arith.constant 0 : index
    %c0_73 = arith.constant 0 : index
    %326 = vector.load %arg14[%c0_72, %c0_73] : memref<128x128xbf16, #tpu.memory_space<vmem>>, vector<128x128xbf16>
    tpu.vector_store %arg14[%c0_72, %c0_73], %325 {strides = array<i32>} : memref<128x128xbf16, #tpu.memory_space<vmem>>, vector<128x128xbf16>,
    %c0_74 = arith.constant 0 : index
    %c0_75 = arith.constant 0 : index
    %327 = vector.load %arg9[%c0_74, %c0_75] : memref<32x128xbf16, #tpu.memory_space<vmem>>, vector<32x128xbf16>
    %cst_76 = arith.constant 0.000000e+00 : f32
    %328 = vector.broadcast %cst_76 : f32 to vector<16x32xf32>
    %cst_77 = arith.constant 0.000000e+00 : f32
    %329 = vector.broadcast %cst_77 : f32 to vector<16x32xf32>
    %c0_i32_78 = arith.constant 0 : i32
    %c16_i32_79 = arith.constant 16 : i32
    %330 = arith.muli %c0_i32_78, %c16_i32_79 : i32
    %331 = tpu.assume_multiple %330, 16 : i32
    %332 = arith.index_cast %331 : i32 to index
    %c0_80 = arith.constant 0 : index
    %333 = vector.load %arg14[%332, %c0_80] : memref<128x128xbf16, #tpu.memory_space<vmem>>, vector<16x128xbf16>
    %334 = arith.extf %333 : vector<16x128xbf16> to vector<16x128xf32>
    %335 = arith.truncf %328 : vector<16x32xf32> to vector<16x32xbf16>
    %cst_81 = arith.constant dense<0.000000e+00> : vector<16x128xf32>
    %336 = tpu.matmul %335, %327, %cst_81 {dimension_numbers = #tpu.dot_dimension_numbers<[1], [0], [0], [1], [0, 0, 1, 1], [], []>} : vector<16x32xbf16>, vector<32x128xbf16>, vector<16x128xf32> -> vector<16x128xf32>
    %337 = arith.addf %334, %336 : vector<16x128xf32>
    %338 = vector.extract_strided_slice %337 {offsets = [0, 0], sizes = [16, 96], strides = [1, 1]} : vector<16x128xf32> to vector<16x96xf32>
    %339 = arith.negf %338 : vector<16x96xf32>
    %340 = math.exp %339 : vector<16x96xf32>
    %cst_82 = arith.constant 1.000000e+00 : f32
    %341 = vector.broadcast %cst_82 : f32 to vector<16x96xf32>
    %342 = arith.addf %341, %340 : vector<16x96xf32>
    %343 = arith.divf %341, %342 : vector<16x96xf32>
    %344 = vector.extract_strided_slice %337 {offsets = [0, 96], sizes = [16, 32], strides = [1, 1]} : vector<16x128xf32> to vector<16x32xf32>
    %345 = math.tanh %344 : vector<16x32xf32>
    %346 = vector.extract_strided_slice %343 {offsets = [0, 0], sizes = [16, 32], strides = [1, 1]} : vector<16x96xf32> to vector<16x32xf32>
    %347 = vector.extract_strided_slice %343 {offsets = [0, 32], sizes = [16, 32], strides = [1, 1]} : vector<16x96xf32> to vector<16x32xf32>
    %348 = vector.extract_strided_slice %343 {offsets = [0, 64], sizes = [16, 32], strides = [1, 1]} : vector<16x96xf32> to vector<16x32xf32>
    %349 = arith.mulf %347, %329 : vector<16x32xf32>
    %350 = arith.mulf %346, %345 : vector<16x32xf32>
    %351 = arith.addf %349, %350 : vector<16x32xf32>
    %352 = math.tanh %351 : vector<16x32xf32>
    %353 = arith.mulf %348, %352 : vector<16x32xf32>
    %354 = vector.broadcast %c0_i32_78 : i32 to vector<16x1xi32>
    %355 = arith.cmpi sgt, %0, %354 : vector<16x1xi32>
    %356 = vector.shape_cast %355 : vector<16x1xi1> to vector<16x1xi1>
    %357 = vector.broadcast %356 : vector<16x1xi1> to vector<16x32xi1>
    %358 = arith.select %357, %353, %328 : vector<16x32xi1>, vector<16x32xf32>
    %359 = vector.shape_cast %355 : vector<16x1xi1> to vector<16x1xi1>
    %360 = vector.broadcast %359 : vector<16x1xi1> to vector<16x32xi1>
    %361 = arith.select %360, %351, %329 : vector<16x32xi1>, vector<16x32xf32>
    %c1_i32_83 = arith.constant 1 : i32
    %c16_i32_84 = arith.constant 16 : i32
    %362 = arith.muli %c1_i32_83, %c16_i32_84 : i32
    %363 = tpu.assume_multiple %362, 16 : i32
    %364 = arith.index_cast %363 : i32 to index
    %c0_85 = arith.constant 0 : index
    %365 = vector.load %arg14[%364, %c0_85] : memref<128x128xbf16, #tpu.memory_space<vmem>>, vector<16x128xbf16>
    %366 = arith.extf %365 : vector<16x128xbf16> to vector<16x128xf32>
    %367 = arith.truncf %358 : vector<16x32xf32> to vector<16x32xbf16>
    %cst_86 = arith.constant dense<0.000000e+00> : vector<16x128xf32>
    %368 = tpu.matmul %367, %327, %cst_86 {dimension_numbers = #tpu.dot_dimension_numbers<[1], [0], [0], [1], [0, 0, 1, 1], [], []>} : vector<16x32xbf16>, vector<32x128xbf16>, vector<16x128xf32> -> vector<16x128xf32>
    %369 = arith.addf %366, %368 : vector<16x128xf32>
    %370 = vector.extract_strided_slice %369 {offsets = [0, 0], sizes = [16, 96], strides = [1, 1]} : vector<16x128xf32> to vector<16x96xf32>
    %371 = arith.negf %370 : vector<16x96xf32>
    %372 = math.exp %371 : vector<16x96xf32>
    %cst_87 = arith.constant 1.000000e+00 : f32
    %373 = vector.broadcast %cst_87 : f32 to vector<16x96xf32>
    %374 = arith.addf %373, %372 : vector<16x96xf32>
    %375 = arith.divf %373, %374 : vector<16x96xf32>
    %376 = vector.extract_strided_slice %369 {offsets = [0, 96], sizes = [16, 32], strides = [1, 1]} : vector<16x128xf32> to vector<16x32xf32>
    %377 = math.tanh %376 : vector<16x32xf32>
    %378 = vector.extract_strided_slice %375 {offsets = [0, 0], sizes = [16, 32], strides = [1, 1]} : vector<16x96xf32> to vector<16x32xf32>
    %379 = vector.extract_strided_slice %375 {offsets = [0, 32], sizes = [16, 32], strides = [1, 1]} : vector<16x96xf32> to vector<16x32xf32>
    %380 = vector.extract_strided_slice %375 {offsets = [0, 64], sizes = [16, 32], strides = [1, 1]} : vector<16x96xf32> to vector<16x32xf32>
    %381 = arith.mulf %379, %361 : vector<16x32xf32>
    %382 = arith.mulf %378, %377 : vector<16x32xf32>
    %383 = arith.addf %381, %382 : vector<16x32xf32>
    %384 = math.tanh %383 : vector<16x32xf32>
    %385 = arith.mulf %380, %384 : vector<16x32xf32>
    %386 = vector.broadcast %c1_i32_83 : i32 to vector<16x1xi32>
    %387 = arith.cmpi sgt, %0, %386 : vector<16x1xi32>
    %388 = vector.shape_cast %387 : vector<16x1xi1> to vector<16x1xi1>
    %389 = vector.broadcast %388 : vector<16x1xi1> to vector<16x32xi1>
    %390 = arith.select %389, %385, %358 : vector<16x32xi1>, vector<16x32xf32>
    %391 = vector.shape_cast %387 : vector<16x1xi1> to vector<16x1xi1>
    %392 = vector.broadcast %391 : vector<16x1xi1> to vector<16x32xi1>
    %393 = arith.select %392, %383, %361 : vector<16x32xi1>, vector<16x32xf32>
    %c2_i32_88 = arith.constant 2 : i32
    %c16_i32_89 = arith.constant 16 : i32
    %394 = arith.muli %c2_i32_88, %c16_i32_89 : i32
    %395 = tpu.assume_multiple %394, 16 : i32
    %396 = arith.index_cast %395 : i32 to index
    %c0_90 = arith.constant 0 : index
    %397 = vector.load %arg14[%396, %c0_90] : memref<128x128xbf16, #tpu.memory_space<vmem>>, vector<16x128xbf16>
    %398 = arith.extf %397 : vector<16x128xbf16> to vector<16x128xf32>
    %399 = arith.truncf %390 : vector<16x32xf32> to vector<16x32xbf16>
    %cst_91 = arith.constant dense<0.000000e+00> : vector<16x128xf32>
    %400 = tpu.matmul %399, %327, %cst_91 {dimension_numbers = #tpu.dot_dimension_numbers<[1], [0], [0], [1], [0, 0, 1, 1], [], []>} : vector<16x32xbf16>, vector<32x128xbf16>, vector<16x128xf32> -> vector<16x128xf32>
    %401 = arith.addf %398, %400 : vector<16x128xf32>
    %402 = vector.extract_strided_slice %401 {offsets = [0, 0], sizes = [16, 96], strides = [1, 1]} : vector<16x128xf32> to vector<16x96xf32>
    %403 = arith.negf %402 : vector<16x96xf32>
    %404 = math.exp %403 : vector<16x96xf32>
    %cst_92 = arith.constant 1.000000e+00 : f32
    %405 = vector.broadcast %cst_92 : f32 to vector<16x96xf32>
    %406 = arith.addf %405, %404 : vector<16x96xf32>
    %407 = arith.divf %405, %406 : vector<16x96xf32>
    %408 = vector.extract_strided_slice %401 {offsets = [0, 96], sizes = [16, 32], strides = [1, 1]} : vector<16x128xf32> to vector<16x32xf32>
    %409 = math.tanh %408 : vector<16x32xf32>
    %410 = vector.extract_strided_slice %407 {offsets = [0, 0], sizes = [16, 32], strides = [1, 1]} : vector<16x96xf32> to vector<16x32xf32>
    %411 = vector.extract_strided_slice %407 {offsets = [0, 32], sizes = [16, 32], strides = [1, 1]} : vector<16x96xf32> to vector<16x32xf32>
    %412 = vector.extract_strided_slice %407 {offsets = [0, 64], sizes = [16, 32], strides = [1, 1]} : vector<16x96xf32> to vector<16x32xf32>
    %413 = arith.mulf %411, %393 : vector<16x32xf32>
    %414 = arith.mulf %410, %409 : vector<16x32xf32>
    %415 = arith.addf %413, %414 : vector<16x32xf32>
    %416 = math.tanh %415 : vector<16x32xf32>
    %417 = arith.mulf %412, %416 : vector<16x32xf32>
    %418 = vector.broadcast %c2_i32_88 : i32 to vector<16x1xi32>
    %419 = arith.cmpi sgt, %0, %418 : vector<16x1xi32>
    %420 = vector.shape_cast %419 : vector<16x1xi1> to vector<16x1xi1>
    %421 = vector.broadcast %420 : vector<16x1xi1> to vector<16x32xi1>
    %422 = arith.select %421, %417, %390 : vector<16x32xi1>, vector<16x32xf32>
    %423 = vector.shape_cast %419 : vector<16x1xi1> to vector<16x1xi1>
    %424 = vector.broadcast %423 : vector<16x1xi1> to vector<16x32xi1>
    %425 = arith.select %424, %415, %393 : vector<16x32xi1>, vector<16x32xf32>
    %c3_i32_93 = arith.constant 3 : i32
    %c16_i32_94 = arith.constant 16 : i32
    %426 = arith.muli %c3_i32_93, %c16_i32_94 : i32
    %427 = tpu.assume_multiple %426, 16 : i32
    %428 = arith.index_cast %427 : i32 to index
    %c0_95 = arith.constant 0 : index
    %429 = vector.load %arg14[%428, %c0_95] : memref<128x128xbf16, #tpu.memory_space<vmem>>, vector<16x128xbf16>
    %430 = arith.extf %429 : vector<16x128xbf16> to vector<16x128xf32>
    %431 = arith.truncf %422 : vector<16x32xf32> to vector<16x32xbf16>
    %cst_96 = arith.constant dense<0.000000e+00> : vector<16x128xf32>
    %432 = tpu.matmul %431, %327, %cst_96 {dimension_numbers = #tpu.dot_dimension_numbers<[1], [0], [0], [1], [0, 0, 1, 1], [], []>} : vector<16x32xbf16>, vector<32x128xbf16>, vector<16x128xf32> -> vector<16x128xf32>
    %433 = arith.addf %430, %432 : vector<16x128xf32>
    %434 = vector.extract_strided_slice %433 {offsets = [0, 0], sizes = [16, 96], strides = [1, 1]} : vector<16x128xf32> to vector<16x96xf32>
    %435 = arith.negf %434 : vector<16x96xf32>
    %436 = math.exp %435 : vector<16x96xf32>
    %cst_97 = arith.constant 1.000000e+00 : f32
    %437 = vector.broadcast %cst_97 : f32 to vector<16x96xf32>
    %438 = arith.addf %437, %436 : vector<16x96xf32>
    %439 = arith.divf %437, %438 : vector<16x96xf32>
    %440 = vector.extract_strided_slice %433 {offsets = [0, 96], sizes = [16, 32], strides = [1, 1]} : vector<16x128xf32> to vector<16x32xf32>
    %441 = math.tanh %440 : vector<16x32xf32>
    %442 = vector.extract_strided_slice %439 {offsets = [0, 0], sizes = [16, 32], strides = [1, 1]} : vector<16x96xf32> to vector<16x32xf32>
    %443 = vector.extract_strided_slice %439 {offsets = [0, 32], sizes = [16, 32], strides = [1, 1]} : vector<16x96xf32> to vector<16x32xf32>
    %444 = vector.extract_strided_slice %439 {offsets = [0, 64], sizes = [16, 32], strides = [1, 1]} : vector<16x96xf32> to vector<16x32xf32>
    %445 = arith.mulf %443, %425 : vector<16x32xf32>
    %446 = arith.mulf %442, %441 : vector<16x32xf32>
    %447 = arith.addf %445, %446 : vector<16x32xf32>
    %448 = math.tanh %447 : vector<16x32xf32>
    %449 = arith.mulf %444, %448 : vector<16x32xf32>
    %450 = vector.broadcast %c3_i32_93 : i32 to vector<16x1xi32>
    %451 = arith.cmpi sgt, %0, %450 : vector<16x1xi32>
    %452 = vector.shape_cast %451 : vector<16x1xi1> to vector<16x1xi1>
    %453 = vector.broadcast %452 : vector<16x1xi1> to vector<16x32xi1>
    %454 = arith.select %453, %449, %422 : vector<16x32xi1>, vector<16x32xf32>
    %455 = vector.shape_cast %451 : vector<16x1xi1> to vector<16x1xi1>
    %456 = vector.broadcast %455 : vector<16x1xi1> to vector<16x32xi1>
    %457 = arith.select %456, %447, %425 : vector<16x32xi1>, vector<16x32xf32>
    %c4_i32_98 = arith.constant 4 : i32
    %c16_i32_99 = arith.constant 16 : i32
    %458 = arith.muli %c4_i32_98, %c16_i32_99 : i32
    %459 = tpu.assume_multiple %458, 16 : i32
    %460 = arith.index_cast %459 : i32 to index
    %c0_100 = arith.constant 0 : index
    %461 = vector.load %arg14[%460, %c0_100] : memref<128x128xbf16, #tpu.memory_space<vmem>>, vector<16x128xbf16>
    %462 = arith.extf %461 : vector<16x128xbf16> to vector<16x128xf32>
    %463 = arith.truncf %454 : vector<16x32xf32> to vector<16x32xbf16>
    %cst_101 = arith.constant dense<0.000000e+00> : vector<16x128xf32>
    %464 = tpu.matmul %463, %327, %cst_101 {dimension_numbers = #tpu.dot_dimension_numbers<[1], [0], [0], [1], [0, 0, 1, 1], [], []>} : vector<16x32xbf16>, vector<32x128xbf16>, vector<16x128xf32> -> vector<16x128xf32>
    %465 = arith.addf %462, %464 : vector<16x128xf32>
    %466 = vector.extract_strided_slice %465 {offsets = [0, 0], sizes = [16, 96], strides = [1, 1]} : vector<16x128xf32> to vector<16x96xf32>
    %467 = arith.negf %466 : vector<16x96xf32>
    %468 = math.exp %467 : vector<16x96xf32>
    %cst_102 = arith.constant 1.000000e+00 : f32
    %469 = vector.broadcast %cst_102 : f32 to vector<16x96xf32>
    %470 = arith.addf %469, %468 : vector<16x96xf32>
    %471 = arith.divf %469, %470 : vector<16x96xf32>
    %472 = vector.extract_strided_slice %465 {offsets = [0, 96], sizes = [16, 32], strides = [1, 1]} : vector<16x128xf32> to vector<16x32xf32>
    %473 = math.tanh %472 : vector<16x32xf32>
    %474 = vector.extract_strided_slice %471 {offsets = [0, 0], sizes = [16, 32], strides = [1, 1]} : vector<16x96xf32> to vector<16x32xf32>
    %475 = vector.extract_strided_slice %471 {offsets = [0, 32], sizes = [16, 32], strides = [1, 1]} : vector<16x96xf32> to vector<16x32xf32>
    %476 = vector.extract_strided_slice %471 {offsets = [0, 64], sizes = [16, 32], strides = [1, 1]} : vector<16x96xf32> to vector<16x32xf32>
    %477 = arith.mulf %475, %457 : vector<16x32xf32>
    %478 = arith.mulf %474, %473 : vector<16x32xf32>
    %479 = arith.addf %477, %478 : vector<16x32xf32>
    %480 = math.tanh %479 : vector<16x32xf32>
    %481 = arith.mulf %476, %480 : vector<16x32xf32>
    %482 = vector.broadcast %c4_i32_98 : i32 to vector<16x1xi32>
    %483 = arith.cmpi sgt, %0, %482 : vector<16x1xi32>
    %484 = vector.shape_cast %483 : vector<16x1xi1> to vector<16x1xi1>
    %485 = vector.broadcast %484 : vector<16x1xi1> to vector<16x32xi1>
    %486 = arith.select %485, %481, %454 : vector<16x32xi1>, vector<16x32xf32>
    %487 = vector.shape_cast %483 : vector<16x1xi1> to vector<16x1xi1>
    %488 = vector.broadcast %487 : vector<16x1xi1> to vector<16x32xi1>
    %489 = arith.select %488, %479, %457 : vector<16x32xi1>, vector<16x32xf32>
    %c5_i32_103 = arith.constant 5 : i32
    %c16_i32_104 = arith.constant 16 : i32
    %490 = arith.muli %c5_i32_103, %c16_i32_104 : i32
    %491 = tpu.assume_multiple %490, 16 : i32
    %492 = arith.index_cast %491 : i32 to index
    %c0_105 = arith.constant 0 : index
    %493 = vector.load %arg14[%492, %c0_105] : memref<128x128xbf16, #tpu.memory_space<vmem>>, vector<16x128xbf16>
    %494 = arith.extf %493 : vector<16x128xbf16> to vector<16x128xf32>
    %495 = arith.truncf %486 : vector<16x32xf32> to vector<16x32xbf16>
    %cst_106 = arith.constant dense<0.000000e+00> : vector<16x128xf32>
    %496 = tpu.matmul %495, %327, %cst_106 {dimension_numbers = #tpu.dot_dimension_numbers<[1], [0], [0], [1], [0, 0, 1, 1], [], []>} : vector<16x32xbf16>, vector<32x128xbf16>, vector<16x128xf32> -> vector<16x128xf32>
    %497 = arith.addf %494, %496 : vector<16x128xf32>
    %498 = vector.extract_strided_slice %497 {offsets = [0, 0], sizes = [16, 96], strides = [1, 1]} : vector<16x128xf32> to vector<16x96xf32>
    %499 = arith.negf %498 : vector<16x96xf32>
    %500 = math.exp %499 : vector<16x96xf32>
    %cst_107 = arith.constant 1.000000e+00 : f32
    %501 = vector.broadcast %cst_107 : f32 to vector<16x96xf32>
    %502 = arith.addf %501, %500 : vector<16x96xf32>
    %503 = arith.divf %501, %502 : vector<16x96xf32>
    %504 = vector.extract_strided_slice %497 {offsets = [0, 96], sizes = [16, 32], strides = [1, 1]} : vector<16x128xf32> to vector<16x32xf32>
    %505 = math.tanh %504 : vector<16x32xf32>
    %506 = vector.extract_strided_slice %503 {offsets = [0, 0], sizes = [16, 32], strides = [1, 1]} : vector<16x96xf32> to vector<16x32xf32>
    %507 = vector.extract_strided_slice %503 {offsets = [0, 32], sizes = [16, 32], strides = [1, 1]} : vector<16x96xf32> to vector<16x32xf32>
    %508 = vector.extract_strided_slice %503 {offsets = [0, 64], sizes = [16, 32], strides = [1, 1]} : vector<16x96xf32> to vector<16x32xf32>
    %509 = arith.mulf %507, %489 : vector<16x32xf32>
    %510 = arith.mulf %506, %505 : vector<16x32xf32>
    %511 = arith.addf %509, %510 : vector<16x32xf32>
    %512 = math.tanh %511 : vector<16x32xf32>
    %513 = arith.mulf %508, %512 : vector<16x32xf32>
    %514 = vector.broadcast %c5_i32_103 : i32 to vector<16x1xi32>
    %515 = arith.cmpi sgt, %0, %514 : vector<16x1xi32>
    %516 = vector.shape_cast %515 : vector<16x1xi1> to vector<16x1xi1>
    %517 = vector.broadcast %516 : vector<16x1xi1> to vector<16x32xi1>
    %518 = arith.select %517, %513, %486 : vector<16x32xi1>, vector<16x32xf32>
    %519 = vector.shape_cast %515 : vector<16x1xi1> to vector<16x1xi1>
    %520 = vector.broadcast %519 : vector<16x1xi1> to vector<16x32xi1>
    %521 = arith.select %520, %511, %489 : vector<16x32xi1>, vector<16x32xf32>
    %c6_i32_108 = arith.constant 6 : i32
    %c16_i32_109 = arith.constant 16 : i32
    %522 = arith.muli %c6_i32_108, %c16_i32_109 : i32
    %523 = tpu.assume_multiple %522, 16 : i32
    %524 = arith.index_cast %523 : i32 to index
    %c0_110 = arith.constant 0 : index
    %525 = vector.load %arg14[%524, %c0_110] : memref<128x128xbf16, #tpu.memory_space<vmem>>, vector<16x128xbf16>
    %526 = arith.extf %525 : vector<16x128xbf16> to vector<16x128xf32>
    %527 = arith.truncf %518 : vector<16x32xf32> to vector<16x32xbf16>
    %cst_111 = arith.constant dense<0.000000e+00> : vector<16x128xf32>
    %528 = tpu.matmul %527, %327, %cst_111 {dimension_numbers = #tpu.dot_dimension_numbers<[1], [0], [0], [1], [0, 0, 1, 1], [], []>} : vector<16x32xbf16>, vector<32x128xbf16>, vector<16x128xf32> -> vector<16x128xf32>
    %529 = arith.addf %526, %528 : vector<16x128xf32>
    %530 = vector.extract_strided_slice %529 {offsets = [0, 0], sizes = [16, 96], strides = [1, 1]} : vector<16x128xf32> to vector<16x96xf32>
    %531 = arith.negf %530 : vector<16x96xf32>
    %532 = math.exp %531 : vector<16x96xf32>
    %cst_112 = arith.constant 1.000000e+00 : f32
    %533 = vector.broadcast %cst_112 : f32 to vector<16x96xf32>
    %534 = arith.addf %533, %532 : vector<16x96xf32>
    %535 = arith.divf %533, %534 : vector<16x96xf32>
    %536 = vector.extract_strided_slice %529 {offsets = [0, 96], sizes = [16, 32], strides = [1, 1]} : vector<16x128xf32> to vector<16x32xf32>
    %537 = math.tanh %536 : vector<16x32xf32>
    %538 = vector.extract_strided_slice %535 {offsets = [0, 0], sizes = [16, 32], strides = [1, 1]} : vector<16x96xf32> to vector<16x32xf32>
    %539 = vector.extract_strided_slice %535 {offsets = [0, 32], sizes = [16, 32], strides = [1, 1]} : vector<16x96xf32> to vector<16x32xf32>
    %540 = vector.extract_strided_slice %535 {offsets = [0, 64], sizes = [16, 32], strides = [1, 1]} : vector<16x96xf32> to vector<16x32xf32>
    %541 = arith.mulf %539, %521 : vector<16x32xf32>
    %542 = arith.mulf %538, %537 : vector<16x32xf32>
    %543 = arith.addf %541, %542 : vector<16x32xf32>
    %544 = math.tanh %543 : vector<16x32xf32>
    %545 = arith.mulf %540, %544 : vector<16x32xf32>
    %546 = vector.broadcast %c6_i32_108 : i32 to vector<16x1xi32>
    %547 = arith.cmpi sgt, %0, %546 : vector<16x1xi32>
    %548 = vector.shape_cast %547 : vector<16x1xi1> to vector<16x1xi1>
    %549 = vector.broadcast %548 : vector<16x1xi1> to vector<16x32xi1>
    %550 = arith.select %549, %545, %518 : vector<16x32xi1>, vector<16x32xf32>
    %551 = vector.shape_cast %547 : vector<16x1xi1> to vector<16x1xi1>
    %552 = vector.broadcast %551 : vector<16x1xi1> to vector<16x32xi1>
    %553 = arith.select %552, %543, %521 : vector<16x32xi1>, vector<16x32xf32>
    %c7_i32_113 = arith.constant 7 : i32
    %c16_i32_114 = arith.constant 16 : i32
    %554 = arith.muli %c7_i32_113, %c16_i32_114 : i32
    %555 = tpu.assume_multiple %554, 16 : i32
    %556 = arith.index_cast %555 : i32 to index
    %c0_115 = arith.constant 0 : index
    %557 = vector.load %arg14[%556, %c0_115] : memref<128x128xbf16, #tpu.memory_space<vmem>>, vector<16x128xbf16>
    %558 = arith.extf %557 : vector<16x128xbf16> to vector<16x128xf32>
    %559 = arith.truncf %550 : vector<16x32xf32> to vector<16x32xbf16>
    %cst_116 = arith.constant dense<0.000000e+00> : vector<16x128xf32>
    %560 = tpu.matmul %559, %327, %cst_116 {dimension_numbers = #tpu.dot_dimension_numbers<[1], [0], [0], [1], [0, 0, 1, 1], [], []>} : vector<16x32xbf16>, vector<32x128xbf16>, vector<16x128xf32> -> vector<16x128xf32>
    %561 = arith.addf %558, %560 : vector<16x128xf32>
    %562 = vector.extract_strided_slice %561 {offsets = [0, 0], sizes = [16, 96], strides = [1, 1]} : vector<16x128xf32> to vector<16x96xf32>
    %563 = arith.negf %562 : vector<16x96xf32>
    %564 = math.exp %563 : vector<16x96xf32>
    %cst_117 = arith.constant 1.000000e+00 : f32
    %565 = vector.broadcast %cst_117 : f32 to vector<16x96xf32>
    %566 = arith.addf %565, %564 : vector<16x96xf32>
    %567 = arith.divf %565, %566 : vector<16x96xf32>
    %568 = vector.extract_strided_slice %561 {offsets = [0, 96], sizes = [16, 32], strides = [1, 1]} : vector<16x128xf32> to vector<16x32xf32>
    %569 = math.tanh %568 : vector<16x32xf32>
    %570 = vector.extract_strided_slice %567 {offsets = [0, 0], sizes = [16, 32], strides = [1, 1]} : vector<16x96xf32> to vector<16x32xf32>
    %571 = vector.extract_strided_slice %567 {offsets = [0, 32], sizes = [16, 32], strides = [1, 1]} : vector<16x96xf32> to vector<16x32xf32>
    %572 = vector.extract_strided_slice %567 {offsets = [0, 64], sizes = [16, 32], strides = [1, 1]} : vector<16x96xf32> to vector<16x32xf32>
    %573 = arith.mulf %571, %553 : vector<16x32xf32>
    %574 = arith.mulf %570, %569 : vector<16x32xf32>
    %575 = arith.addf %573, %574 : vector<16x32xf32>
    %576 = math.tanh %575 : vector<16x32xf32>
    %577 = arith.mulf %572, %576 : vector<16x32xf32>
    %578 = vector.broadcast %c7_i32_113 : i32 to vector<16x1xi32>
    %579 = arith.cmpi sgt, %0, %578 : vector<16x1xi32>
    %580 = vector.shape_cast %579 : vector<16x1xi1> to vector<16x1xi1>
    %581 = vector.broadcast %580 : vector<16x1xi1> to vector<16x32xi1>
    %582 = arith.select %581, %577, %550 : vector<16x32xi1>, vector<16x32xf32>
    %583 = vector.shape_cast %579 : vector<16x1xi1> to vector<16x1xi1>
    %584 = vector.broadcast %583 : vector<16x1xi1> to vector<16x32xi1>
    %585 = arith.select %584, %575, %553 : vector<16x32xi1>, vector<16x32xf32>
    %c8_i32_118 = arith.constant 8 : i32
    %c0_119 = arith.constant 0 : index
    %c0_120 = arith.constant 0 : index
    %586 = vector.load %arg11[%c0_119, %c0_120] : memref<32x128xf32, #tpu.memory_space<vmem>>, vector<32x128xf32>
    %cst_121 = arith.constant dense<0.000000e+00> : vector<16x128xf32>
    %587 = tpu.matmul %582, %586, %cst_121 {dimension_numbers = #tpu.dot_dimension_numbers<[1], [0], [0], [1], [0, 0, 1, 1], [], []>} : vector<16x32xf32>, vector<32x128xf32>, vector<16x128xf32> -> vector<16x128xf32>
    %c0_122 = arith.constant 0 : index
    %c0_123 = arith.constant 0 : index
    %588 = vector.load %arg12[%c0_122, %c0_123] : memref<1x128xf32, #tpu.memory_space<vmem>>, vector<1x128xf32>
    %589 = vector.broadcast %588 : vector<1x128xf32> to vector<16x128xf32>
    %590 = arith.addf %587, %589 : vector<16x128xf32>
    %c0_124 = arith.constant 0 : index
    %c0_125 = arith.constant 0 : index
    %591 = vector.load %arg13[%c0_124, %c0_125] : memref<16x128xf32, #tpu.memory_space<vmem>>, vector<16x128xf32>
    tpu.vector_store %arg13[%c0_124, %c0_125], %590 {strides = array<i32>} : memref<16x128xf32, #tpu.memory_space<vmem>>, vector<16x128xf32>,
    return
  }
  func.func @transform_0(%arg0: i32) -> (i32, i32) {
    %c0_i32 = arith.constant 0 : i32
    %c0_i32_0 = arith.constant 0 : i32
    %c0_i32_1 = arith.constant 0 : i32
    return %c0_i32, %c0_i32_0 : i32, i32
  }
  func.func @transform_1(%arg0: i32) -> (i32, i32) {
    %c0_i32 = arith.constant 0 : i32
    %c0_i32_0 = arith.constant 0 : i32
    %c0_i32_1 = arith.constant 0 : i32
    return %c0_i32, %c0_i32_0 : i32, i32
  }
  func.func @transform_2(%arg0: i32) -> (i32, i32) {
    %c0_i32 = arith.constant 0 : i32
    %c0_i32_0 = arith.constant 0 : i32
    %c0_i32_1 = arith.constant 0 : i32
    return %c0_i32, %c0_i32_0 : i32, i32
  }
  func.func @transform_3(%arg0: i32) -> (i32, i32) {
    %c0_i32 = arith.constant 0 : i32
    %c0_i32_0 = arith.constant 0 : i32
    %c0_i32_1 = arith.constant 0 : i32
    return %c0_i32, %c0_i32_0 : i32, i32
  }
  func.func @transform_4(%arg0: i32) -> (i32, i32) {
    %c0_i32 = arith.constant 0 : i32
    %c0_i32_0 = arith.constant 0 : i32
    %c0_i32_1 = arith.constant 0 : i32
    return %c0_i32, %c0_i32_0 : i32, i32
  }
  func.func @transform_5(%arg0: i32) -> (i32, i32) {
    %c0_i32 = arith.constant 0 : i32
    %c0_i32_0 = arith.constant 0 : i32
    %c0_i32_1 = arith.constant 0 : i32
    return %c0_i32, %c0_i32_0 : i32, i32
  }
  func.func @transform_6(%arg0: i32) -> (i32, i32) {
    %c0_i32 = arith.constant 0 : i32
    %c0_i32_0 = arith.constant 0 : i32
    %c0_i32_1 = arith.constant 0 : i32
    return %c0_i32, %c0_i32_0 : i32, i32
  }
  func.func @transform_7(%arg0: i32) -> (i32, i32) {
    %c0_i32 = arith.constant 0 : i32
    %c0_i32_0 = arith.constant 0 : i32
    %c0_i32_1 = arith.constant 0 : i32
    return %c0_i32, %c0_i32_0 : i32, i32
  }
  func.func @transform_8(%arg0: i32) -> (i32, i32) {
    %c0_i32 = arith.constant 0 : i32
    %c0_i32_0 = arith.constant 0 : i32
    %c0_i32_1 = arith.constant 0 : i32
    return %c0_i32, %c0_i32_0 : i32, i32
  }
  func.func @transform_9(%arg0: i32) -> (i32, i32) {
    %c0_i32 = arith.constant 0 : i32
    %c0_i32_0 = arith.constant 0 : i32
    %c0_i32_1 = arith.constant 0 : i32
    return %c0_i32, %c0_i32_0 : i32, i32
  }
  func.func @transform_10(%arg0: i32) -> (i32, i32) {
    %c0_i32 = arith.constant 0 : i32
    %c0_i32_0 = arith.constant 0 : i32
    %c0_i32_1 = arith.constant 0 : i32
    return %c0_i32, %c0_i32_0 : i32, i32
  }
  func.func @transform_11(%arg0: i32) -> (i32, i32) {
    %c0_i32 = arith.constant 0 : i32
    %c0_i32_0 = arith.constant 0 : i32
    %c0_i32_1 = arith.constant 0 : i32
    return %c0_i32, %c0_i32_0 : i32, i32
  }
  func.func @transform_12(%arg0: i32) -> (i32, i32) {
    %c0_i32 = arith.constant 0 : i32
    %c0_i32_0 = arith.constant 0 : i32
    %c0_i32_1 = arith.constant 0 : i32
    return %c0_i32, %c0_i32_0 : i32, i32
  }
}

</mosaic_0001>

<bundles_post_ra>
// kernel: lstm_text_classifier_forward.1
= control target key start
LH: loop header
LB: loop body
LE: loop exit
PB: predicated region body
PF: predicated region fallthrough
CT: control target
= control target key end

     0   :  { %vm60_vm0 = vcmask 261120   ;;  %v3245_v30 = vmov 0.0   ;;  %vm3246_vm1 = vmmov 0   ;;  %v3247_v33 = vmov 0   ;;  %s3248_s26 = smov 32   ;;  %s3249_s29 = smov 64   ;;  %s4406_s0 = inlined_call_operand.vmem [shape: f32[128,32], index: 0, kind: input, shape index: {}]   ;;  %s4407_s4 = inlined_call_operand.vmem [shape: bf16[32,128], index: 4, kind: input, shape index: {}]   ;;  %s4408_s5 = inlined_call_operand.vmem [shape: bf16[32,128], index: 5, kind: input, shape index: {}]   ;;  %s4409_s1 = inlined_call_operand.vmem [shape: f32[1,32], index: 1, kind: input, shape index: {}]   ;;  %s4410_s2 = inlined_call_operand.vmem [shape: f32[1,32], index: 2, kind: input, shape index: {}]   ;;  %s4411_s6 = inlined_call_operand.vmem [shape: f32[1,128], index: 6, kind: input, shape index: {}]   ;;  %s4412_s3 = inlined_call_operand.vmem [shape: s32[16,1], index: 3, kind: input, shape index: {}]   ;;  %s4413_s7 = inlined_call_operand.vmem [shape: bf16[32,128], index: 7, kind: input, shape index: {}]   ;;  %s4414_s9 = inlined_call_operand.vmem [shape: f32[1,128], index: 9, kind: input, shape index: {}]   ;;  %s4415_s8 = inlined_call_operand.vmem [shape: bf16[32,128], index: 8, kind: input, shape index: {}]   ;;  %s4416_s10 = inlined_call_operand.vmem [shape: f32[32,128], index: 10, kind: input, shape index: {}]   ;;  %s4417_s11 = inlined_call_operand.vmem [shape: f32[1,128], index: 11, kind: input, shape index: {}]   ;;  %s4418_s12 = inlined_call_operand.vmem [shape: f32[16,128], index: 12, kind: output, shape index: {}]  }
   0x1   :  { %v44_v0 = vld [vmem:[%s4406_s0] sm:$0xff]  ;;  %v46_v1 = vld [vmem:[%s4406_s0 + $0x10] sm:$0xff]  ;;  %v45_v2 = vld [vmem:[%s4406_s0 + $0x8] sm:$0xff]  ;;  %2768 = vmatprep.subr.bf16.mxu1 %v3245_v30  ;;  %2772 = vmatprep.mubr.msk.bf16.mxu1 %vm3246_vm1, %v3245_v30 }
   0x2   :  { %v61_v3 = vsel %vm60_vm0, %v44_v0, 0.0  ;;  %v67_v4 = vsel %vm60_vm0, %v46_v1, 0.0  ;;  %v47_v5 = vld [vmem:[%s4406_s0 + $0x18] sm:$0xff]  ;;  %v64_v6 = vsel %vm60_vm0, %v45_v2, 0.0  ;;  %v2942_v28 = vld [vmem:[%s4407_s4] sm:$0xff]   ;;  %v2943_v29 = vld [vmem:[%s4407_s4 + $0x8] sm:$0xff]   ;;  %2940 = vset.pattern.permute.xlu0 %v3247_v33  ;;  %2941 = vset.pattern.permute.xlu1 %v3247_v33 }
   0x3   :  { %62 = vadd.xlane.f32.xlu0 %v61_v3  ;;  %68 = vadd.xlane.f32.xlu1 %v67_v4  ;;  %v70_v7 = vsel %vm60_vm0, %v47_v5, 0.0  ;;  %v3361_v31 = vld [vmem:[%s4408_s5] sm:$0xff]   ;;  %v3369_v32 = vld [vmem:[%s4408_s5 + $0x8] sm:$0xff]  }
   0x4   :  { %2748 = vmatprep.subr.bf16.mxu0 %v2942_v28  ;;  %2769 = vmatpush3.bf16.msra.mxu1 %v3361_v31  ;;  %v3388_v48 = vld [vmem:[%s4409_s1] ss:$0 sm:$0xff] }
   0x5   :  { %2749 = vmatpush3.bf16.msra.mxu0 %v2942_v28  ;;  %2770 = vmatprep.subr.bf16.mxu1 %v3245_v30  ;;  %v3395_v53 = vld [vmem:[%s4410_s2] ss:$0 sm:$0xff] }
   0x6   :  { %2750 = vmatprep.subr.bf16.mxu0 %v2943_v29 }
   0x7   :  { %65 = vadd.xlane.f32.xlu0 %v64_v6  ;;  %71 = vadd.xlane.f32.xlu1 %v70_v7 }
   0x8   :  { %2771 = vmatpush3.bf16.msra.mxu1 %v3369_v32 }
   0x9   :  { %2751 = vmatpush3.bf16.msra.mxu0 %v2943_v29  ;;  %2776 = vmatprep.subr.bf16.mxu1 %v3245_v30 }
   0xa   :  { %2800 = vmatprep.subr.bf16.mxu0 %v3245_v30 }
   0xb   :  { %2773 = vmatmul.mubr.bf16.vlgmr.msra.gmra.mrb[0].mxu1 %v3247_v33 }
   0xc   :  { %2777 = vmatpush3.bf16.msra.mxu1 %v3361_v31  ;;  %2780 = vmatprep.mubr.msk.bf16.mxu1 %vm3246_vm1, %v3245_v30 }
   0xd   :  { %2778 = vmatprep.subr.bf16.mxu1 %v3245_v30 }
  0x10   :  { %2779 = vmatpush3.bf16.msra.mxu1 %v3369_v32 }
  0x11   :  { %2784 = vmatprep.subr.bf16.mxu1 %v3245_v30 }
  0x90   :  { %v63_v8 = vpop.xlane.xlu0 %62  ;;  %v69_v9 = vpop.xlane.xlu1 %68 }
  0x91   :  { %v110_v10 = vmul.f32 0.03125, %v63_v8  ;;  %v112_v11 = vmul.f32 0.03125, %v69_v9  ;;  %v3417_v9 = vld [vmem:[%s4411_s6] ss:$0 sm:$0xff] }
  0x93   :  { %v3331_v12 = vsub.f32 %v44_v0, %v110_v10  ;;  %v3333_v13 = vsub.f32 %v46_v1, %v112_v11 }
  0x94   :  { %v66_v14 = vpop.xlane.xlu0 %65  ;;  %v72_v15 = vpop.xlane.xlu1 %71 }
  0x95   :  { %v111_v16 = vmul.f32 0.03125, %v66_v14  ;;  %v113_v17 = vmul.f32 0.03125, %v72_v15  ;;  %v142_v18 = vmul.f32 %v3331_v12, %v3331_v12  ;;  %v144_v19 = vmul.f32 %v3333_v13, %v3333_v13 }
  0x97   :  { %v3339_v20 = vsub.f32 %v45_v2, %v111_v16  ;;  %v3341_v21 = vsub.f32 %v47_v5, %v113_v17  ;;  %v158_v22 = vsel %vm60_vm0, %v142_v18, 0.0  ;;  %v164_v23 = vsel %vm60_vm0, %v144_v19, 0.0 }
  0x98   :  { %159 = vadd.xlane.f32.xlu0 %v158_v22 }
  0x99   :  { %v143_v24 = vmul.f32 %v3339_v20, %v3339_v20  ;;  %v145_v25 = vmul.f32 %v3341_v21, %v3341_v21 }
  0x9b   :  { %v161_v26 = vsel %vm60_vm0, %v143_v24, 0.0  ;;  %v167_v27 = vsel %vm60_vm0, %v145_v25, 0.0 }
  0x9c   :  { %165 = vadd.xlane.f32.xlu0 %v164_v23  ;;  %162 = vadd.xlane.f32.xlu1 %v161_v26  ;;  %v3428_v23 = vld [vmem:[%s4412_s3] sm:$0xff] }
  0x9d   :  { %vm613_vm2 = vcmp.gt.s32.totalorder %v3428_v23, 0  ;;  %vm733_vm7 = vcmp.gt.s32.totalorder %v3428_v23, 1  ;;  %vm854_vm10 = vcmp.gt.s32.totalorder %v3428_v23, 2  ;;  %vm975_vm14 = vcmp.gt.s32.totalorder %v3428_v23, 3 }
  0x9e   :  { %v615_v26 = vsel %vm613_vm2, 1, %v3247_v33 }
  0xa0   :  { %168 = vadd.xlane.f32.xlu1 %v167_v27 }
  0xde   :  { %v556_v4 = vpop.f32.mrb[0].mxu1 }
  0xdf   :  { %v2774_v5 = vpop.f32.mrb[1].mxu1 }
  0xe0   :  { %v559_v6 = vpop.f32.mrb[2].mxu1 }
  0xe1   :  { %v2775_v7 = vpop.f32.mrb[3].mxu1 }
 0x125   :  { %v160_v34 = vpop.xlane.xlu0 %159 }
 0x126   :  { %v206_v35 = vmul.f32 0.03125, %v160_v34 }
 0x128   :  { %v222_v36 = vadd.f32 1e-05, %v206_v35 }
 0x129   :  { %v163_v37 = vpop.xlane.xlu1 %162  ;;  %v166_v38 = vpop.xlane.xlu0 %165 }
 0x12a   :  { %2950 = vrsqrt.f32 %v222_v36  ;;  %v207_v39 = vmul.f32 0.03125, %v163_v37  ;;  %v208_v40 = vmul.f32 0.03125, %v166_v38 }
 0x12c   :  { %v223_v41 = vadd.f32 1e-05, %v207_v39  ;;  %v224_v42 = vadd.f32 1e-05, %v208_v40 }
 0x12d   :  { %v169_v43 = vpop.xlane.xlu1 %168 }
 0x12e   :  { %2952 = vrsqrt.f32 %v223_v41  ;;  %v209_v44 = vmul.f32 0.03125, %v169_v43  ;;  %v3437_v41 = vld [vmem:[%s4412_s3 + $0x8] sm:$0xff] }
 0x12f   :  { %2954 = vrsqrt.f32 %v224_v42  ;;  %vm614_vm3 = vcmp.gt.s32.totalorder %v3437_v41, 0  ;;  %vm734_vm6 = vcmp.gt.s32.totalorder %v3437_v41, 1  ;;  %vm855_vm11 = vcmp.gt.s32.totalorder %v3437_v41, 2 }
 0x130   :  { %v225_v45 = vadd.f32 1e-05, %v209_v44  ;;  %v616_v44 = vsel %vm614_vm3, 1, %v3247_v33  ;;  %vm976_vm15 = vcmp.gt.s32.totalorder %v3437_v41, 3 }
 0x132   :  { %2956 = vrsqrt.f32 %v225_v45 }
 0x134   :  { %v2951_v46 = vpop.eup %2950 }
 0x135   :  { %v254_v47 = vmul.f32 %v2951_v46, %v3331_v12 }
 0x137   :  { %v277_v51 = vmul.f32 %v3388_v48, %v254_v47 }
 0x138   :  { %v2953_v49 = vpop.eup %2952 }
 0x139   :  { %v2955_v50 = vpop.eup %2954  ;;  %v255_v52 = vmul.f32 %v2953_v49, %v3339_v20  ;;  %v300_v57 = vadd.f32 %v3395_v53, %v277_v51 }
 0x13a   :  { %v256_v54 = vmul.f32 %v2955_v50, %v3333_v13 }
 0x13b   :  { %v278_v55 = vmul.f32 %v3388_v48, %v255_v52 }
 0x13c   :  { %v2957_v56 = vpop.eup %2956  ;;  %v279_v59 = vmul.f32 %v3388_v48, %v256_v54 }
 0x13d   :  { %v301_v58 = vadd.f32 %v3395_v53, %v278_v55  ;;  %v257_v60 = vmul.f32 %v2957_v56, %v3341_v21 }
 0x13e   :  { %v302_v63 = vadd.f32 %v3395_v53, %v279_v59 }
 0x13f   :  { %v316_v61 = vpack.c.bf16 %v301_v58, %v300_v57  ;;  %v280_v62 = vmul.f32 %v3388_v48, %v257_v60 }
 0x141   :  { %324 = vst.msk [vmem:[#allocation3] sm:$0xff] %vm60_vm0, %v316_v61  ;;  %v303_v0 = vadd.f32 %v3395_v53, %v280_v62 }
 0x143   :  { %v317_v1 = vpack.c.bf16 %v303_v0, %v302_v63 }
 0x145   :  { %325 = vst.msk [vmem:[#allocation3 + $0x8] sm:$0xff] %vm60_vm0, %v317_v1 }
 0x148   :  { %v332_v2 = vld [vmem:[#allocation3] sm:$0xff] }
 0x149   :  { %2752 = vmatprep.mubr.msk.bf16.mxu0 %vm60_vm0, %v332_v2 }
 0x14c   :  { %v333_v3 = vld [vmem:[#allocation3 + $0x8] sm:$0xff] }
 0x14d   :  { %2753 = vmatmul.mubr.msk.bf16.vlgmr.msra.gmra.mrb[0].mxu0 %vm60_vm0, %v333_v3 }
 0x14e   :  { %2801 = vmatpush3.bf16.msra.mxu0 %v3361_v31 }
 0x14f   :  { %2802 = vmatprep.subr.bf16.mxu0 %v3245_v30 }
 0x152   :  { %2803 = vmatpush3.bf16.msra.mxu0 %v3369_v32 }
 0x153   :  { %2816 = vmatprep.subr.bf16.mxu0 %v3245_v30 }
 0x220   :  { %v2754_v8 = vpop.f32.mrb[0].mxu0 }
 0x221   :  { %v421_v10 = vpop.f32.mrb[1].mxu0  ;;  %v430_v12 = vadd.f32 %v2754_v8, %v3417_v9 }
 0x222   :  { %v2755_v11 = vpop.f32.mrb[2].mxu0  ;;  %v422_v15 = vadd.f32 %v3417_v9, %v421_v10 }
 0x223   :  { %v433_v13 = vadd.f32 %v2755_v11, %v3417_v9  ;;  %v424_v14 = vpop.f32.mrb[3].mxu0 }
 0x224   :  { %v425_v16 = vadd.f32 %v3417_v9, %v424_v14 }
 0x225   :  { %v3423_v17 = vpack.c.bf16 %v433_v13, %v430_v12  ;;  %v48_v12 = vld [vmem:[%s4406_s0 + $0x20] sm:$0xff] }
 0x226   :  { %v484_v18 = vpack.c.bf16 %v425_v16, %v422_v15  ;;  %v73_v13 = vsel %vm60_vm0, %v48_v12, 0.0 }
 0x227   :  { %v637_v1 = vunpack.c.l.bf16 %v3423_v17  ;;  %v638_v5 = vunpack.c.h.bf16 %v3423_v17 }
 0x228   :  { %v505_v19 = vunpack.c.l.bf16 %v484_v18  ;;  %v506_v20 = vunpack.c.h.bf16 %v484_v18 }
 0x22a   :  { %v563_v21 = vadd.f32 %v556_v4, %v505_v19  ;;  %v564_v22 = vadd.f32 %v559_v6, %v506_v20 }
 0x22c   :  { %2958 = vtanh.f32 %v563_v21  ;;  %v2612_v27 = vmul.f32 -1.442695, %v563_v21  ;;  %v2613_v28 = vmul.f32 -1.442695, %v564_v22 }
 0x22d   :  { %2960 = vtanh.f32 %v564_v22 }
 0x22e   :  { %2962 = vpow2.f32 %v2612_v27  ;;  %v50_v27 = vld [vmem:[%s4406_s0 + $0x30] sm:$0xff] }
 0x22f   :  { %2964 = vpow2.f32 %v2613_v28  ;;  %v79_v28 = vsel %vm60_vm0, %v50_v27, 0.0 }
 0x236   :  { %v2959_v24 = vpop.eup %2958 }
 0x237   :  { %v2961_v25 = vpop.eup %2960  ;;  %583 = vrot.lane.b32.xlu0 %v2959_v24, %s3248_s26 }
 0x238   :  { %585 = vrot.lane.b32.xlu1 %v2961_v25, %s3248_s26  ;;  %v2963_v29 = vpop.eup %2962 }
 0x239   :  { %v571_v34 = vadd.f32 1.0, %v2963_v29  ;;  %v2965_v35 = vpop.eup %2964  ;;  %v51_v29 = vld [vmem:[%s4406_s0 + $0x38] sm:$0xff] }
 0x23a   :  { %v572_v36 = vadd.f32 1.0, %v2965_v35  ;;  %v49_v35 = vld [vmem:[%s4406_s0 + $0x28] sm:$0xff] }
 0x23b   :  { %618 = vperm.xlu0 %2940, %v615_v26   ;;  %2966 = vrcp.f32 %v571_v34  ;;  %v82_v34 = vsel %vm60_vm0, %v51_v29, 0.0 }
 0x23c   :  { %2968 = vrcp.f32 %v572_v36  ;;  %v76_v36 = vsel %vm60_vm0, %v49_v35, 0.0 }
 0x245   :  { %v2967_v37 = vpop.eup %2966 }
 0x246   :  { %v2969_v42 = vpop.eup %2968  ;;  %v579_v45 = vmul.f32 0.0, %v2967_v37 }
 0x247   :  { %v580_v49 = vmul.f32 0.0, %v2969_v42 }
 0x2a9   :  { %v584_v38 = vpop.permute.xlu0 %583 }
 0x2aa   :  { %v589_v39 = vmul.f32 %v2967_v37, %v584_v38  ;;  %v586_v40 = vpop.permute.xlu1 %585  ;;  %v735_v38 = vsel %vm733_vm7, 1, %v3247_v33 }
 0x2ab   :  { %v590_v43 = vmul.f32 %v2969_v42, %v586_v40 }
 0x2ac   :  { %593 = vrot.lane.b32.xlu1 %v589_v39, %s3248_s26 }
 0x2b0   :  { %595 = vrot.lane.b32.xlu1 %v590_v43, %s3248_s26 }
 0x2b4   :  { %621 = vperm.xlu1 %2941, %v616_v44  }
 0x2ba   :  { %v3453_v56 = vpop.permute.xlu0 %618 }
 0x2bb   :  { %vm623_vm4 = vcmp.eq.s32.totalorder %v3453_v56, 1 }
 0x31e   :  { %v594_v46 = vpop.permute.xlu1 %593 }
 0x31f   :  { %v3443_v47 = vadd.f32 %v594_v46, %v579_v45 }
 0x321   :  { %2970 = vtanh.f32 %v3443_v47  ;;  %v3516_v45 = vsel %vm623_vm4, %v3443_v47, 0.0 }
 0x322   :  { %v596_v50 = vpop.permute.xlu1 %595 }
 0x323   :  { %v3446_v51 = vadd.f32 %v596_v50, %v580_v49 }
 0x325   :  { %2972 = vtanh.f32 %v3446_v51 }
 0x32b   :  { %v2971_v52 = vpop.eup %2970 }
 0x32c   :  { %605 = vrot.lane.b32.xlu1 %v2971_v52, %s3248_s26 }
 0x32f   :  { %v2973_v54 = vpop.eup %2972 }
 0x330   :  { %607 = vrot.lane.b32.xlu0 %v2973_v54, %s3248_s26 }
 0x333   :  { %v3451_v55 = vpop.permute.xlu1 %621 }
 0x334   :  { %vm624_vm5 = vcmp.eq.s32.totalorder %v3451_v55, 1 }
 0x335   :  { %v3525_v52 = vsel %vm624_vm5, %v3446_v51, 0.0 }
 0x39e   :  { %v606_v57 = vpop.permute.xlu1 %605 }
 0x39f   :  { %v611_v58 = vmul.f32 %v2967_v37, %v606_v57  ;;  %v736_v37 = vsel %vm734_vm6, 1, %v3247_v33 }
 0x3a1   :  { %v3459_v61 = vsel %vm623_vm4, %v611_v58, 0.0 }
 0x3a2   :  { %v608_v59 = vpop.permute.xlu0 %607 }
 0x3a3   :  { %v612_v60 = vmul.f32 %v2969_v42, %v608_v59 }
 0x3a5   :  { %v3463_v62 = vsel %vm624_vm5, %v612_v60, 0.0 }
 0x3a6   :  { %v629_v63 = vpack.c.bf16 %v3463_v62, %v3459_v61 }
 0x3a8   :  { %631 = vrot.lane.b32.xlu1 %v629_v63, %s3249_s29 }
 0x41a   :  { %v632_v0 = vpop.permute.xlu1 %631 }
 0x41b   :  { %634 = vst.msk [vmem:[#allocation3] sm:$0xff] %vm60_vm0, %v632_v0  ;;  %2781 = vmatmul.mubr.msk.bf16.vlgmr.msra.gmra.mrb[4].mxu1 %vm60_vm0, %v632_v0 }
 0x41c   :  { %2785 = vmatpush3.bf16.msra.mxu1 %v3361_v31  ;;  %2788 = vmatprep.mubr.msk.bf16.mxu1 %vm3246_vm1, %v3245_v30 }
 0x41d   :  { %2786 = vmatprep.subr.bf16.mxu1 %v3245_v30 }
 0x420   :  { %2787 = vmatpush3.bf16.msra.mxu1 %v3369_v32 }
 0x421   :  { %2792 = vmatprep.subr.bf16.mxu1 %v3245_v30 }
 0x4ee   :  { %v676_v2 = vpop.f32.mrb[4].mxu1 }
 0x4ef   :  { %v683_v3 = vadd.f32 %v676_v2, %v637_v1  ;;  %v2782_v4 = vpop.f32.mrb[5].mxu1 }
 0x4f0   :  { %v679_v6 = vpop.f32.mrb[6].mxu1 }
 0x4f1   :  { %2974 = vtanh.f32 %v683_v3  ;;  %v684_v7 = vadd.f32 %v679_v6, %v638_v5  ;;  %v2783_v8 = vpop.f32.mrb[7].mxu1  ;;  %v2615_v14 = vmul.f32 -1.442695, %v683_v3 }
 0x4f3   :  { %2976 = vtanh.f32 %v684_v7  ;;  %v2616_v15 = vmul.f32 -1.442695, %v684_v7 }
 0x4f4   :  { %2978 = vpow2.f32 %v2615_v14 }
 0x4f5   :  { %2980 = vpow2.f32 %v2616_v15 }
 0x4fb   :  { %v2975_v10 = vpop.eup %2974 }
 0x4fc   :  { %703 = vrot.lane.b32.xlu0 %v2975_v10, %s3248_s26 }
 0x4fd   :  { %v2977_v11 = vpop.eup %2976 }
 0x4fe   :  { %705 = vrot.lane.b32.xlu1 %v2977_v11, %s3248_s26  ;;  %v2979_v16 = vpop.eup %2978 }
 0x4ff   :  { %v2981_v17 = vpop.eup %2980  ;;  %v691_v18 = vadd.f32 1.0, %v2979_v16 }
 0x500   :  { %v692_v19 = vadd.f32 1.0, %v2981_v17 }
 0x501   :  { %2982 = vrcp.f32 %v691_v18 }
 0x502   :  { %2984 = vrcp.f32 %v692_v19 }
 0x50b   :  { %v3484_v20 = vpop.eup %2982 }
 0x50c   :  { %v3487_v24 = vpop.eup %2984  ;;  %v699_v46 = vmul.f32 %v3484_v20, %v3516_v45 }
 0x50d   :  { %v700_v54 = vmul.f32 %v3487_v24, %v3525_v52 }
 0x51b   :  { %74 = vadd.xlane.f32.xlu0 %v73_v13 }
 0x56e   :  { %v704_v21 = vpop.permute.xlu0 %703 }
 0x56f   :  { %v709_v22 = vmul.f32 %v3484_v20, %v704_v21 }
 0x570   :  { %v706_v25 = vpop.permute.xlu1 %705 }
 0x571   :  { %713 = vrot.lane.b32.xlu0 %v709_v22, %s3248_s26  ;;  %v710_v26 = vmul.f32 %v3487_v24, %v706_v25 }
 0x573   :  { %715 = vrot.lane.b32.xlu1 %v710_v26, %s3248_s26 }
 0x590   :  { %80 = vadd.xlane.f32.xlu0 %v79_v28 }
 0x594   :  { %83 = vadd.xlane.f32.xlu0 %v82_v34 }
 0x597   :  { %77 = vadd.xlane.f32.xlu1 %v76_v36 }
 0x5a8   :  { %741 = vperm.xlu1 %2941, %v736_v37   ;;  %v75_v39 = vpop.xlane.xlu0 %74 }
 0x5a9   :  { %v114_v40 = vmul.f32 0.03125, %v75_v39 }
 0x5aa   :  { %738 = vperm.xlu0 %2940, %v735_v38  }
 0x5ab   :  { %v3508_v42 = vsub.f32 %v48_v12, %v114_v40 }
 0x5ad   :  { %v146_v43 = vmul.f32 %v3508_v42, %v3508_v42 }
 0x5af   :  { %v170_v44 = vsel %vm60_vm0, %v146_v43, 0.0 }
 0x5c9   :  { %171 = vadd.xlane.f32.xlu0 %v170_v44 }
 0x5e3   :  { %v714_v49 = vpop.permute.xlu0 %713 }
 0x5e4   :  { %v3520_v50 = vadd.f32 %v714_v49, %v699_v46 }
 0x5e5   :  { %v716_v57 = vpop.permute.xlu1 %715 }
 0x5e6   :  { %2986 = vtanh.f32 %v3520_v50  ;;  %v3530_v58 = vadd.f32 %v716_v57, %v700_v54 }
 0x5e8   :  { %2988 = vtanh.f32 %v3530_v58 }
 0x5f0   :  { %v2987_v47 = vpop.eup %2986 }
 0x5f1   :  { %725 = vrot.lane.b32.xlu1 %v2987_v47, %s3248_s26 }
 0x5f2   :  { %v2989_v59 = vpop.eup %2988 }
 0x5f5   :  { %727 = vrot.lane.b32.xlu1 %v2989_v59, %s3248_s26 }
 0x61d   :  { %v81_v60 = vpop.xlane.xlu0 %80 }
 0x61e   :  { %v116_v63 = vmul.f32 0.03125, %v81_v60 }
 0x620   :  { %v132_v51 = vsub.f32 %v50_v27, %v116_v63 }
 0x621   :  { %v84_v0 = vpop.xlane.xlu0 %83 }
 0x622   :  { %v117_v1 = vmul.f32 0.03125, %v84_v0  ;;  %v148_v2 = vmul.f32 %v132_v51, %v132_v51 }
 0x624   :  { %v133_v3 = vsub.f32 %v51_v29, %v117_v1  ;;  %v176_v4 = vsel %vm60_vm0, %v148_v2, 0.0  ;;  %v78_v5 = vpop.xlane.xlu1 %77 }
 0x625   :  { %177 = vadd.xlane.f32.xlu0 %v176_v4  ;;  %v115_v6 = vmul.f32 0.03125, %v78_v5 }
 0x626   :  { %v149_v7 = vmul.f32 %v133_v3, %v133_v3 }
 0x627   :  { %v131_v8 = vsub.f32 %v49_v35, %v115_v6 }
 0x628   :  { %v179_v10 = vsel %vm60_vm0, %v149_v7, 0.0  ;;  %v3538_v13 = vpop.permute.xlu1 %741 }
 0x629   :  { %180 = vadd.xlane.f32.xlu0 %v179_v10  ;;  %v147_v11 = vmul.f32 %v131_v8, %v131_v8  ;;  %v3540_v15 = vpop.permute.xlu0 %738  ;;  %vm744_vm8 = vcmp.eq.s32.totalorder %v3538_v13, 1 }
 0x62a   :  { %vm743_vm9 = vcmp.eq.s32.totalorder %v3540_v15, 1 }
 0x62b   :  { %v173_v12 = vsel %vm60_vm0, %v147_v11, 0.0 }
 0x62c   :  { %174 = vadd.xlane.f32.xlu1 %v173_v12 }
 0x656   :  { %v172_v22 = vpop.xlane.xlu0 %171 }
 0x663   :  { %v726_v14 = vpop.permute.xlu1 %725 }
 0x664   :  { %v731_v16 = vmul.f32 %v3484_v20, %v726_v14 }
 0x666   :  { %v3549_v19 = vsel %vm743_vm9, %v731_v16, %v3459_v61 }
 0x667   :  { %v728_v17 = vpop.permute.xlu1 %727 }
 0x668   :  { %v732_v18 = vmul.f32 %v3487_v24, %v728_v17  ;;  %v210_v24 = vmul.f32 0.03125, %v172_v22 }
 0x66a   :  { %v3554_v21 = vsel %vm744_vm8, %v732_v18, %v3463_v62  ;;  %v226_v27 = vadd.f32 1e-05, %v210_v24 }
 0x66b   :  { %v749_v20 = vpack.c.bf16 %v3554_v21, %v3549_v19 }
 0x66d   :  { %751 = vrot.lane.b32.xlu0 %v749_v20, %s3249_s29 }
 0x6b2   :  { %v178_v25 = vpop.xlane.xlu0 %177 }
 0x6b3   :  { %v212_v26 = vmul.f32 0.03125, %v178_v25 }
 0x6b5   :  { %v228_v28 = vadd.f32 1e-05, %v212_v26 }
 0x6b6   :  { %v181_v29 = vpop.xlane.xlu0 %180 }
 0x6b7   :  { %2990 = vrsqrt.f32 %v228_v28  ;;  %v213_v61 = vmul.f32 0.03125, %v181_v29 }
 0x6b8   :  { %2992 = vrsqrt.f32 %v226_v27 }
 0x6b9   :  { %v229_v34 = vadd.f32 1e-05, %v213_v61  ;;  %v175_v35 = vpop.xlane.xlu1 %174 }
 0x6ba   :  { %v211_v62 = vmul.f32 0.03125, %v175_v35 }
 0x6bb   :  { %2994 = vrsqrt.f32 %v229_v34 }
 0x6bc   :  { %v227_v36 = vadd.f32 1e-05, %v211_v62 }
 0x6be   :  { %2996 = vrsqrt.f32 %v227_v36 }
 0x6c1   :  { %v2991_v37 = vpop.eup %2990 }
 0x6c2   :  { %v260_v38 = vmul.f32 %v2991_v37, %v132_v51  ;;  %v2993_v39 = vpop.eup %2992 }
 0x6c3   :  { %v258_v43 = vmul.f32 %v2993_v39, %v3508_v42 }
 0x6c4   :  { %v283_v44 = vmul.f32 %v3388_v48, %v260_v38 }
 0x6c5   :  { %v2995_v40 = vpop.eup %2994  ;;  %v281_v57 = vmul.f32 %v3388_v48, %v258_v43 }
 0x6c6   :  { %v261_v46 = vmul.f32 %v2995_v40, %v133_v3  ;;  %v306_v47 = vadd.f32 %v3395_v53, %v283_v44 }
 0x6c7   :  { %v304_v0 = vadd.f32 %v3395_v53, %v281_v57  ;;  %v3598_v57 = vsel %vm743_vm9, %v3520_v50, %v3516_v45 }
 0x6c8   :  { %v284_v49 = vmul.f32 %v3388_v48, %v261_v46  ;;  %v2997_v54 = vpop.eup %2996  ;;  %v856_v46 = vsel %vm854_vm10, 1, %v3247_v33 }
 0x6c9   :  { %v259_v60 = vmul.f32 %v2997_v54, %v131_v8  ;;  %v857_v54 = vsel %vm855_vm11, 1, %v3247_v33 }
 0x6ca   :  { %v307_v59 = vadd.f32 %v3395_v53, %v284_v49 }
 0x6cb   :  { %v282_v51 = vmul.f32 %v3388_v48, %v259_v60 }
 0x6cc   :  { %v319_v63 = vpack.c.bf16 %v307_v59, %v306_v47 }
 0x6cd   :  { %v305_v42 = vadd.f32 %v3395_v53, %v282_v51 }
 0x6ce   :  { %327 = vst.msk [vmem:[#allocation3 + $0x18] sm:$0xff] %vm60_vm0, %v319_v63  ;;  %v3607_v63 = vsel %vm744_vm8, %v3530_v58, %v3525_v52  ;;  %v3621_v52 = vld [vmem:[%s4406_s0 + $0x40] sm:$0xff] }
 0x6cf   :  { %v318_v1 = vpack.c.bf16 %v305_v42, %v304_v0  ;;  %v85_v58 = vsel %vm60_vm0, %v3621_v52, 0.0 }
 0x6d1   :  { %326 = vst.msk [vmem:[#allocation3 + $0x10] sm:$0xff] %vm60_vm0, %v318_v1 }
 0x6d5   :  { %v335_v3 = vld [vmem:[#allocation3 + $0x18] sm:$0xff] }
 0x6d8   :  { %v334_v2 = vld [vmem:[#allocation3 + $0x10] sm:$0xff] }
 0x6d9   :  { %2756 = vmatprep.mubr.msk.bf16.mxu0 %vm60_vm0, %v334_v2 }
 0x6da   :  { %2757 = vmatmul.mubr.msk.bf16.gmra.mrb[4].mxu0 %vm60_vm0, %v335_v3 }
 0x6df   :  { %v752_v4 = vpop.permute.xlu0 %751 }
 0x6e0   :  { %755 = vst.msk [vmem:[#allocation3 + $0x8] sm:$0xff] %vm60_vm0, %v752_v4  ;;  %2789 = vmatmul.mubr.msk.bf16.vlgmr.msra.gmra.mrb[8].mxu1 %vm60_vm0, %v752_v4 }
 0x6e1   :  { %2793 = vmatpush3.bf16.msra.mxu1 %v3361_v31  ;;  %2796 = vmatprep.mubr.msk.bf16.mxu1 %vm3246_vm1, %v3245_v30 }
 0x6e2   :  { %2794 = vmatprep.subr.bf16.mxu1 %v3245_v30 }
 0x6e5   :  { %2795 = vmatpush3.bf16.msra.mxu1 %v3369_v32 }
 0x6e6   :  { %2808 = vmatprep.subr.bf16.mxu1 %v3245_v30 }
 0x7ad   :  { %v2758_v5 = vpop.f32.mrb[4].mxu0 }
 0x7ae   :  { %v437_v6 = vpop.f32.mrb[5].mxu0  ;;  %v446_v8 = vadd.f32 %v2758_v5, %v3417_v9 }
 0x7af   :  { %v2759_v7 = vpop.f32.mrb[6].mxu0  ;;  %v438_v12 = vadd.f32 %v3417_v9, %v437_v6 }
 0x7b0   :  { %v449_v10 = vadd.f32 %v2759_v7, %v3417_v9  ;;  %v440_v11 = vpop.f32.mrb[7].mxu0 }
 0x7b1   :  { %v441_v14 = vadd.f32 %v3417_v9, %v440_v11 }
 0x7b2   :  { %v3584_v16 = vpack.c.bf16 %v449_v10, %v446_v8 }
 0x7b3   :  { %v797_v17 = vpop.f32.mrb[8].mxu1  ;;  %v486_v18 = vpack.c.bf16 %v441_v14, %v438_v12 }
 0x7b4   :  { %v2790_v20 = vpop.f32.mrb[9].mxu1 }
 0x7b5   :  { %v800_v22 = vpop.f32.mrb[10].mxu1  ;;  %v758_v24 = vunpack.c.l.bf16 %v486_v18  ;;  %v759_v25 = vunpack.c.h.bf16 %v486_v18 }
 0x7b6   :  { %v2791_v26 = vpop.f32.mrb[11].mxu1 }
 0x7b7   :  { %v804_v27 = vadd.f32 %v797_v17, %v758_v24  ;;  %v805_v28 = vadd.f32 %v800_v22, %v759_v25  ;;  %v880_v17 = vunpack.c.h.bf16 %v3584_v16 }
 0x7b9   :  { %2998 = vtanh.f32 %v804_v27  ;;  %v2618_v9 = vmul.f32 -1.442695, %v804_v27  ;;  %v2619_v34 = vmul.f32 -1.442695, %v805_v28  ;;  %v53_v27 = vld [vmem:[%s4406_s0 + $0x48] sm:$0xff] }
 0x7ba   :  { %3000 = vtanh.f32 %v805_v28  ;;  %v57_v28 = vld [vmem:[%s4406_s0 + $0x68] sm:$0xff] }
 0x7bb   :  { %3002 = vpow2.f32 %v2618_v9  ;;  %v56_v9 = vld [vmem:[%s4406_s0 + $0x60] sm:$0xff] }
 0x7bc   :  { %3004 = vpow2.f32 %v2619_v34  ;;  %v97_v34 = vsel %vm60_vm0, %v56_v9, 0.0 }
 0x7c3   :  { %v2999_v29 = vpop.eup %2998 }
 0x7c4   :  { %824 = vrot.lane.b32.xlu1 %v2999_v29, %s3248_s26  ;;  %v3001_v61 = vpop.eup %3000  ;;  %v88_v29 = vsel %vm60_vm0, %v53_v27, 0.0 }
 0x7c5   :  { %v3003_v35 = vpop.eup %3002 }
 0x7c6   :  { %v812_v62 = vadd.f32 1.0, %v3003_v35  ;;  %v3005_v36 = vpop.eup %3004  ;;  %v3680_v35 = vld [vmem:[%s4406_s0 + $0x78] sm:$0xff] }
 0x7c7   :  { %v813_v37 = vadd.f32 1.0, %v3005_v36 }
 0x7c8   :  { %826 = vrot.lane.b32.xlu1 %v3001_v61, %s3248_s26  ;;  %3006 = vrcp.f32 %v812_v62  ;;  %v100_v61 = vsel %vm60_vm0, %v57_v28, 0.0  ;;  %v106_v62 = vsel %vm60_vm0, %v3680_v35, 0.0 }
 0x7c9   :  { %3008 = vrcp.f32 %v813_v37 }
 0x7d2   :  { %v3007_v38 = vpop.eup %3006 }
 0x7d3   :  { %v3009_v43 = vpop.eup %3008  ;;  %v820_v47 = vmul.f32 %v3007_v38, %v3598_v57 }
 0x7d4   :  { %v821_v51 = vmul.f32 %v3009_v43, %v3607_v63 }
 0x836   :  { %v825_v39 = vpop.permute.xlu1 %824 }
 0x837   :  { %v830_v40 = vmul.f32 %v3007_v38, %v825_v39 }
 0x839   :  { %834 = vrot.lane.b32.xlu1 %v830_v40, %s3248_s26 }
 0x83a   :  { %v827_v44 = vpop.permute.xlu1 %826 }
 0x83b   :  { %v831_v49 = vmul.f32 %v3009_v43, %v827_v44 }
 0x83d   :  { %859 = vperm.xlu1 %2941, %v856_v46   ;;  %836 = vrot.lane.b32.xlu0 %v831_v49, %s3248_s26 }
 0x841   :  { %862 = vperm.xlu0 %2940, %v857_v54  }
 0x8ab   :  { %v835_v59 = vpop.permute.xlu1 %834 }
 0x8ac   :  { %v3601_v60 = vadd.f32 %v835_v59, %v820_v47 }
 0x8ae   :  { %3010 = vtanh.f32 %v3601_v60 }
 0x8af   :  { %v837_v0 = vpop.permute.xlu0 %836 }
 0x8b0   :  { %v3611_v42 = vadd.f32 %v837_v0, %v821_v51  ;;  %v3695_v0 = vld [vmem:[%s4406_s0 + $0x70] sm:$0xff] }
 0x8b2   :  { %3012 = vtanh.f32 %v3611_v42 }
 0x8b8   :  { %v3011_v45 = vpop.eup %3010 }
 0x8b9   :  { %846 = vrot.lane.b32.xlu1 %v3011_v45, %s3248_s26  ;;  %v103_v45 = vsel %vm60_vm0, %v3695_v0, 0.0 }
 0x8bc   :  { %v3013_v50 = vpop.eup %3012  ;;  %v3616_v1 = vpop.permute.xlu1 %859 }
 0x8bd   :  { %848 = vrot.lane.b32.xlu0 %v3013_v50, %s3248_s26  ;;  %vm864_vm12 = vcmp.eq.s32.totalorder %v3616_v1, 1  ;;  %v977_v50 = vsel %vm975_vm14, 1, %v3247_v33 }
 0x8be   :  { %v3739_v41 = vsel %vm864_vm12, %v3601_v60, %v3598_v57 }
 0x8c0   :  { %v3625_v2 = vpop.permute.xlu0 %862 }
 0x8c1   :  { %vm865_vm13 = vcmp.eq.s32.totalorder %v3625_v2, 1 }
 0x8dc   :  { %86 = vadd.xlane.f32.xlu0 %v85_v58 }
 0x92b   :  { %v847_v3 = vpop.permute.xlu1 %846 }
 0x92c   :  { %v852_v4 = vmul.f32 %v3007_v38, %v847_v3 }
 0x92e   :  { %v3632_v7 = vsel %vm864_vm12, %v852_v4, %v3549_v19  ;;  %v879_v19 = vunpack.c.l.bf16 %v3584_v16  ;;  %v3661_v16 = vld [vmem:[%s4406_s0 + $0x58] sm:$0xff] }
 0x92f   :  { %v849_v5 = vpop.permute.xlu0 %848  ;;  %v94_v26 = vsel %vm60_vm0, %v3661_v16, 0.0 }
 0x930   :  { %v853_v6 = vmul.f32 %v3009_v43, %v849_v5 }
 0x932   :  { %v3637_v8 = vsel %vm865_vm13, %v853_v6, %v3554_v21 }
 0x933   :  { %v870_v10 = vpack.c.bf16 %v3637_v8, %v3632_v7 }
 0x935   :  { %872 = vrot.lane.b32.xlu1 %v870_v10, %s3249_s29 }
 0x969   :  { %v87_v44 = vpop.xlane.xlu0 %86 }
 0x9a7   :  { %v873_v11 = vpop.permute.xlu1 %872 }
 0x9a8   :  { %876 = vst.msk [vmem:[#allocation3 + $0x10] sm:$0xff] %vm60_vm0, %v873_v11  ;;  %2797 = vmatmul.mubr.msk.bf16.vlgmr.msra.gmra.mrb[12].mxu1 %vm60_vm0, %v873_v11 }
 0x9a9   :  { %2809 = vmatpush3.bf16.msra.mxu1 %v3361_v31  ;;  %2812 = vmatprep.mubr.msk.bf16.mxu1 %vm3246_vm1, %v3245_v30 }
 0x9aa   :  { %2810 = vmatprep.subr.bf16.mxu1 %v3245_v30 }
 0x9ad   :  { %2811 = vmatpush3.bf16.msra.mxu1 %v3369_v32  ;;  %v54_v32 = vld [vmem:[%s4406_s0 + $0x50] sm:$0xff] }
 0x9ae   :  { %2824 = vmatprep.subr.bf16.mxu1 %v3245_v30  ;;  %v91_v25 = vsel %vm60_vm0, %v54_v32, 0.0 }
 0xa7b   :  { %v918_v21 = vpop.f32.mrb[12].mxu1 }
 0xa7c   :  { %v925_v12 = vadd.f32 %v918_v21, %v879_v19  ;;  %v2798_v14 = vpop.f32.mrb[13].mxu1 }
 0xa7d   :  { %v921_v18 = vpop.f32.mrb[14].mxu1  ;;  %v118_v14 = vmul.f32 0.03125, %v87_v44 }
 0xa7e   :  { %3014 = vtanh.f32 %v925_v12  ;;  %v926_v20 = vadd.f32 %v921_v18, %v880_v17  ;;  %v2799_v31 = vpop.f32.mrb[15].mxu1  ;;  %v2621_v36 = vmul.f32 -1.442695, %v925_v12 }
 0xa7f   :  { %v3712_v18 = vsub.f32 %v3621_v52, %v118_v14 }
 0xa80   :  { %3016 = vtanh.f32 %v926_v20  ;;  %v2622_v37 = vmul.f32 -1.442695, %v926_v20 }
 0xa81   :  { %3018 = vpow2.f32 %v2621_v36 }
 0xa82   :  { %3020 = vpow2.f32 %v2622_v37 }
 0xa88   :  { %v3015_v22 = vpop.eup %3014 }
 0xa89   :  { %945 = vrot.lane.b32.xlu0 %v3015_v22, %s3248_s26 }
 0xa8a   :  { %v3017_v24 = vpop.eup %3016 }
 0xa8b   :  { %947 = vrot.lane.b32.xlu1 %v3017_v24, %s3248_s26  ;;  %v3019_v38 = vpop.eup %3018 }
 0xa8c   :  { %v3021_v39 = vpop.eup %3020  ;;  %v933_v40 = vadd.f32 1.0, %v3019_v38 }
 0xa8d   :  { %v934_v43 = vadd.f32 1.0, %v3021_v39 }
 0xa8e   :  { %3022 = vrcp.f32 %v933_v40  ;;  %v3749_v40 = vsel %vm865_vm13, %v3611_v42, %v3607_v63 }
 0xa8f   :  { %3024 = vrcp.f32 %v934_v43 }
 0xa98   :  { %v3684_v46 = vpop.eup %3022 }
 0xa99   :  { %v3687_v47 = vpop.eup %3024  ;;  %v941_v37 = vmul.f32 %v3684_v46, %v3739_v41 }
 0xa9a   :  { %v942_v43 = vmul.f32 %v3687_v47, %v3749_v40 }
 0xaa8   :  { %92 = vadd.xlane.f32.xlu0 %v91_v25  ;;  %v150_v25 = vmul.f32 %v3712_v18, %v3712_v18 }
 0xaac   :  { %95 = vadd.xlane.f32.xlu0 %v94_v26 }
 0xaaf   :  { %89 = vadd.xlane.f32.xlu1 %v88_v29 }
 0xab0   :  { %101 = vadd.xlane.f32.xlu0 %v100_v61 }
 0xab3   :  { %98 = vadd.xlane.f32.xlu1 %v97_v34  ;;  %v978_v34 = vsel %vm976_vm15, 1, %v3247_v33 }
 0xab7   :  { %107 = vadd.xlane.f32.xlu1 %v106_v62 }
 0xafb   :  { %v946_v49 = vpop.permute.xlu0 %945 }
 0xafc   :  { %v951_v54 = vmul.f32 %v3684_v46, %v946_v49 }
 0xafd   :  { %v948_v59 = vpop.permute.xlu1 %947 }
 0xafe   :  { %955 = vrot.lane.b32.xlu0 %v951_v54, %s3248_s26  ;;  %v952_v51 = vmul.f32 %v3687_v47, %v948_v59 }
 0xb00   :  { %957 = vrot.lane.b32.xlu1 %v952_v51, %s3248_s26 }
 0xb1d   :  { %104 = vadd.xlane.f32.xlu0 %v103_v45 }
 0xb33   :  { %980 = vperm.xlu0 %2940, %v977_v50  }
 0xb35   :  { %v93_v58 = vpop.xlane.xlu0 %92 }
 0xb36   :  { %v120_v20 = vmul.f32 0.03125, %v93_v58 }
 0xb38   :  { %v3714_v22 = vsub.f32 %v54_v32, %v120_v20 }
 0xb39   :  { %v96_v3 = vpop.xlane.xlu0 %95 }
 0xb3a   :  { %v121_v24 = vmul.f32 0.03125, %v96_v3  ;;  %v152_v29 = vmul.f32 %v3714_v22, %v3714_v22 }
 0xb3c   :  { %v90_v4 = vpop.xlane.xlu1 %89  ;;  %v188_v32 = vsel %vm60_vm0, %v152_v29, 0.0 }
 0xb3d   :  { %v102_v5 = vpop.xlane.xlu0 %101  ;;  %v119_v6 = vmul.f32 0.03125, %v90_v4 }
 0xb3e   :  { %v123_v10 = vmul.f32 0.03125, %v102_v5 }
 0xb3f   :  { %v3701_v11 = vsub.f32 %v53_v27, %v119_v6  ;;  %v3719_v27 = vsub.f32 %v3661_v16, %v121_v24 }
 0xb40   :  { %v3703_v19 = vsub.f32 %v57_v28, %v123_v10  ;;  %v99_v31 = vpop.xlane.xlu1 %98  ;;  %v182_v28 = vsel %vm60_vm0, %v150_v25, 0.0 }
 0xb41   :  { %v151_v21 = vmul.f32 %v3701_v11, %v3701_v11  ;;  %v122_v26 = vmul.f32 0.03125, %v99_v31  ;;  %v153_v61 = vmul.f32 %v3719_v27, %v3719_v27 }
 0xb42   :  { %v155_v12 = vmul.f32 %v3703_v19, %v3703_v19 }
 0xb43   :  { %v185_v23 = vsel %vm60_vm0, %v151_v21, 0.0  ;;  %v3724_v52 = vsub.f32 %v56_v9, %v122_v26  ;;  %v191_v62 = vsel %vm60_vm0, %v153_v61, 0.0 }
 0xb44   :  { %186 = vadd.xlane.f32.xlu1 %v185_v23  ;;  %v197_v17 = vsel %vm60_vm0, %v155_v12, 0.0  ;;  %v108_v36 = vpop.xlane.xlu1 %107 }
 0xb45   :  { %v154_v16 = vmul.f32 %v3724_v52, %v3724_v52  ;;  %v125_v54 = vmul.f32 0.03125, %v108_v36 }
 0xb47   :  { %v194_v9 = vsel %vm60_vm0, %v154_v16, 0.0  ;;  %v3760_v63 = vsub.f32 %v3680_v35, %v125_v54 }
 0xb48   :  { %198 = vadd.xlane.f32.xlu1 %v197_v17 }
 0xb49   :  { %v157_v42 = vmul.f32 %v3760_v63, %v3760_v63 }
 0xb4b   :  { %v203_v59 = vsel %vm60_vm0, %v157_v42, 0.0 }
 0xb52   :  { %183 = vadd.xlane.f32.xlu0 %v182_v28 }
 0xb56   :  { %189 = vadd.xlane.f32.xlu0 %v188_v32 }
 0xb59   :  { %983 = vperm.xlu1 %2941, %v978_v34  }
 0xb5a   :  { %192 = vadd.xlane.f32.xlu0 %v191_v62 }
 0xb5e   :  { %195 = vadd.xlane.f32.xlu0 %v194_v9 }
 0xb70   :  { %v956_v38 = vpop.permute.xlu0 %955 }
 0xb71   :  { %v3743_v39 = vadd.f32 %v956_v38, %v941_v37 }
 0xb72   :  { %v958_v44 = vpop.permute.xlu1 %957 }
 0xb73   :  { %3026 = vtanh.f32 %v3743_v39  ;;  %v3754_v57 = vadd.f32 %v958_v44, %v942_v43 }
 0xb75   :  { %3028 = vtanh.f32 %v3754_v57 }
 0xb7d   :  { %v3027_v60 = vpop.eup %3026 }
 0xb7e   :  { %967 = vrot.lane.b32.xlu1 %v3027_v60, %s3248_s26 }
 0xb7f   :  { %v3029_v49 = vpop.eup %3028 }
 0xb82   :  { %969 = vrot.lane.b32.xlu1 %v3029_v49, %s3248_s26 }
 0xba6   :  { %204 = vadd.xlane.f32.xlu1 %v203_v59 }
 0xbaa   :  { %v105_v51 = vpop.xlane.xlu0 %104 }
 0xbab   :  { %v124_v45 = vmul.f32 0.03125, %v105_v51 }
 0xbad   :  { %v3766_v50 = vsub.f32 %v3695_v0, %v124_v45 }
 0xbaf   :  { %v156_v58 = vmul.f32 %v3766_v50, %v3766_v50 }
 0xbb1   :  { %v200_v3 = vsel %vm60_vm0, %v156_v58, 0.0 }
 0xbb2   :  { %201 = vadd.xlane.f32.xlu0 %v200_v3  ;;  %v3771_v6 = vpop.permute.xlu0 %980 }
 0xbb3   :  { %vm985_vm2 = vcmp.eq.s32.totalorder %v3771_v6, 1 }
 0xbd1   :  { %v187_v4 = vpop.xlane.xlu1 %186 }
 0xbd2   :  { %v215_v35 = vmul.f32 0.03125, %v187_v4 }
 0xbd4   :  { %v231_v5 = vadd.f32 1e-05, %v215_v35 }
 0xbd5   :  { %v199_v10 = vpop.xlane.xlu1 %198 }
 0xbd6   :  { %3030 = vrsqrt.f32 %v231_v5  ;;  %v219_v23 = vmul.f32 0.03125, %v199_v10 }
 0xbd8   :  { %v235_v20 = vadd.f32 1e-05, %v219_v23 }
 0xbd9   :  { %v3774_v61 = vpop.permute.xlu1 %983 }
 0xbda   :  { %vm986_vm3 = vcmp.eq.s32.totalorder %v3774_v61, 1 }
 0xbdf   :  { %v184_v21 = vpop.xlane.xlu0 %183 }
 0xbe0   :  { %v214_v12 = vmul.f32 0.03125, %v184_v21  ;;  %v3031_v25 = vpop.eup %3030 }
 0xbe1   :  { %v263_v29 = vmul.f32 %v3031_v25, %v3701_v11 }
 0xbe2   :  { %v230_v14 = vadd.f32 1e-05, %v214_v12 }
 0xbe3   :  { %v190_v17 = vpop.xlane.xlu0 %189  ;;  %v286_v9 = vmul.f32 %v3388_v48, %v263_v29 }
 0xbe4   :  { %3032 = vrsqrt.f32 %v230_v14  ;;  %v216_v0 = vmul.f32 0.03125, %v190_v17 }
 0xbe5   :  { %v309_v60 = vadd.f32 %v3395_v53, %v286_v9 }
 0xbe6   :  { %v232_v31 = vadd.f32 1e-05, %v216_v0 }
 0xbe7   :  { %v193_v24 = vpop.xlane.xlu0 %192 }
 0xbe8   :  { %3034 = vrsqrt.f32 %v232_v31  ;;  %v217_v26 = vmul.f32 0.03125, %v193_v24 }
 0xbe9   :  { %3036 = vrsqrt.f32 %v235_v20 }
 0xbea   :  { %v233_v28 = vadd.f32 1e-05, %v217_v26 }
 0xbeb   :  { %v196_v32 = vpop.xlane.xlu0 %195 }
 0xbec   :  { %3038 = vrsqrt.f32 %v233_v28  ;;  %v218_v34 = vmul.f32 0.03125, %v196_v32 }
 0xbee   :  { %v3033_v16 = vpop.eup %3032  ;;  %v234_v62 = vadd.f32 1e-05, %v218_v34 }
 0xbef   :  { %v262_v36 = vmul.f32 %v3033_v16, %v3712_v18 }
 0xbf0   :  { %3040 = vrsqrt.f32 %v234_v62  ;;  %v968_v37 = vpop.permute.xlu1 %967 }
 0xbf1   :  { %v285_v38 = vmul.f32 %v3388_v48, %v262_v36  ;;  %v973_v54 = vmul.f32 %v3684_v46, %v968_v37  ;;  %v3238_v48 = vld [vmem:[%s4409_s1] ss:$0 sm:$0xff] }
 0xbf2   :  { %v3035_v43 = vpop.eup %3034 }
 0xbf3   :  { %v3037_v44 = vpop.eup %3036  ;;  %v308_v11 = vadd.f32 %v3395_v53, %v285_v38  ;;  %v264_v49 = vmul.f32 %v3035_v43, %v3714_v22 }
 0xbf4   :  { %v970_v42 = vpop.permute.xlu1 %969  ;;  %v267_v18 = vmul.f32 %v3037_v44, %v3703_v19 }
 0xbf5   :  { %v320_v59 = vpack.c.bf16 %v309_v60, %v308_v11  ;;  %v974_v51 = vmul.f32 %v3687_v47, %v970_v42  ;;  %v287_v53 = vmul.f32 %v3238_v48, %v264_v49  ;;  %v3795_v47 = vsel %vm985_vm2, %v973_v54, %v3632_v7  ;;  %v3242_v49 = vld [vmem:[%s4411_s6] ss:$0 sm:$0xff] }
 0xbf6   :  { %v3039_v45 = vpop.eup %3038  ;;  %v290_v4 = vmul.f32 %v3238_v48, %v267_v18 }
 0xbf7   :  { %328 = vst.msk [vmem:[#allocation3 + $0x20] sm:$0xff] %vm60_vm0, %v320_v59  ;;  %v265_v46 = vmul.f32 %v3039_v45, %v3719_v27  ;;  %v3800_v19 = vsel %vm986_vm3, %v974_v51, %v3637_v8  ;;  %v3239_v27 = vld [vmem:[%s4410_s2] ss:$0 sm:$0xff] }
 0xbf8   :  { %v991_v22 = vpack.c.bf16 %v3800_v19, %v3795_v47  ;;  %v310_v35 = vadd.f32 %v3239_v27, %v287_v53  ;;  %v313_v12 = vadd.f32 %v3239_v27, %v290_v4 }
 0xbf9   :  { %v288_v58 = vmul.f32 %v3238_v48, %v265_v46 }
 0xbfa   :  { %v3041_v3 = vpop.eup %3040  ;;  %993 = vrot.lane.b32.xlu0 %v991_v22, %s3249_s29 }
 0xbfb   :  { %v311_v7 = vadd.f32 %v3239_v27, %v288_v58  ;;  %v266_v5 = vmul.f32 %v3041_v3, %v3724_v52 }
 0xbfd   :  { %v321_v10 = vpack.c.bf16 %v311_v7, %v310_v35  ;;  %v289_v21 = vmul.f32 %v3238_v48, %v266_v5 }
 0xbfe   :  { %v336_v8 = vld [vmem:[#allocation3 + $0x20] sm:$0xff] }
 0xbff   :  { %329 = vst.msk [vmem:[#allocation3 + $0x28] sm:$0xff] %vm60_vm0, %v321_v10  ;;  %v312_v23 = vadd.f32 %v3239_v27, %v289_v21  ;;  %2760 = vmatprep.mubr.msk.bf16.mxu0 %vm60_vm0, %v336_v8 }
 0xc01   :  { %v322_v14 = vpack.c.bf16 %v313_v12, %v312_v23 }
 0xc03   :  { %330 = vst.msk [vmem:[#allocation3 + $0x30] sm:$0xff] %vm60_vm0, %v322_v14 }
 0xc06   :  { %v337_v17 = vld [vmem:[#allocation3 + $0x28] sm:$0xff] }
 0xc07   :  { %2761 = vmatmul.mubr.msk.bf16.gmra.mrb[8].mxu0 %vm60_vm0, %v337_v17 }
 0xc0a   :  { %v338_v0 = vld [vmem:[#allocation3 + $0x30] sm:$0xff] }
 0xc0b   :  { %2764 = vmatprep.mubr.msk.bf16.mxu0 %vm60_vm0, %v338_v0 }
 0xc33   :  { %v205_v20 = vpop.xlane.xlu1 %204 }
 0xc34   :  { %v221_v52 = vmul.f32 0.03125, %v205_v20 }
 0xc36   :  { %v237_v31 = vadd.f32 1e-05, %v221_v52 }
 0xc38   :  { %3042 = vrsqrt.f32 %v237_v31 }
 0xc3f   :  { %v202_v24 = vpop.xlane.xlu0 %201 }
 0xc40   :  { %v220_v25 = vmul.f32 0.03125, %v202_v24 }
 0xc42   :  { %v236_v26 = vadd.f32 1e-05, %v220_v25  ;;  %v3043_v28 = vpop.eup %3042 }
 0xc43   :  { %v269_v29 = vmul.f32 %v3043_v28, %v3760_v63  ;;  %v3825_v63 = vld [vmem:[%s4408_s5] sm:$0xff]  }
 0xc44   :  { %3044 = vrsqrt.f32 %v236_v26 }
 0xc45   :  { %v292_v34 = vmul.f32 %v3238_v48, %v269_v29 }
 0xc47   :  { %v315_v9 = vadd.f32 %v3239_v27, %v292_v34 }
 0xc4e   :  { %v3045_v32 = vpop.eup %3044 }
 0xc4f   :  { %v268_v16 = vmul.f32 %v3045_v32, %v3766_v50  ;;  %v3834_v50 = vld [vmem:[%s4408_s5 + $0x8] sm:$0xff]  }
 0xc51   :  { %v291_v62 = vmul.f32 %v3238_v48, %v268_v16 }
 0xc53   :  { %v314_v36 = vadd.f32 %v3239_v27, %v291_v62  ;;  %v3851_v62 = vld [vmem:[%s4412_s3] sm:$0xff] }
 0xc54   :  { %vm1096_vm6 = vcmp.gt.s32.totalorder %v3851_v62, 4  ;;  %vm1217_vm14 = vcmp.gt.s32.totalorder %v3851_v62, 5 }
 0xc55   :  { %v323_v37 = vpack.c.bf16 %v315_v9, %v314_v36 }
 0xc57   :  { %331 = vst.msk [vmem:[#allocation3 + $0x38] sm:$0xff] %vm60_vm0, %v323_v37  ;;  %v1098_v37 = vsel %vm1096_vm6, 1, %v3247_v33 }
 0xc5e   :  { %v339_v38 = vld [vmem:[#allocation3 + $0x38] sm:$0xff] }
 0xc5f   :  { %2765 = vmatmul.mubr.msk.bf16.gmra.mrb[12].mxu0 %vm60_vm0, %v339_v38 }
 0xc60   :  { %2804 = vmatprep.mubr.msk.bf16.mxu0 %vm3246_vm1, %v3245_v30 }
 0xc6c   :  { %v994_v43 = vpop.permute.xlu0 %993 }
 0xc6d   :  { %997 = vst.msk [vmem:[#allocation3 + $0x18] sm:$0xff] %vm60_vm0, %v994_v43  ;;  %2805 = vmatmul.mubr.msk.bf16.vlgmr.msra.gmra.mrb[16].mxu0 %vm60_vm0, %v994_v43  ;;  %v3859_v43 = vld [vmem:[%s4412_s3 + $0x8] sm:$0xff] }
 0xc6e   :  { %2817 = vmatpush3.bf16.msra.mxu0 %v3825_v63  ;;  %2820 = vmatprep.mubr.msk.bf16.mxu0 %vm3246_vm1, %v3245_v30  ;;  %vm1097_vm7 = vcmp.gt.s32.totalorder %v3859_v43, 4  ;;  %vm1218_vm15 = vcmp.gt.s32.totalorder %v3859_v43, 5 }
 0xc6f   :  { %2818 = vmatprep.subr.bf16.mxu0 %v3245_v30 }
 0xc72   :  { %2819 = vmatpush3.bf16.msra.mxu0 %v3834_v50 }
 0xcda   :  { %v2762_v44 = vpop.f32.mrb[8].mxu0 }
 0xcdb   :  { %v453_v60 = vpop.f32.mrb[9].mxu0  ;;  %v462_v54 = vadd.f32 %v3242_v49, %v2762_v44  ;;  %v1099_v44 = vsel %vm1097_vm7, 1, %v3247_v33 }
 0xcdc   :  { %v2763_v11 = vpop.f32.mrb[10].mxu0  ;;  %v454_v51 = vadd.f32 %v3242_v49, %v453_v60  ;;  %v3868_v60 = vsel %vm985_vm2, %v3743_v39, %v3739_v41 }
 0xcdd   :  { %v465_v42 = vadd.f32 %v3242_v49, %v2763_v11  ;;  %v456_v59 = vpop.f32.mrb[11].mxu0 }
 0xcde   :  { %v457_v45 = vadd.f32 %v3242_v49, %v456_v59 }
 0xcdf   :  { %v3840_v18 = vpack.c.bf16 %v465_v42, %v462_v54  ;;  %v3877_v42 = vsel %vm986_vm3, %v3754_v57, %v3749_v40 }
 0xce0   :  { %v488_v48 = vpack.c.bf16 %v457_v45, %v454_v51 }
 0xce2   :  { %v1000_v10 = vunpack.c.l.bf16 %v488_v48  ;;  %v1001_v23 = vunpack.c.h.bf16 %v488_v48 }
 0xd32   :  { %v2766_v53 = vpop.f32.mrb[12].mxu0 }
 0xd33   :  { %v469_v46 = vpop.f32.mrb[13].mxu0  ;;  %v478_v58 = vadd.f32 %v3242_v49, %v2766_v53 }
 0xd34   :  { %v2767_v22 = vpop.f32.mrb[14].mxu0  ;;  %v470_v27 = vadd.f32 %v3242_v49, %v469_v46 }
 0xd35   :  { %v481_v3 = vadd.f32 %v3242_v49, %v2767_v22  ;;  %v472_v4 = vpop.f32.mrb[15].mxu0 }
 0xd36   :  { %v473_v35 = vadd.f32 %v3242_v49, %v472_v4 }
 0xd37   :  { %v3842_v7 = vpack.c.bf16 %v481_v3, %v478_v58 }
 0xd38   :  { %v3844_v5 = vpack.c.bf16 %v473_v35, %v470_v27 }
 0xd40   :  { %v1039_v21 = vpop.f32.mrb[16].mxu0 }
 0xd41   :  { %v1046_v8 = vadd.f32 %v1039_v21, %v1000_v10  ;;  %v2806_v12 = vpop.f32.mrb[17].mxu0  ;;  %v1122_v21 = vunpack.c.h.bf16 %v3840_v18 }
 0xd42   :  { %v1042_v14 = vpop.f32.mrb[18].mxu0 }
 0xd43   :  { %3046 = vtanh.f32 %v1046_v8  ;;  %v1047_v17 = vadd.f32 %v1042_v14, %v1001_v23  ;;  %v2807_v0 = vpop.f32.mrb[19].mxu0  ;;  %v2624_v31 = vmul.f32 -1.442695, %v1046_v8 }
 0xd45   :  { %3048 = vtanh.f32 %v1047_v17  ;;  %v2625_v24 = vmul.f32 -1.442695, %v1047_v17 }
 0xd46   :  { %3050 = vpow2.f32 %v2624_v31 }
 0xd47   :  { %3052 = vpow2.f32 %v2625_v24 }
 0xd4d   :  { %v3047_v20 = vpop.eup %3046 }
 0xd4e   :  { %1066 = vrot.lane.b32.xlu1 %v3047_v20, %s3248_s26 }
 0xd4f   :  { %v3049_v52 = vpop.eup %3048 }
 0xd50   :  { %v3051_v25 = vpop.eup %3050 }
 0xd51   :  { %v1054_v26 = vadd.f32 1.0, %v3051_v25  ;;  %v3053_v28 = vpop.eup %3052 }
 0xd52   :  { %1068 = vrot.lane.b32.xlu1 %v3049_v52, %s3248_s26  ;;  %v1055_v29 = vadd.f32 1.0, %v3053_v28 }
 0xd53   :  { %3054 = vrcp.f32 %v1054_v26 }
 0xd54   :  { %3056 = vrcp.f32 %v1055_v29 }
 0xd5d   :  { %v3055_v32 = vpop.eup %3054 }
 0xd5e   :  { %v3057_v9 = vpop.eup %3056  ;;  %v1062_v11 = vmul.f32 %v3055_v32, %v3868_v60 }
 0xd5f   :  { %v1063_v59 = vmul.f32 %v3057_v9, %v3877_v42 }
 0xdc0   :  { %v1067_v34 = vpop.permute.xlu1 %1066 }
 0xdc1   :  { %v1072_v16 = vmul.f32 %v3055_v32, %v1067_v34  ;;  %v1220_v34 = vsel %vm1218_vm15, 1, %v3247_v33  ;;  %vm1339_vm15 = vcmp.gt.s32.totalorder %v3859_v43, 6 }
 0xdc3   :  { %1076 = vrot.lane.b32.xlu1 %v1072_v16, %s3248_s26 }
 0xdc4   :  { %v1069_v36 = vpop.permute.xlu1 %1068 }
 0xdc5   :  { %v1073_v38 = vmul.f32 %v3057_v9, %v1069_v36 }
 0xdc7   :  { %1101 = vperm.xlu1 %2941, %v1098_v37   ;;  %1078 = vrot.lane.b32.xlu0 %v1073_v38, %s3248_s26 }
 0xdcb   :  { %1104 = vperm.xlu0 %2940, %v1099_v44  }
 0xe35   :  { %v1077_v49 = vpop.permute.xlu1 %1076 }
 0xe36   :  { %v3871_v54 = vadd.f32 %v1077_v49, %v1062_v11 }
 0xe38   :  { %3058 = vtanh.f32 %v3871_v54 }
 0xe39   :  { %v1079_v51 = vpop.permute.xlu0 %1078 }
 0xe3a   :  { %v3881_v45 = vadd.f32 %v1079_v51, %v1063_v59 }
 0xe3c   :  { %3060 = vtanh.f32 %v3881_v45 }
 0xe42   :  { %v3059_v41 = vpop.eup %3058 }
 0xe43   :  { %1088 = vrot.lane.b32.xlu1 %v3059_v41, %s3248_s26 }
 0xe46   :  { %v3061_v39 = vpop.eup %3060  ;;  %v3886_v48 = vpop.permute.xlu1 %1101 }
 0xe47   :  { %1090 = vrot.lane.b32.xlu0 %v3061_v39, %s3248_s26  ;;  %vm1106_vm10 = vcmp.eq.s32.totalorder %v3886_v48, 1 }
 0xe48   :  { %v3927_v16 = vsel %vm1106_vm10, %v3871_v54, %v3868_v60 }
 0xe4a   :  { %v3888_v53 = vpop.permute.xlu0 %1104 }
 0xe4b   :  { %vm1107_vm11 = vcmp.eq.s32.totalorder %v3888_v53, 1 }
 0xe4c   :  { %v3936_v38 = vsel %vm1107_vm11, %v3881_v45, %v3877_v42  ;;  %v2946_v42 = vld [vmem:[%s4413_s7] sm:$0xff]  }
 0xe4d   :  { %2832 = vmatprep.subr.bf16.mxu0 %v2946_v42 }
 0xeb5   :  { %v1089_v40 = vpop.permute.xlu1 %1088 }
 0xeb6   :  { %v1094_v57 = vmul.f32 %v3055_v32, %v1089_v40  ;;  %v1219_v32 = vsel %vm1217_vm14, 1, %v3247_v33  ;;  %vm1338_vm14 = vcmp.gt.s32.totalorder %v3851_v62, 6 }
 0xeb8   :  { %v3895_v58 = vsel %vm1106_vm10, %v1094_v57, %v3795_v47  ;;  %v1121_v47 = vunpack.c.l.bf16 %v3840_v18 }
 0xeb9   :  { %v1091_v46 = vpop.permute.xlu0 %1090 }
 0xeba   :  { %v1095_v22 = vmul.f32 %v3057_v9, %v1091_v46 }
 0xebc   :  { %v3900_v3 = vsel %vm1107_vm11, %v1095_v22, %v3800_v19 }
 0xebd   :  { %v1112_v4 = vpack.c.bf16 %v3900_v3, %v3895_v58 }
 0xebf   :  { %1114 = vrot.lane.b32.xlu1 %v1112_v4, %s3249_s29  ;;  %v2947_v4 = vld [vmem:[%s4413_s7 + $0x8] sm:$0xff]  }
 0xf31   :  { %v1115_v27 = vpop.permute.xlu1 %1114 }
 0xf32   :  { %1118 = vst.msk [vmem:[#allocation3 + $0x20] sm:$0xff] %vm60_vm0, %v1115_v27  ;;  %2813 = vmatmul.mubr.msk.bf16.vlgmr.msra.gmra.mrb[16].mxu1 %vm60_vm0, %v1115_v27 }
 0xf33   :  { %2825 = vmatpush3.bf16.msra.mxu1 %v3825_v63  ;;  %2828 = vmatprep.mubr.msk.bf16.mxu1 %vm3246_vm1, %v3245_v30 }
 0xf34   :  { %2826 = vmatprep.subr.bf16.mxu1 %v3245_v30 }
 0xf37   :  { %2827 = vmatpush3.bf16.msra.mxu1 %v3834_v50 }
 0xf38   :  { %2852 = vmatprep.subr.bf16.mxu1 %v3245_v30 }
0x1005   :  { %v1160_v19 = vpop.f32.mrb[16].mxu1 }
0x1006   :  { %v1167_v35 = vadd.f32 %v1160_v19, %v1121_v47  ;;  %v2814_v10 = vpop.f32.mrb[17].mxu1  ;;  %v1482_v47 = vld [vmem:[#allocation3 + $0x10] sm:$0xff]  ;;  %v1483_v19 = vld [vmem:[#allocation3 + $0x18] sm:$0xff] }
0x1007   :  { %v1163_v8 = vpop.f32.mrb[18].mxu1 }
0x1008   :  { %3062 = vtanh.f32 %v1167_v35  ;;  %v1168_v12 = vadd.f32 %v1163_v8, %v1122_v21  ;;  %v2815_v63 = vpop.f32.mrb[19].mxu1  ;;  %v2627_v50 = vmul.f32 -1.442695, %v1167_v35  ;;  %v1484_v35 = vld [vmem:[#allocation3 + $0x20] sm:$0xff]  ;;  %v1242_v21 = vunpack.c.l.bf16 %v3844_v5 }
0x100a   :  { %3064 = vtanh.f32 %v1168_v12  ;;  %v2628_v17 = vmul.f32 -1.442695, %v1168_v12 }
0x100b   :  { %3066 = vpow2.f32 %v2627_v50 }
0x100c   :  { %3068 = vpow2.f32 %v2628_v17 }
0x1012   :  { %v3063_v23 = vpop.eup %3062 }
0x1013   :  { %1187 = vrot.lane.b32.xlu0 %v3063_v23, %s3248_s26  ;;  %v1243_v23 = vunpack.c.h.bf16 %v3844_v5 }
0x1014   :  { %v3065_v14 = vpop.eup %3064 }
0x1015   :  { %1189 = vrot.lane.b32.xlu1 %v3065_v14, %s3248_s26  ;;  %v3067_v0 = vpop.eup %3066 }
0x1016   :  { %v3069_v20 = vpop.eup %3068  ;;  %v1175_v52 = vadd.f32 1.0, %v3067_v0 }
0x1017   :  { %v1176_v31 = vadd.f32 1.0, %v3069_v20  ;;  %v3984_v20 = vld [vmem:[%s4414_s9] ss:$0 sm:$0xff] }
0x1018   :  { %3070 = vrcp.f32 %v1175_v52 }
0x1019   :  { %3072 = vrcp.f32 %v1176_v31 }
0x1022   :  { %v3071_v18 = vpop.eup %3070 }
0x1023   :  { %v3073_v26 = vpop.eup %3072  ;;  %v1183_v9 = vmul.f32 %v3071_v18, %v3927_v16 }
0x1024   :  { %v1184_v44 = vmul.f32 %v3073_v26, %v3936_v38 }
0x1085   :  { %v1188_v24 = vpop.permute.xlu0 %1187 }
0x1086   :  { %v1193_v25 = vmul.f32 %v3071_v18, %v1188_v24 }
0x1087   :  { %v1190_v28 = vpop.permute.xlu1 %1189 }
0x1088   :  { %1197 = vrot.lane.b32.xlu0 %v1193_v25, %s3248_s26  ;;  %v1194_v29 = vmul.f32 %v3073_v26, %v1190_v28 }
0x108a   :  { %1199 = vrot.lane.b32.xlu1 %v1194_v29, %s3248_s26 }
0x108c   :  { %1222 = vperm.xlu0 %2940, %v1219_v32  }
0x108e   :  { %1225 = vperm.xlu1 %2941, %v1220_v34  }
0x10fa   :  { %v1198_v36 = vpop.permute.xlu0 %1197 }
0x10fb   :  { %v3930_v37 = vadd.f32 %v1198_v36, %v1183_v9 }
0x10fc   :  { %v1200_v11 = vpop.permute.xlu1 %1199 }
0x10fd   :  { %3074 = vtanh.f32 %v3930_v37  ;;  %v3940_v49 = vadd.f32 %v1200_v11, %v1184_v44 }
0x10ff   :  { %3076 = vtanh.f32 %v3940_v49 }
0x1107   :  { %v3075_v60 = vpop.eup %3074 }
0x1108   :  { %1209 = vrot.lane.b32.xlu0 %v3075_v60, %s3248_s26 }
0x1109   :  { %v3077_v54 = vpop.eup %3076 }
0x110a   :  { %1211 = vrot.lane.b32.xlu1 %v3077_v54, %s3248_s26 }
0x110b   :  { %v3948_v59 = vpop.permute.xlu0 %1222 }
0x110c   :  { %vm1227_vm6 = vcmp.eq.s32.totalorder %v3948_v59, 1 }
0x110d   :  { %v3950_v51 = vpop.permute.xlu1 %1225 }
0x110e   :  { %vm1228_vm7 = vcmp.eq.s32.totalorder %v3950_v51, 1 }
0x117a   :  { %v1210_v45 = vpop.permute.xlu0 %1209 }
0x117b   :  { %v1215_v41 = vmul.f32 %v3071_v18, %v1210_v45 }
0x117c   :  { %v1212_v39 = vpop.permute.xlu1 %1211 }
0x117d   :  { %v1216_v40 = vmul.f32 %v3073_v26, %v1212_v39  ;;  %v3957_v57 = vsel %vm1227_vm6, %v1215_v41, %v3895_v58  ;;  %v1480_v58 = vld [vmem:[#allocation3] sm:$0xff] }
0x117f   :  { %v3962_v46 = vsel %vm1228_vm7, %v1216_v40, %v3900_v3  ;;  %v1481_v3 = vld [vmem:[#allocation3 + $0x8] sm:$0xff] }
0x1180   :  { %v1233_v22 = vpack.c.bf16 %v3962_v46, %v3957_v57 }
0x1182   :  { %1235 = vrot.lane.b32.xlu0 %v1233_v22, %s3249_s29 }
0x11f4   :  { %v1236_v27 = vpop.permute.xlu0 %1235 }
0x11f5   :  { %1239 = vst.msk [vmem:[#allocation3 + $0x28] sm:$0xff] %vm60_vm0, %v1236_v27  ;;  %2821 = vmatmul.mubr.msk.bf16.vlgmr.msra.gmra.mrb[20].mxu0 %vm60_vm0, %v1236_v27 }
0x11f6   :  { %2833 = vmatpush3.bf16.msra.mxu0 %v2946_v42  ;;  %2836 = vmatprep.mubr.msk.bf16.mxu0 %vm60_vm0, %v1480_v58 }
0x11f7   :  { %2834 = vmatprep.subr.bf16.mxu0 %v2947_v4 }
0x11fa   :  { %2835 = vmatpush3.bf16.msra.mxu0 %v2947_v4 }
0x11fb   :  { %2884 = vmatprep.subr.bf16.mxu0 %v3245_v30 }
0x11fc   :  { %v1485_v10 = vld [vmem:[#allocation3 + $0x28] sm:$0xff] }
0x11fd   :  { %2837 = vmatmul.mubr.msk.bf16.vlgmr.msra.gmra.mrb[24].mxu0 %vm60_vm0, %v1481_v3 }
0x11fe   :  { %2840 = vmatprep.mubr.msk.bf16.mxu0 %vm60_vm0, %v1482_v47 }
0x1205   :  { %2841 = vmatmul.mubr.msk.bf16.gmra.mrb[28].mxu0 %vm60_vm0, %v1483_v19 }
0x1206   :  { %2844 = vmatprep.mubr.msk.bf16.mxu0 %vm60_vm0, %v1484_v35 }
0x120d   :  { %2845 = vmatmul.mubr.msk.bf16.gmra.mrb[32].mxu0 %vm60_vm0, %v1485_v10 }
0x12c8   :  { %v1281_v8 = vpop.f32.mrb[20].mxu0 }
0x12c9   :  { %v1288_v12 = vadd.f32 %v1281_v8, %v1242_v21  ;;  %v2822_v63 = vpop.f32.mrb[21].mxu0 }
0x12ca   :  { %v1284_v14 = vpop.f32.mrb[22].mxu0 }
0x12cb   :  { %3078 = vtanh.f32 %v1288_v12  ;;  %v1289_v50 = vadd.f32 %v1284_v14, %v1243_v23  ;;  %v2823_v17 = vpop.f32.mrb[23].mxu0  ;;  %v2630_v21 = vmul.f32 -1.442695, %v1288_v12  ;;  %v1340_v12 = vsel %vm1338_vm14, 1, %v3247_v33 }
0x12cd   :  { %3080 = vtanh.f32 %v1289_v50  ;;  %v2631_v8 = vmul.f32 -1.442695, %v1289_v50  ;;  %v1341_v50 = vsel %vm1339_vm15, 1, %v3247_v33 }
0x12ce   :  { %3082 = vpow2.f32 %v2630_v21 }
0x12cf   :  { %3084 = vpow2.f32 %v2631_v8  ;;  %v1364_v8 = vunpack.c.h.bf16 %v3842_v7 }
0x12d0   :  { %v2838_v0 = vpop.f32.mrb[24].mxu0 }
0x12d1   :  { %v1569_v52 = vpop.f32.mrb[25].mxu0  ;;  %v1578_v18 = vadd.f32 %v2838_v0, %v3984_v20 }
0x12d2   :  { %v2839_v31 = vpop.f32.mrb[26].mxu0  ;;  %v1570_v5 = vadd.f32 %v3984_v20, %v1569_v52 }
0x12d3   :  { %v1581_v24 = vadd.f32 %v2839_v31, %v3984_v20  ;;  %v1572_v25 = vpop.f32.mrb[27].mxu0 }
0x12d4   :  { %v1573_v26 = vadd.f32 %v3984_v20, %v1572_v25 }
0x12d5   :  { %v3079_v28 = vpop.eup %3078  ;;  %v3990_v29 = vpack.c.bf16 %v1581_v24, %v1578_v18 }
0x12d6   :  { %v3992_v32 = vpack.c.bf16 %v1573_v26, %v1570_v5  ;;  %1308 = vrot.lane.b32.xlu1 %v3079_v28, %s3248_s26  ;;  %v4022_v5 = vsel %vm1227_vm6, %v3930_v37, %v3927_v16 }
0x12d7   :  { %v3081_v34 = vpop.eup %3080 }
0x12d8   :  { %v2842_v9 = vpop.f32.mrb[28].mxu0  ;;  %1310 = vrot.lane.b32.xlu0 %v3081_v34, %s3248_s26  ;;  %v3083_v63 = vpop.eup %3082 }
0x12d9   :  { %v1585_v36 = vpop.f32.mrb[29].mxu0  ;;  %v1594_v11 = vadd.f32 %v2842_v9, %v3984_v20  ;;  %v3085_v23 = vpop.eup %3084  ;;  %v1296_v14 = vadd.f32 1.0, %v3083_v63  ;;  %v4031_v9 = vsel %vm1228_vm7, %v3940_v49, %v3936_v38  ;;  %v4043_v38 = vld [vmem:[%s4415_s8] sm:$0xff]  }
0x12da   :  { %v2843_v44 = vpop.f32.mrb[30].mxu0  ;;  %v1586_v42 = vadd.f32 %v3984_v20, %v1585_v36  ;;  %v1297_v17 = vadd.f32 1.0, %v3085_v23  ;;  %2885 = vmatpush3.bf16.msra.mxu0 %v4043_v38 }
0x12db   :  { %v1597_v60 = vadd.f32 %v2843_v44, %v3984_v20  ;;  %v1588_v54 = vpop.f32.mrb[31].mxu0  ;;  %3086 = vrcp.f32 %v1296_v14  ;;  %2886 = vmatprep.subr.bf16.mxu0 %v3245_v30 }
0x12dc   :  { %v1589_v45 = vadd.f32 %v3984_v20, %v1588_v54  ;;  %3088 = vrcp.f32 %v1297_v17  ;;  %v4054_v54 = vld [vmem:[%s4415_s8 + $0x8] sm:$0xff]   ;;  %v1653_v17 = vunpack.c.l.bf16 %v3992_v32 }
0x12dd   :  { %v4000_v41 = vpack.c.bf16 %v1597_v60, %v1594_v11 }
0x12de   :  { %v4002_v39 = vpack.c.bf16 %v1589_v45, %v1586_v42  ;;  %2887 = vmatpush3.bf16.msra.mxu0 %v4054_v54 }
0x12df   :  { %2900 = vmatprep.subr.bf16.mxu0 %v3245_v30 }
0x12e0   :  { %v2846_v40 = vpop.f32.mrb[32].mxu0 }
0x12e1   :  { %v1601_v22 = vpop.f32.mrb[33].mxu0  ;;  %v1610_v27 = vadd.f32 %v2846_v40, %v3984_v20 }
0x12e2   :  { %v2847_v4 = vpop.f32.mrb[34].mxu0  ;;  %v1602_v47 = vadd.f32 %v3984_v20, %v1601_v22 }
0x12e3   :  { %v1613_v58 = vadd.f32 %v2847_v4, %v3984_v20  ;;  %v1604_v3 = vpop.f32.mrb[35].mxu0 }
0x12e4   :  { %v1605_v19 = vadd.f32 %v3984_v20, %v1604_v3 }
0x12e5   :  { %v4008_v35 = vpack.c.bf16 %v1613_v58, %v1610_v27  ;;  %v3087_v0 = vpop.eup %3086 }
0x12e6   :  { %v4010_v10 = vpack.c.bf16 %v1605_v19, %v1602_v47  ;;  %v3089_v18 = vpop.eup %3088  ;;  %v1304_v26 = vmul.f32 %v3087_v0, %v4022_v5 }
0x12e7   :  { %v1305_v36 = vmul.f32 %v3089_v18, %v4031_v9 }
0x1348   :  { %v1309_v52 = vpop.permute.xlu1 %1308 }
0x1349   :  { %v1314_v31 = vmul.f32 %v3087_v0, %v1309_v52 }
0x134a   :  { %v1311_v24 = vpop.permute.xlu0 %1310 }
0x134b   :  { %1318 = vrot.lane.b32.xlu1 %v1314_v31, %s3248_s26  ;;  %v1315_v25 = vmul.f32 %v3089_v18, %v1311_v24 }
0x134d   :  { %1320 = vrot.lane.b32.xlu0 %v1315_v25, %s3248_s26 }
0x134f   :  { %1343 = vperm.xlu1 %2941, %v1340_v12  }
0x1351   :  { %1346 = vperm.xlu0 %2940, %v1341_v50  }
0x13bd   :  { %v1319_v28 = vpop.permute.xlu1 %1318 }
0x13be   :  { %v4025_v34 = vadd.f32 %v1319_v28, %v1304_v26 }
0x13bf   :  { %v1321_v44 = vpop.permute.xlu0 %1320 }
0x13c0   :  { %3090 = vtanh.f32 %v4025_v34  ;;  %v4035_v11 = vadd.f32 %v1321_v44, %v1305_v36 }
0x13c2   :  { %3092 = vtanh.f32 %v4035_v11 }
0x13ca   :  { %v3091_v16 = vpop.eup %3090 }
0x13cb   :  { %1330 = vrot.lane.b32.xlu1 %v3091_v16, %s3248_s26 }
0x13cc   :  { %v3093_v37 = vpop.eup %3092 }
0x13cd   :  { %1332 = vrot.lane.b32.xlu0 %v3093_v37, %s3248_s26 }
0x13ce   :  { %v4045_v49 = vpop.permute.xlu1 %1343 }
0x13cf   :  { %vm1348_vm14 = vcmp.eq.s32.totalorder %v4045_v49, 1  ;;  %v2496_v49 = vld [vmem:[%s4416_s10 + $0x8] sm:$0xff] }
0x13d0   :  { %v4049_v60 = vpop.permute.xlu0 %1346 }
0x13d1   :  { %vm1349_vm15 = vcmp.eq.s32.totalorder %v4049_v60, 1  ;;  %v2498_v60 = vld [vmem:[%s4416_s10 + $0x18] sm:$0xff] }
0x143d   :  { %v1331_v42 = vpop.permute.xlu1 %1330 }
0x143e   :  { %v1336_v45 = vmul.f32 %v3087_v0, %v1331_v42 }
0x143f   :  { %v1333_v40 = vpop.permute.xlu0 %1332 }
0x1440   :  { %v1337_v22 = vmul.f32 %v3089_v18, %v1333_v40  ;;  %v4063_v4 = vsel %vm1348_vm14, %v1336_v45, %v3957_v57  ;;  %v1654_v18 = vunpack.c.h.bf16 %v3992_v32 }
0x1442   :  { %v4068_v27 = vsel %vm1349_vm15, %v1337_v22, %v3962_v46  ;;  %v1363_v46 = vunpack.c.l.bf16 %v3842_v7 }
0x1443   :  { %v1354_v58 = vpack.c.bf16 %v4068_v27, %v4063_v4 }
0x1445   :  { %1356 = vrot.lane.b32.xlu1 %v1354_v58, %s3249_s29 }
0x14b7   :  { %v1357_v3 = vpop.permute.xlu1 %1356 }
0x14b8   :  { %1360 = vst.msk [vmem:[#allocation3 + $0x30] sm:$0xff] %vm60_vm0, %v1357_v3  ;;  %2829 = vmatmul.mubr.msk.bf16.vlgmr.msra.gmra.mrb[20].mxu1 %vm60_vm0, %v1357_v3 }
0x14b9   :  { %2853 = vmatpush3.bf16.msra.mxu1 %v4043_v38  ;;  %2856 = vmatprep.mubr.msk.bf16.mxu1 %vm3246_vm1, %v3245_v30 }
0x14ba   :  { %2854 = vmatprep.subr.bf16.mxu1 %v3245_v30 }
0x14bd   :  { %2855 = vmatpush3.bf16.msra.mxu1 %v4054_v54 }
0x14be   :  { %2860 = vmatprep.subr.bf16.mxu1 %v3245_v30 }
0x14bf   :  { %v1486_v57 = vld [vmem:[#allocation3 + $0x30] sm:$0xff] }
0x14c0   :  { %2848 = vmatprep.mubr.msk.bf16.mxu0 %vm60_vm0, %v1486_v57  ;;  %2857 = vmatmul.mubr.bf16.vlgmr.msra.gmra.mrb[24].mxu1 %v3247_v33 }
0x14c1   :  { %2861 = vmatpush3.bf16.msra.mxu1 %v4043_v38  ;;  %2864 = vmatprep.mubr.msk.bf16.mxu1 %vm3246_vm1, %v3245_v30 }
0x14c2   :  { %2862 = vmatprep.subr.bf16.mxu1 %v3245_v30 }
0x14c5   :  { %2863 = vmatpush3.bf16.msra.mxu1 %v4054_v54 }
0x14c6   :  { %2868 = vmatprep.subr.bf16.mxu1 %v3245_v30 }
0x158b   :  { %v1402_v47 = vpop.f32.mrb[20].mxu1 }
0x158c   :  { %v4090_v19 = vadd.f32 %v1402_v47, %v1363_v46  ;;  %v2830_v21 = vpop.f32.mrb[21].mxu1 }
0x158d   :  { %v1405_v63 = vpop.f32.mrb[22].mxu1 }
0x158e   :  { %v4093_v23 = vadd.f32 %v1405_v63, %v1364_v8  ;;  %v2831_v14 = vpop.f32.mrb[23].mxu1 }
0x1593   :  { %v1701_v0 = vpop.f32.mrb[24].mxu1 }
0x1594   :  { %v1708_v52 = vadd.f32 %v1701_v0, %v1653_v17  ;;  %v2858_v31 = vpop.f32.mrb[25].mxu1 }
0x1595   :  { %v1704_v24 = vpop.f32.mrb[26].mxu1 }
0x1596   :  { %3094 = vtanh.f32 %v1708_v52  ;;  %v1709_v25 = vadd.f32 %v1704_v24, %v1654_v18  ;;  %v2859_v12 = vpop.f32.mrb[27].mxu1  ;;  %v2648_v26 = vmul.f32 -1.442695, %v1708_v52 }
0x1598   :  { %3096 = vtanh.f32 %v1709_v25  ;;  %v2649_v28 = vmul.f32 -1.442695, %v1709_v25 }
0x1599   :  { %3098 = vpow2.f32 %v2648_v26 }
0x159a   :  { %3100 = vpow2.f32 %v2649_v28 }
0x15a0   :  { %v3095_v50 = vpop.eup %3094 }
0x15a1   :  { %1728 = vrot.lane.b32.xlu0 %v3095_v50, %s3248_s26  ;;  %v1763_v50 = vunpack.c.l.bf16 %v3990_v29 }
0x15a2   :  { %v3097_v7 = vpop.eup %3096 }
0x15a3   :  { %1730 = vrot.lane.b32.xlu1 %v3097_v7, %s3248_s26  ;;  %v3099_v36 = vpop.eup %3098 }
0x15a4   :  { %v3101_v44 = vpop.eup %3100  ;;  %v1716_v16 = vadd.f32 1.0, %v3099_v36  ;;  %v1764_v36 = vunpack.c.h.bf16 %v3990_v29 }
0x15a5   :  { %v1717_v37 = vadd.f32 1.0, %v3101_v44 }
0x15a6   :  { %3102 = vrcp.f32 %v1716_v16 }
0x15a7   :  { %3104 = vrcp.f32 %v1717_v37 }
0x15b0   :  { %v3103_v32 = vpop.eup %3102 }
0x15b1   :  { %v3105_v40 = vpop.eup %3104  ;;  %v1724_v3 = vmul.f32 0.0, %v3103_v32 }
0x15b2   :  { %v1725_v47 = vmul.f32 0.0, %v3105_v40 }
0x1613   :  { %v1729_v42 = vpop.permute.xlu0 %1728 }
0x1614   :  { %v1734_v45 = vmul.f32 %v3103_v32, %v1729_v42 }
0x1615   :  { %v1731_v22 = vpop.permute.xlu1 %1730 }
0x1616   :  { %1738 = vrot.lane.b32.xlu0 %v1734_v45, %s3248_s26  ;;  %v1735_v58 = vmul.f32 %v3105_v40, %v1731_v22 }
0x1618   :  { %1740 = vrot.lane.b32.xlu1 %v1735_v58, %s3248_s26 }
0x1688   :  { %v1739_v57 = vpop.permute.xlu0 %1738 }
0x1689   :  { %v1744_v46 = vadd.f32 %v1739_v57, %v1724_v3 }
0x168a   :  { %v1741_v21 = vpop.permute.xlu1 %1740 }
0x168b   :  { %3106 = vtanh.f32 %v1744_v46  ;;  %v1745_v8 = vadd.f32 %v1741_v21, %v1725_v47 }
0x168d   :  { %3108 = vtanh.f32 %v1745_v8 }
0x1695   :  { %v3107_v63 = vpop.eup %3106 }
0x1696   :  { %1750 = vrot.lane.b32.xlu0 %v3107_v63, %s3248_s26 }
0x1697   :  { %v3109_v14 = vpop.eup %3108 }
0x1698   :  { %1752 = vrot.lane.b32.xlu1 %v3109_v14, %s3248_s26 }
0x1708   :  { %v1751_v17 = vpop.permute.xlu0 %1750 }
0x1709   :  { %v1756_v0 = vmul.f32 %v3103_v32, %v1751_v17 }
0x170a   :  { %v1753_v52 = vpop.permute.xlu1 %1752 }
0x170b   :  { %v1757_v31 = vmul.f32 %v3105_v40, %v1753_v52  ;;  %v1758_v18 = vsel %vm623_vm4, %v1756_v0, 0.0  ;;  %v1760_v0 = vsel %vm623_vm4, %v1744_v46, 0.0  ;;  %vm1459_vm4 = vcmp.gt.s32.totalorder %v3851_v62, 7 }
0x170c   :  { %v1353_v62 = vsel %vm1349_vm15, %v4035_v11, %v4031_v9 }
0x170d   :  { %v1759_v24 = vsel %vm624_vm5, %v1757_v31, 0.0 }
0x170e   :  { %v1765_v25 = vpack.c.bf16 %v1759_v24, %v1758_v18 }
0x1710   :  { %1767 = vrot.lane.b32.xlu0 %v1765_v25, %s3249_s29  ;;  %v4125_v25 = vsel %vm624_vm5, %v1745_v8, 0.0  ;;  %vm1460_vm5 = vcmp.gt.s32.totalorder %v3859_v43, 7 }
0x1782   :  { %v1768_v12 = vpop.permute.xlu0 %1767 }
0x1783   :  { %2865 = vmatmul.mubr.msk.bf16.vlgmr.msra.gmra.mrb[28].mxu1 %vm60_vm0, %v1768_v12 }
0x1784   :  { %2869 = vmatpush3.bf16.msra.mxu1 %v4043_v38  ;;  %2872 = vmatprep.mubr.msk.bf16.mxu1 %vm3246_vm1, %v3245_v30 }
0x1785   :  { %2870 = vmatprep.subr.bf16.mxu1 %v3245_v30 }
0x1788   :  { %2871 = vmatpush3.bf16.msra.mxu1 %v4054_v54 }
0x1789   :  { %2876 = vmatprep.subr.bf16.mxu1 %v3245_v30 }
0x1856   :  { %v1806_v7 = vpop.f32.mrb[28].mxu1 }
0x1857   :  { %v1813_v26 = vadd.f32 %v1806_v7, %v1763_v50  ;;  %v2866_v28 = vpop.f32.mrb[29].mxu1 }
0x1858   :  { %v1809_v44 = vpop.f32.mrb[30].mxu1 }
0x1859   :  { %3110 = vtanh.f32 %v1813_v26  ;;  %v1814_v16 = vadd.f32 %v1809_v44, %v1764_v36  ;;  %v2867_v37 = vpop.f32.mrb[31].mxu1  ;;  %v2651_v45 = vmul.f32 -1.442695, %v1813_v26 }
0x185b   :  { %3112 = vtanh.f32 %v1814_v16  ;;  %v2652_v40 = vmul.f32 -1.442695, %v1814_v16 }
0x185c   :  { %3114 = vpow2.f32 %v2651_v45 }
0x185d   :  { %3116 = vpow2.f32 %v2652_v40  ;;  %v1869_v40 = vunpack.c.h.bf16 %v4002_v39 }
0x1863   :  { %v3111_v32 = vpop.eup %3110 }
0x1864   :  { %1833 = vrot.lane.b32.xlu1 %v3111_v32, %s3248_s26 }
0x1865   :  { %v3113_v42 = vpop.eup %3112 }
0x1866   :  { %1835 = vrot.lane.b32.xlu0 %v3113_v42, %s3248_s26  ;;  %v3115_v22 = vpop.eup %3114 }
0x1867   :  { %v3117_v58 = vpop.eup %3116  ;;  %v1821_v3 = vadd.f32 1.0, %v3115_v22 }
0x1868   :  { %v1822_v57 = vadd.f32 1.0, %v3117_v58 }
0x1869   :  { %3118 = vrcp.f32 %v1821_v3 }
0x186a   :  { %3120 = vrcp.f32 %v1822_v57 }
0x1873   :  { %v3119_v29 = vpop.eup %3118 }
0x1874   :  { %v3121_v63 = vpop.eup %3120  ;;  %v1829_v52 = vmul.f32 %v3119_v29, %v1760_v0 }
0x1875   :  { %v1830_v50 = vmul.f32 %v3121_v63, %v4125_v25 }
0x18d6   :  { %v1834_v47 = vpop.permute.xlu1 %1833 }
0x18d7   :  { %v1839_v21 = vmul.f32 %v3119_v29, %v1834_v47 }
0x18d8   :  { %v1836_v14 = vpop.permute.xlu0 %1835 }
0x18d9   :  { %1843 = vrot.lane.b32.xlu1 %v1839_v21, %s3248_s26  ;;  %v1840_v17 = vmul.f32 %v3121_v63, %v1836_v14 }
0x18db   :  { %1845 = vrot.lane.b32.xlu0 %v1840_v17, %s3248_s26 }
0x194b   :  { %v1844_v31 = vpop.permute.xlu1 %1843 }
0x194c   :  { %v1849_v12 = vadd.f32 %v1844_v31, %v1829_v52 }
0x194d   :  { %v1846_v7 = vpop.permute.xlu0 %1845 }
0x194e   :  { %3122 = vtanh.f32 %v1849_v12  ;;  %v1850_v26 = vadd.f32 %v1846_v7, %v1830_v50 }
0x1950   :  { %3124 = vtanh.f32 %v1850_v26 }
0x1958   :  { %v3123_v28 = vpop.eup %3122 }
0x1959   :  { %1855 = vrot.lane.b32.xlu1 %v3123_v28, %s3248_s26 }
0x195a   :  { %v3125_v36 = vpop.eup %3124 }
0x195b   :  { %1857 = vrot.lane.b32.xlu0 %v3125_v36, %s3248_s26 }
0x19cb   :  { %v1856_v56 = vpop.permute.xlu1 %1855 }
0x19cc   :  { %v1861_v46 = vmul.f32 %v3119_v29, %v1856_v56  ;;  %v4156_v56 = vsel %vm743_vm9, %v1849_v12, %v1760_v0 }
0x19cd   :  { %v1858_v44 = vpop.permute.xlu0 %1857 }
0x19ce   :  { %v1862_v16 = vmul.f32 %v3121_v63, %v1858_v44  ;;  %v4132_v55 = vsel %vm743_vm9, %v1861_v46, %v1758_v18  ;;  %v1868_v18 = vunpack.c.l.bf16 %v4002_v39 }
0x19d0   :  { %v4136_v8 = vsel %vm744_vm8, %v1862_v16, %v1759_v24 }
0x19d1   :  { %v1870_v37 = vpack.c.bf16 %v4136_v8, %v4132_v55 }
0x19d3   :  { %1872 = vrot.lane.b32.xlu1 %v1870_v37, %s3249_s29  ;;  %v4164_v37 = vsel %vm744_vm8, %v1850_v26, %v4125_v25 }
0x1a45   :  { %v1873_v32 = vpop.permute.xlu1 %1872 }
0x1a46   :  { %2873 = vmatmul.mubr.msk.bf16.vlgmr.msra.gmra.mrb[32].mxu1 %vm60_vm0, %v1873_v32 }
0x1a47   :  { %2877 = vmatpush3.bf16.msra.mxu1 %v4043_v38  ;;  %2880 = vmatprep.mubr.msk.bf16.mxu1 %vm3246_vm1, %v3245_v30 }
0x1a48   :  { %2878 = vmatprep.subr.bf16.mxu1 %v3245_v30 }
0x1a4b   :  { %2879 = vmatpush3.bf16.msra.mxu1 %v4054_v54 }
0x1a4c   :  { %2892 = vmatprep.subr.bf16.mxu1 %v3245_v30 }
0x1b19   :  { %v1911_v24 = vpop.f32.mrb[32].mxu1 }
0x1b1a   :  { %v1918_v42 = vadd.f32 %v1911_v24, %v1868_v18  ;;  %v2874_v45 = vpop.f32.mrb[33].mxu1 }
0x1b1b   :  { %v1914_v22 = vpop.f32.mrb[34].mxu1 }
0x1b1c   :  { %3126 = vtanh.f32 %v1918_v42  ;;  %v1919_v58 = vadd.f32 %v1914_v22, %v1869_v40  ;;  %v2875_v3 = vpop.f32.mrb[35].mxu1  ;;  %v2654_v47 = vmul.f32 -1.442695, %v1918_v42 }
0x1b1e   :  { %3128 = vtanh.f32 %v1919_v58  ;;  %v2655_v21 = vmul.f32 -1.442695, %v1919_v58 }
0x1b1f   :  { %3130 = vpow2.f32 %v2654_v47 }
0x1b20   :  { %3132 = vpow2.f32 %v2655_v21 }
0x1b26   :  { %v3127_v57 = vpop.eup %3126 }
0x1b27   :  { %1938 = vrot.lane.b32.xlu0 %v3127_v57, %s3248_s26 }
0x1b28   :  { %v3129_v29 = vpop.eup %3128 }
0x1b29   :  { %1940 = vrot.lane.b32.xlu1 %v3129_v29, %s3248_s26  ;;  %v3131_v63 = vpop.eup %3130  ;;  %v1973_v29 = vunpack.c.l.bf16 %v4000_v41 }
0x1b2a   :  { %v3133_v14 = vpop.eup %3132  ;;  %v1926_v17 = vadd.f32 1.0, %v3131_v63 }
0x1b2b   :  { %v1927_v52 = vadd.f32 1.0, %v3133_v14 }
0x1b2c   :  { %3134 = vrcp.f32 %v1926_v17 }
0x1b2d   :  { %3136 = vrcp.f32 %v1927_v52  ;;  %v1974_v52 = vunpack.c.h.bf16 %v4000_v41 }
0x1b36   :  { %v3135_v39 = vpop.eup %3134 }
0x1b37   :  { %v3137_v7 = vpop.eup %3136  ;;  %v1934_v46 = vmul.f32 %v3135_v39, %v4156_v56 }
0x1b38   :  { %v1935_v32 = vmul.f32 %v3137_v7, %v4164_v37 }
0x1b99   :  { %v1939_v31 = vpop.permute.xlu0 %1938 }
0x1b9a   :  { %v1944_v50 = vmul.f32 %v3135_v39, %v1939_v31 }
0x1b9b   :  { %v1941_v28 = vpop.permute.xlu1 %1940 }
0x1b9c   :  { %1948 = vrot.lane.b32.xlu0 %v1944_v50, %s3248_s26  ;;  %v1945_v36 = vmul.f32 %v3137_v7, %v1941_v28 }
0x1b9e   :  { %1950 = vrot.lane.b32.xlu1 %v1945_v36, %s3248_s26 }
0x1c0e   :  { %v1949_v44 = vpop.permute.xlu0 %1948 }
0x1c0f   :  { %v4159_v16 = vadd.f32 %v1949_v44, %v1934_v46 }
0x1c10   :  { %v1951_v18 = vpop.permute.xlu1 %1950 }
0x1c11   :  { %3138 = vtanh.f32 %v4159_v16  ;;  %v4168_v24 = vadd.f32 %v1951_v18, %v1935_v32  ;;  %v4229_v9 = vsel %vm864_vm12, %v4159_v16, %v4156_v56 }
0x1c13   :  { %3140 = vtanh.f32 %v4168_v24 }
0x1c14   :  { %3142 = vtanh.f32 %v4090_v19 }
0x1c15   :  { %3144 = vtanh.f32 %v4093_v23 }
0x1c1b   :  { %v3139_v15 = vpop.eup %3138 }
0x1c1c   :  { %1960 = vrot.lane.b32.xlu0 %v3139_v15, %s3248_s26 }
0x1c1d   :  { %v3141_v0 = vpop.eup %3140 }
0x1c1e   :  { %1962 = vrot.lane.b32.xlu1 %v3141_v0, %s3248_s26  ;;  %v3143_v13 = vpop.eup %3142 }
0x1c1f   :  { %v3145_v58 = vpop.eup %3144 }
0x1c22   :  { %1429 = vrot.lane.b32.xlu1 %v3143_v13, %s3248_s26 }
0x1c8e   :  { %v1961_v25 = vpop.permute.xlu0 %1960 }
0x1c8f   :  { %v1966_v12 = vmul.f32 %v3135_v39, %v1961_v25 }
0x1c90   :  { %v1963_v26 = vpop.permute.xlu1 %1962 }
0x1c91   :  { %v1967_v42 = vmul.f32 %v3137_v7, %v1963_v26  ;;  %v4179_v45 = vsel %vm864_vm12, %v1966_v12, %v4132_v55  ;;  %v2633_v55 = vmul.f32 -1.442695, %v4090_v19 }
0x1c93   :  { %v4184_v40 = vsel %vm865_vm13, %v1967_v42, %v4136_v8  ;;  %v2634_v8 = vmul.f32 -1.442695, %v4093_v23  ;;  %3146 = vpow2.f32 %v2633_v55 }
0x1c94   :  { %v1975_v22 = vpack.c.bf16 %v4184_v40, %v4179_v45  ;;  %v1430_v23 = vpop.permute.xlu1 %1429 }
0x1c95   :  { %3148 = vpow2.f32 %v2634_v8 }
0x1c96   :  { %1977 = vrot.lane.b32.xlu0 %v1975_v22, %s3249_s29 }
0x1c9a   :  { %1431 = vrot.lane.b32.xlu0 %v3145_v58, %s3248_s26  ;;  %v1352_v58 = vsel %vm1348_vm14, %v4025_v34, %v4022_v5 }
0x1c9d   :  { %v3147_v57 = vpop.eup %3146 }
0x1c9e   :  { %v1417_v63 = vadd.f32 1.0, %v3147_v57 }
0x1c9f   :  { %v3149_v21 = vpop.eup %3148 }
0x1ca0   :  { %v1418_v7 = vadd.f32 1.0, %v3149_v21 }
0x1d08   :  { %v1978_v3 = vpop.permute.xlu0 %1977 }
0x1d09   :  { %2881 = vmatmul.mubr.msk.bf16.vlgmr.msra.gmra.mrb[36].mxu1 %vm60_vm0, %v1978_v3 }
0x1d0a   :  { %2893 = vmatpush3.bf16.msra.mxu1 %v4043_v38  ;;  %2896 = vmatprep.mubr.msk.bf16.mxu1 %vm3246_vm1, %v3245_v30 }
0x1d0b   :  { %2894 = vmatprep.subr.bf16.mxu1 %v3245_v30 }
0x1d0c   :  { %v1432_v44 = vpop.permute.xlu0 %1431 }
0x1d0e   :  { %2895 = vmatpush3.bf16.msra.mxu1 %v4054_v54 }
0x1d0f   :  { %2908 = vmatprep.subr.bf16.mxu1 %v3245_v30 }
0x1ddc   :  { %v2016_v47 = vpop.f32.mrb[36].mxu1 }
0x1ddd   :  { %v2023_v14 = vadd.f32 %v2016_v47, %v1973_v29  ;;  %v2882_v17 = vpop.f32.mrb[37].mxu1  ;;  %v1461_v47 = vsel %vm1459_vm4, 1, %v3247_v33 }
0x1dde   :  { %v2019_v39 = vpop.f32.mrb[38].mxu1 }
0x1ddf   :  { %3150 = vtanh.f32 %v2023_v14  ;;  %v2024_v31 = vadd.f32 %v2019_v39, %v1974_v52  ;;  %v2883_v50 = vpop.f32.mrb[39].mxu1  ;;  %v2657_v18 = vmul.f32 -1.442695, %v2023_v14 }
0x1de0   :  { %3152 = vrcp.f32 %v1417_v63  ;;  %v1462_v63 = vsel %vm1460_vm5, 1, %v3247_v33  ;;  %v4238_v33 = vsel %vm865_vm13, %v4168_v24, %v4164_v37 }
0x1de1   :  { %3154 = vtanh.f32 %v2024_v31  ;;  %v2658_v15 = vmul.f32 -1.442695, %v2024_v31 }
0x1de2   :  { %3156 = vrcp.f32 %v1418_v7 }
0x1de3   :  { %3158 = vpow2.f32 %v2657_v18 }
0x1de4   :  { %3160 = vpow2.f32 %v2658_v15 }
0x1de9   :  { %v3151_v19 = vpop.eup %3150 }
0x1dea   :  { %2043 = vrot.lane.b32.xlu1 %v3151_v19, %s3248_s26  ;;  %v4202_v28 = vpop.eup %3152 }
0x1deb   :  { %v3155_v36 = vpop.eup %3154  ;;  %v1435_v46 = vmul.f32 %v4202_v28, %v1430_v23  ;;  %v1425_v8 = vmul.f32 %v4202_v28, %v1352_v58 }
0x1dec   :  { %2045 = vrot.lane.b32.xlu0 %v3155_v36, %s3248_s26  ;;  %v3157_v41 = vpop.eup %3156 }
0x1ded   :  { %v1436_v32 = vmul.f32 %v3157_v41, %v1432_v44  ;;  %v3159_v0 = vpop.eup %3158  ;;  %v1426_v5 = vmul.f32 %v3157_v41, %v1353_v62  ;;  %v2079_v62 = vunpack.c.h.bf16 %v4010_v10 }
0x1dee   :  { %1439 = vrot.lane.b32.xlu1 %v1435_v46, %s3248_s26  ;;  %v3161_v13 = vpop.eup %3160  ;;  %v2031_v25 = vadd.f32 1.0, %v3159_v0 }
0x1def   :  { %v2032_v12 = vadd.f32 1.0, %v3161_v13 }
0x1df0   :  { %1441 = vrot.lane.b32.xlu0 %v1436_v32, %s3248_s26  ;;  %3162 = vrcp.f32 %v2031_v25 }
0x1df1   :  { %3164 = vrcp.f32 %v2032_v12 }
0x1dfa   :  { %v3163_v26 = vpop.eup %3162 }
0x1dfb   :  { %v3165_v3 = vpop.eup %3164  ;;  %v2039_v11 = vmul.f32 %v3163_v26, %v4229_v9 }
0x1dfc   :  { %v2040_v31 = vmul.f32 %v3165_v3, %v4238_v33 }
0x1e5c   :  { %v2044_v42 = vpop.permute.xlu1 %2043 }
0x1e5d   :  { %v2049_v22 = vmul.f32 %v3163_v26, %v2044_v42 }
0x1e5e   :  { %v2046_v55 = vpop.permute.xlu0 %2045 }
0x1e5f   :  { %2053 = vrot.lane.b32.xlu1 %v2049_v22, %s3248_s26  ;;  %v2050_v57 = vmul.f32 %v3165_v3, %v2046_v55 }
0x1e60   :  { %v1440_v29 = vpop.permute.xlu1 %1439 }
0x1e61   :  { %v1445_v21 = vadd.f32 %v1440_v29, %v1425_v8  ;;  %2055 = vrot.lane.b32.xlu0 %v2050_v57, %s3248_s26  ;;  %v2078_v57 = vunpack.c.l.bf16 %v4010_v10 }
0x1e62   :  { %v1442_v34 = vpop.permute.xlu0 %1441 }
0x1e63   :  { %3166 = vtanh.f32 %v1445_v21  ;;  %1464 = vperm.xlu1 %2941, %v1461_v47   ;;  %v1446_v14 = vadd.f32 %v1442_v34, %v1426_v5 }
0x1e65   :  { %3168 = vtanh.f32 %v1446_v14  ;;  %1467 = vperm.xlu0 %2940, %v1462_v63  }
0x1e6d   :  { %v3167_v17 = vpop.eup %3166 }
0x1e6e   :  { %1451 = vrot.lane.b32.xlu1 %v3167_v17, %s3248_s26 }
0x1e6f   :  { %v3169_v43 = vpop.eup %3168 }
0x1e70   :  { %1453 = vrot.lane.b32.xlu0 %v3169_v43, %s3248_s26 }
0x1ed1   :  { %v2054_v52 = vpop.permute.xlu1 %2053 }
0x1ed2   :  { %v4232_v39 = vadd.f32 %v2054_v52, %v2039_v11 }
0x1ed3   :  { %v2056_v50 = vpop.permute.xlu0 %2055 }
0x1ed4   :  { %3170 = vtanh.f32 %v4232_v39  ;;  %v4242_v7 = vadd.f32 %v2056_v50, %v2040_v31 }
0x1ed6   :  { %3172 = vtanh.f32 %v4242_v7 }
0x1ede   :  { %v3171_v1 = vpop.eup %3170 }
0x1edf   :  { %2065 = vrot.lane.b32.xlu1 %v3171_v1, %s3248_s26 }
0x1ee0   :  { %v3173_v56 = vpop.eup %3172 }
0x1ee1   :  { %2067 = vrot.lane.b32.xlu0 %v3173_v56, %s3248_s26 }
0x1ee2   :  { %v4247_v16 = vpop.permute.xlu1 %1464 }
0x1ee3   :  { %vm1469_vm8 = vcmp.eq.s32.totalorder %v4247_v16, 1  ;;  %v2671_v16 = vld [vmem:[%s4417_s11] ss:$0 sm:$0xff] }
0x1ee4   :  { %v4249_v2 = vpop.permute.xlu0 %1467 }
0x1ee5   :  { %vm1470_vm9 = vcmp.eq.s32.totalorder %v4249_v2, 1 }
0x1ee6   :  { %v1452_v37 = vpop.permute.xlu1 %1451 }
0x1ee7   :  { %v1457_v24 = vmul.f32 %v4202_v28, %v1452_v37 }
0x1ee8   :  { %v1454_v19 = vpop.permute.xlu0 %1453 }
0x1ee9   :  { %v1458_v23 = vmul.f32 %v3157_v41, %v1454_v19  ;;  %v1471_v36 = vsel %vm1469_vm8, %v1457_v24, %v4063_v4 }
0x1eeb   :  { %v1472_v46 = vsel %vm1470_vm9, %v1458_v23, %v4068_v27  ;;  %v2075_v23 = vsel %vm985_vm2, %v4232_v39, %v4229_v9 }
0x1eec   :  { %v1473_v44 = vpack.c.bf16 %v1472_v46, %v1471_v36 }
0x1eee   :  { %1475 = vrot.lane.b32.xlu1 %v1473_v44, %s3249_s29 }
0x1f51   :  { %v2066_v32 = vpop.permute.xlu1 %2065 }
0x1f52   :  { %v2071_v18 = vmul.f32 %v3163_v26, %v2066_v32  ;;  %v2076_v32 = vsel %vm986_vm3, %v4242_v7, %v4238_v33 }
0x1f53   :  { %v2068_v28 = vpop.permute.xlu0 %2067 }
0x1f54   :  { %v2072_v15 = vmul.f32 %v3165_v3, %v2068_v28  ;;  %v4264_v41 = vsel %vm985_vm2, %v2071_v18, %v4179_v45 }
0x1f56   :  { %v4269_v4 = vsel %vm986_vm3, %v2072_v15, %v4184_v40 }
0x1f57   :  { %v2080_v27 = vpack.c.bf16 %v4269_v4, %v4264_v41 }
0x1f59   :  { %2082 = vrot.lane.b32.xlu0 %v2080_v27, %s3249_s29 }
0x1f60   :  { %v1476_v0 = vpop.permute.xlu1 %1475 }
0x1f61   :  { %1479 = vst.msk [vmem:[#allocation3 + $0x38] sm:$0xff] %vm60_vm0, %v1476_v0 }
0x1f68   :  { %v1487_v13 = vld [vmem:[#allocation3 + $0x38] sm:$0xff] }
0x1f69   :  { %2849 = vmatmul.mubr.msk.bf16.gmra.mrb[36].mxu0 %vm60_vm0, %v1487_v13 }
0x1f6a   :  { %2888 = vmatprep.mubr.msk.bf16.mxu0 %vm3246_vm1, %v3245_v30 }
0x1fcb   :  { %v2083_v45 = vpop.permute.xlu0 %2082 }
0x1fcc   :  { %2889 = vmatmul.mubr.msk.bf16.vlgmr.msra.gmra.mrb[40].mxu0 %vm60_vm0, %v2083_v45 }
0x1fcd   :  { %2901 = vmatpush3.bf16.msra.mxu0 %v4043_v38  ;;  %2904 = vmatprep.mubr.msk.bf16.mxu0 %vm3246_vm1, %v3245_v30 }
0x1fce   :  { %2902 = vmatprep.subr.bf16.mxu0 %v3245_v30 }
0x1fd1   :  { %2903 = vmatpush3.bf16.msra.mxu0 %v4054_v54 }
0x203c   :  { %v2850_v40 = vpop.f32.mrb[36].mxu0 }
0x203d   :  { %v1617_v25 = vpop.f32.mrb[37].mxu0  ;;  %v1626_v26 = vadd.f32 %v2850_v40, %v3984_v20 }
0x203e   :  { %v2851_v12 = vpop.f32.mrb[38].mxu0  ;;  %v1618_v58 = vadd.f32 %v3984_v20, %v1617_v25 }
0x203f   :  { %v1629_v42 = vadd.f32 %v2851_v12, %v3984_v20  ;;  %v1620_v22 = vpop.f32.mrb[39].mxu0  ;;  %v2184_v12 = vunpack.c.h.bf16 %v4008_v35 }
0x2040   :  { %v1621_v3 = vadd.f32 %v3984_v20, %v1620_v22 }
0x2041   :  { %v4288_v55 = vpack.c.bf16 %v1629_v42, %v1626_v26 }
0x2042   :  { %v4290_v8 = vpack.c.bf16 %v1621_v3, %v1618_v58 }
0x209f   :  { %v2121_v29 = vpop.f32.mrb[40].mxu0 }
0x20a0   :  { %v2128_v47 = vadd.f32 %v2121_v29, %v2078_v57  ;;  %v2890_v21 = vpop.f32.mrb[41].mxu0 }
0x20a1   :  { %v2124_v5 = vpop.f32.mrb[42].mxu0 }
0x20a2   :  { %3174 = vtanh.f32 %v2128_v47  ;;  %v2129_v34 = vadd.f32 %v2124_v5, %v2079_v62  ;;  %v2891_v63 = vpop.f32.mrb[43].mxu0  ;;  %v2660_v17 = vmul.f32 -1.442695, %v2128_v47 }
0x20a4   :  { %3176 = vtanh.f32 %v2129_v34  ;;  %v2661_v43 = vmul.f32 -1.442695, %v2129_v34 }
0x20a5   :  { %3178 = vpow2.f32 %v2660_v17 }
0x20a6   :  { %3180 = vpow2.f32 %v2661_v43 }
0x20ac   :  { %v3175_v14 = vpop.eup %3174 }
0x20ad   :  { %2148 = vrot.lane.b32.xlu1 %v3175_v14, %s3248_s26 }
0x20ae   :  { %v3177_v20 = vpop.eup %3176 }
0x20af   :  { %2150 = vrot.lane.b32.xlu0 %v3177_v20, %s3248_s26  ;;  %v3179_v11 = vpop.eup %3178 }
0x20b0   :  { %v3181_v52 = vpop.eup %3180  ;;  %v2136_v31 = vadd.f32 1.0, %v3179_v11 }
0x20b1   :  { %v2137_v50 = vadd.f32 1.0, %v3181_v52 }
0x20b2   :  { %3182 = vrcp.f32 %v2136_v31 }
0x20b3   :  { %3184 = vrcp.f32 %v2137_v50 }
0x20bc   :  { %v3183_v10 = vpop.eup %3182 }
0x20bd   :  { %v3185_v37 = vpop.eup %3184  ;;  %v2144_v36 = vmul.f32 %v3183_v10, %v2075_v23 }
0x20be   :  { %v2145_v18 = vmul.f32 %v3185_v37, %v2076_v32 }
0x211f   :  { %v2149_v1 = vpop.permute.xlu1 %2148 }
0x2120   :  { %v2154_v56 = vmul.f32 %v3183_v10, %v2149_v1 }
0x2121   :  { %v2151_v24 = vpop.permute.xlu0 %2150 }
0x2122   :  { %2158 = vrot.lane.b32.xlu1 %v2154_v56, %s3248_s26  ;;  %v2155_v19 = vmul.f32 %v3185_v37, %v2151_v24 }
0x2124   :  { %2160 = vrot.lane.b32.xlu0 %v2155_v19, %s3248_s26 }
0x2194   :  { %v2159_v46 = vpop.permute.xlu1 %2158 }
0x2195   :  { %v2164_v44 = vadd.f32 %v2159_v46, %v2144_v36  ;;  %v2288_v46 = vunpack.c.l.bf16 %v4290_v8 }
0x2196   :  { %v2161_v28 = vpop.permute.xlu0 %2160 }
0x2197   :  { %3186 = vtanh.f32 %v2164_v44  ;;  %v2165_v15 = vadd.f32 %v2161_v28, %v2145_v18  ;;  %v2180_v14 = vsel %vm1106_vm10, %v2164_v44, %v2075_v23  ;;  %v2289_v28 = vunpack.c.h.bf16 %v4290_v8 }
0x2199   :  { %3188 = vtanh.f32 %v2165_v15  ;;  %v2181_v11 = vsel %vm1107_vm11, %v2165_v15, %v2076_v32 }
0x21a1   :  { %v3187_v27 = vpop.eup %3186 }
0x21a2   :  { %2170 = vrot.lane.b32.xlu1 %v3187_v27, %s3248_s26 }
0x21a3   :  { %v3189_v0 = vpop.eup %3188 }
0x21a4   :  { %2172 = vrot.lane.b32.xlu0 %v3189_v0, %s3248_s26 }
0x2214   :  { %v2171_v6 = vpop.permute.xlu1 %2170 }
0x2215   :  { %v2176_v9 = vmul.f32 %v3183_v10, %v2171_v6 }
0x2216   :  { %v2173_v39 = vpop.permute.xlu0 %2172 }
0x2217   :  { %v2177_v13 = vmul.f32 %v3185_v37, %v2173_v39  ;;  %v2178_v61 = vsel %vm1106_vm10, %v2176_v9, %v4264_v41  ;;  %v2183_v41 = vunpack.c.l.bf16 %v4008_v35 }
0x2219   :  { %v2179_v33 = vsel %vm1107_vm11, %v2177_v13, %v4269_v4 }
0x221a   :  { %v2185_v7 = vpack.c.bf16 %v2179_v33, %v2178_v61 }
0x221c   :  { %2187 = vrot.lane.b32.xlu1 %v2185_v7, %s3249_s29 }
0x228e   :  { %v2188_v45 = vpop.permute.xlu1 %2187 }
0x228f   :  { %2897 = vmatmul.mubr.msk.bf16.vlgmr.msra.gmra.mrb[40].mxu1 %vm60_vm0, %v2188_v45 }
0x2290   :  { %2909 = vmatpush3.bf16.msra.mxu1 %v4043_v38  ;;  %2912 = vmatprep.mubr.msk.bf16.mxu1 %vm3246_vm1, %v3245_v30 }
0x2291   :  { %2910 = vmatprep.subr.bf16.mxu1 %v3245_v30 }
0x2294   :  { %2911 = vmatpush3.bf16.msra.mxu1 %v4054_v54 }
0x2362   :  { %v2226_v40 = vpop.f32.mrb[40].mxu1 }
0x2363   :  { %v2233_v25 = vadd.f32 %v2226_v40, %v2183_v41  ;;  %v2898_v4 = vpop.f32.mrb[41].mxu1 }
0x2364   :  { %v2229_v26 = vpop.f32.mrb[42].mxu1 }
0x2365   :  { %3190 = vtanh.f32 %v2233_v25  ;;  %v2234_v42 = vadd.f32 %v2229_v26, %v2184_v12  ;;  %v2899_v22 = vpop.f32.mrb[43].mxu1  ;;  %v2663_v30 = vmul.f32 -1.442695, %v2233_v25 }
0x2367   :  { %3192 = vtanh.f32 %v2234_v42  ;;  %v2664_v54 = vmul.f32 -1.442695, %v2234_v42 }
0x2368   :  { %3194 = vpow2.f32 %v2663_v30 }
0x2369   :  { %3196 = vpow2.f32 %v2664_v54 }
0x236f   :  { %v3191_v38 = vpop.eup %3190 }
0x2370   :  { %2253 = vrot.lane.b32.xlu0 %v3191_v38, %s3248_s26 }
0x2371   :  { %v3193_v58 = vpop.eup %3192 }
0x2372   :  { %2255 = vrot.lane.b32.xlu1 %v3193_v58, %s3248_s26  ;;  %v3195_v3 = vpop.eup %3194 }
0x2373   :  { %v3197_v57 = vpop.eup %3196  ;;  %v2241_v29 = vadd.f32 1.0, %v3195_v3 }
0x2374   :  { %v2242_v47 = vadd.f32 1.0, %v3197_v57 }
0x2375   :  { %3198 = vrcp.f32 %v2241_v29 }
0x2376   :  { %3200 = vrcp.f32 %v2242_v47 }
0x237f   :  { %v3199_v35 = vpop.eup %3198 }
0x2380   :  { %v3201_v5 = vpop.eup %3200  ;;  %v2249_v20 = vmul.f32 %v3199_v35, %v2180_v14 }
0x2381   :  { %v2250_v52 = vmul.f32 %v3201_v5, %v2181_v11 }
0x23e2   :  { %v2254_v21 = vpop.permute.xlu0 %2253 }
0x23e3   :  { %v2259_v62 = vmul.f32 %v3199_v35, %v2254_v21 }
0x23e4   :  { %v2256_v34 = vpop.permute.xlu1 %2255 }
0x23e5   :  { %2263 = vrot.lane.b32.xlu0 %v2259_v62, %s3248_s26  ;;  %v2260_v63 = vmul.f32 %v3201_v5, %v2256_v34 }
0x23e7   :  { %2265 = vrot.lane.b32.xlu1 %v2260_v63, %s3248_s26  ;;  %v2393_v63 = vunpack.c.l.bf16 %v4288_v55 }
0x2457   :  { %v2264_v17 = vpop.permute.xlu0 %2263 }
0x2458   :  { %v2269_v43 = vadd.f32 %v2264_v17, %v2249_v20 }
0x2459   :  { %v2266_v31 = vpop.permute.xlu1 %2265 }
0x245a   :  { %3202 = vtanh.f32 %v2269_v43  ;;  %v2270_v50 = vadd.f32 %v2266_v31, %v2250_v52  ;;  %v2285_v26 = vsel %vm1227_vm6, %v2269_v43, %v2180_v14  ;;  %v2394_v43 = vunpack.c.h.bf16 %v4288_v55 }
0x245c   :  { %3204 = vtanh.f32 %v2270_v50  ;;  %v2286_v58 = vsel %vm1228_vm7, %v2270_v50, %v2181_v11 }
0x2464   :  { %v3203_v10 = vpop.eup %3202 }
0x2465   :  { %2275 = vrot.lane.b32.xlu0 %v3203_v10, %s3248_s26 }
0x2466   :  { %v3205_v1 = vpop.eup %3204 }
0x2467   :  { %2277 = vrot.lane.b32.xlu1 %v3205_v1, %s3248_s26 }
0x24d7   :  { %v2276_v56 = vpop.permute.xlu0 %2275 }
0x24d8   :  { %v2281_v48 = vmul.f32 %v3199_v35, %v2276_v56 }
0x24d9   :  { %v2278_v37 = vpop.permute.xlu1 %2277 }
0x24da   :  { %v2282_v24 = vmul.f32 %v3201_v5, %v2278_v37  ;;  %v2283_v19 = vsel %vm1227_vm6, %v2281_v48, %v2178_v61 }
0x24dc   :  { %v2284_v53 = vsel %vm1228_vm7, %v2282_v24, %v2179_v33 }
0x24dd   :  { %v2290_v23 = vpack.c.bf16 %v2284_v53, %v2283_v19 }
0x24df   :  { %2292 = vrot.lane.b32.xlu0 %v2290_v23, %s3249_s29 }
0x2551   :  { %v2293_v36 = vpop.permute.xlu0 %2292 }
0x2552   :  { %2905 = vmatmul.mubr.msk.bf16.vlgmr.msra.gmra.mrb[44].mxu0 %vm60_vm0, %v2293_v36 }
0x2625   :  { %v2331_v44 = vpop.f32.mrb[44].mxu0 }
0x2626   :  { %v2338_v32 = vadd.f32 %v2331_v44, %v2288_v46  ;;  %v2906_v18 = vpop.f32.mrb[45].mxu0 }
0x2627   :  { %v2334_v15 = vpop.f32.mrb[46].mxu0 }
0x2628   :  { %3206 = vtanh.f32 %v2338_v32  ;;  %v2339_v27 = vadd.f32 %v2334_v15, %v2289_v28  ;;  %v2907_v0 = vpop.f32.mrb[47].mxu0  ;;  %v2666_v39 = vmul.f32 -1.442695, %v2338_v32 }
0x262a   :  { %3208 = vtanh.f32 %v2339_v27  ;;  %v2667_v13 = vmul.f32 -1.442695, %v2339_v27 }
0x262b   :  { %3210 = vpow2.f32 %v2666_v39  ;;  %v2495_v39 = vld [vmem:[%s4416_s10] sm:$0xff] }
0x262c   :  { %3212 = vpow2.f32 %v2667_v13  ;;  %v2497_v13 = vld [vmem:[%s4416_s10 + $0x10] sm:$0xff] }
0x2632   :  { %v3207_v6 = vpop.eup %3206 }
0x2633   :  { %2358 = vrot.lane.b32.xlu1 %v3207_v6, %s3248_s26 }
0x2634   :  { %v3209_v9 = vpop.eup %3208 }
0x2635   :  { %2360 = vrot.lane.b32.xlu0 %v3209_v9, %s3248_s26  ;;  %v3211_v61 = vpop.eup %3210 }
0x2636   :  { %v3213_v33 = vpop.eup %3212  ;;  %v2346_v7 = vadd.f32 1.0, %v3211_v61  ;;  %v2927_v61 = vpack.c.bf16 %v2496_v49, %v2495_v39 }
0x2637   :  { %v2347_v45 = vadd.f32 1.0, %v3213_v33  ;;  %v2931_v33 = vpack.c.bf16 %v2498_v60, %v2497_v13 }
0x2638   :  { %3214 = vrcp.f32 %v2346_v7  ;;  %2928 = vmatprep.subr.bf16.mxu0 %v2927_v61 }
0x2639   :  { %3216 = vrcp.f32 %v2347_v45  ;;  %2930 = vmatpush3.bf16.msra.mxu0 %v2927_v61 }
0x263a   :  { %2932 = vmatprep.subr.bf16.mxu0 %v2931_v33 }
0x263d   :  { %2934 = vmatpush3.bf16.msra.mxu0 %v2931_v33 }
0x2642   :  { %v3215_v8 = vpop.eup %3214 }
0x2643   :  { %v3217_v25 = vpop.eup %3216  ;;  %v2354_v42 = vmul.f32 %v3215_v8, %v2285_v26 }
0x2644   :  { %v2355_v30 = vmul.f32 %v3217_v25, %v2286_v58 }
0x26a5   :  { %v2359_v41 = vpop.permute.xlu1 %2358 }
0x26a6   :  { %v2364_v40 = vmul.f32 %v3215_v8, %v2359_v41 }
0x26a7   :  { %v2361_v4 = vpop.permute.xlu0 %2360 }
0x26a8   :  { %2368 = vrot.lane.b32.xlu1 %v2364_v40, %s3248_s26  ;;  %v2365_v12 = vmul.f32 %v3217_v25, %v2361_v4 }
0x26aa   :  { %2370 = vrot.lane.b32.xlu0 %v2365_v12, %s3248_s26 }
0x271a   :  { %v2369_v22 = vpop.permute.xlu1 %2368 }
0x271b   :  { %v2374_v38 = vadd.f32 %v2369_v22, %v2354_v42 }
0x271c   :  { %v2371_v54 = vpop.permute.xlu0 %2370 }
0x271d   :  { %3218 = vtanh.f32 %v2374_v38  ;;  %v2375_v3 = vadd.f32 %v2371_v54, %v2355_v30  ;;  %v2390_v32 = vsel %vm1348_vm14, %v2374_v38, %v2285_v26 }
0x271f   :  { %3220 = vtanh.f32 %v2375_v3  ;;  %v2391_v27 = vsel %vm1349_vm15, %v2375_v3, %v2286_v58 }
0x2727   :  { %v3219_v57 = vpop.eup %3218 }
0x2728   :  { %2380 = vrot.lane.b32.xlu1 %v3219_v57, %s3248_s26 }
0x2729   :  { %v3221_v29 = vpop.eup %3220 }
0x272a   :  { %2382 = vrot.lane.b32.xlu0 %v3221_v29, %s3248_s26 }
0x279a   :  { %v2381_v47 = vpop.permute.xlu1 %2380 }
0x279b   :  { %v2386_v59 = vmul.f32 %v3215_v8, %v2381_v47 }
0x279c   :  { %v2383_v35 = vpop.permute.xlu0 %2382 }
0x279d   :  { %v2387_v21 = vmul.f32 %v3217_v25, %v2383_v35  ;;  %v4353_v62 = vsel %vm1348_vm14, %v2386_v59, %v2283_v19 }
0x279f   :  { %v4357_v51 = vsel %vm1349_vm15, %v2387_v21, %v2284_v53 }
0x27a0   :  { %v2395_v5 = vpack.c.bf16 %v4357_v51, %v4353_v62 }
0x27a2   :  { %2397 = vrot.lane.b32.xlu1 %v2395_v5, %s3249_s29 }
0x2814   :  { %v2398_v34 = vpop.permute.xlu1 %2397 }
0x2815   :  { %2913 = vmatmul.mubr.msk.bf16.vlgmr.msra.gmra.mrb[44].mxu1 %vm60_vm0, %v2398_v34 }
0x28e8   :  { %v2436_v14 = vpop.f32.mrb[44].mxu1 }
0x28e9   :  { %v2443_v20 = vadd.f32 %v2436_v14, %v2393_v63  ;;  %v2914_v17 = vpop.f32.mrb[45].mxu1 }
0x28ea   :  { %v2439_v11 = vpop.f32.mrb[46].mxu1 }
0x28eb   :  { %3222 = vtanh.f32 %v2443_v20  ;;  %v2444_v52 = vadd.f32 %v2439_v11, %v2394_v43  ;;  %v2915_v31 = vpop.f32.mrb[47].mxu1  ;;  %v2669_v1 = vmul.f32 -1.442695, %v2443_v20 }
0x28ed   :  { %3224 = vtanh.f32 %v2444_v52  ;;  %v2670_v56 = vmul.f32 -1.442695, %v2444_v52 }
0x28ee   :  { %3226 = vpow2.f32 %v2669_v1 }
0x28ef   :  { %3228 = vpow2.f32 %v2670_v56 }
0x28f5   :  { %v3223_v50 = vpop.eup %3222 }
0x28f6   :  { %2463 = vrot.lane.b32.xlu0 %v3223_v50, %s3248_s26 }
0x28f7   :  { %v3225_v10 = vpop.eup %3224 }
0x28f8   :  { %2465 = vrot.lane.b32.xlu1 %v3225_v10, %s3248_s26  ;;  %v3227_v48 = vpop.eup %3226 }
0x28f9   :  { %v3229_v37 = vpop.eup %3228  ;;  %v2451_v24 = vadd.f32 1.0, %v3227_v48 }
0x28fa   :  { %v2452_v19 = vadd.f32 1.0, %v3229_v37 }
0x28fb   :  { %3230 = vrcp.f32 %v2451_v24 }
0x28fc   :  { %3232 = vrcp.f32 %v2452_v19 }
0x2905   :  { %v3231_v55 = vpop.eup %3230 }
0x2906   :  { %v3233_v36 = vpop.eup %3232  ;;  %v2459_v18 = vmul.f32 %v3231_v55, %v2390_v32 }
0x2907   :  { %v2460_v0 = vmul.f32 %v3233_v36, %v2391_v27 }
0x2968   :  { %v2464_v53 = vpop.permute.xlu0 %2463 }
0x2969   :  { %v2469_v23 = vmul.f32 %v3231_v55, %v2464_v53 }
0x296a   :  { %v2466_v46 = vpop.permute.xlu1 %2465 }
0x296b   :  { %2473 = vrot.lane.b32.xlu0 %v2469_v23, %s3248_s26  ;;  %v2470_v44 = vmul.f32 %v3233_v36, %v2466_v46 }
0x296d   :  { %2475 = vrot.lane.b32.xlu1 %v2470_v44, %s3248_s26 }
0x29dd   :  { %v2474_v28 = vpop.permute.xlu0 %2473 }
0x29de   :  { %v2479_v15 = vadd.f32 %v2474_v28, %v2459_v18 }
0x29df   :  { %v2476_v6 = vpop.permute.xlu1 %2475 }
0x29e0   :  { %3234 = vtanh.f32 %v2479_v15  ;;  %v2480_v9 = vadd.f32 %v2476_v6, %v2460_v0 }
0x29e2   :  { %3236 = vtanh.f32 %v2480_v9 }
0x29ea   :  { %v3235_v7 = vpop.eup %3234 }
0x29eb   :  { %2485 = vrot.lane.b32.xlu0 %v3235_v7, %s3248_s26 }
0x29ec   :  { %v3237_v45 = vpop.eup %3236 }
0x29ed   :  { %2487 = vrot.lane.b32.xlu1 %v3237_v45, %s3248_s26 }
0x2a5d   :  { %v2486_v8 = vpop.permute.xlu0 %2485 }
0x2a5e   :  { %v2491_v41 = vmul.f32 %v3231_v55, %v2486_v8 }
0x2a5f   :  { %v2488_v40 = vpop.permute.xlu1 %2487 }
0x2a60   :  { %v2493_v25 = vsel %vm1469_vm8, %v2491_v41, %v4353_v62  ;;  %v2492_v4 = vmul.f32 %v3233_v36, %v2488_v40 }
0x2a61   :  { %2508 = vrot.lane.b32.xlu0 %v2493_v25, %s3249_s29 }
0x2a62   :  { %v2494_v12 = vsel %vm1470_vm9, %v2492_v4, %v4357_v51 }
0x2a63   :  { %2510 = vrot.lane.b32.xlu1 %v2494_v12, %s3249_s29 }
0x2ad3   :  { %v2509_v26 = vpop.permute.xlu0 %2508 }
0x2ad4   :  { %2924 = vmatprep.mubr.msk.f32.mxu0 %vm60_vm0, %v2509_v26 }
0x2ad5   :  { %v2511_v42 = vpop.permute.xlu1 %2510 }
0x2ad6   :  { %2925 = vmatmul.mubr.msk.f32.vlgmr.msra.gmra.mrb[48].mxu0 %vm60_vm0, %v2511_v42 }
0x2ba9   :  { %v2926_v22 = vpop.f32.mrb[48].mxu0 }
0x2baa   :  { %v2588_v38 = vadd.f32 %v2926_v22, %v2671_v16  ;;  %v2582_v58 = vpop.f32.mrb[49].mxu0 }
0x2bab   :  { %v2583_v30 = vadd.f32 %v2671_v16, %v2582_v58 }
0x2bac   :  { %2592 = vst [vmem:[%s4418_s12 + $0x8] sm:$0xff] %v2588_v38 }
0x2bad   :  { %2591 = vst [vmem:[%s4418_s12] sm:$0xff] %v2583_v30 }

</bundles_post_ra>
